<compile_context>
chip_gen: v7x
topology: tpu7x:2x2x1
jax: 0.10.0
libtpu: 0.0.40
codegen_flags: <defaults>
</compile_context>

<pallas_src>
import functools

import jax
import jax.numpy as jnp
from jax.experimental import pallas as pl
from jax.experimental.pallas import tpu as pltpu


def _round_up(x, m):
    return ((x + m - 1) // m) * m


def _mlp_kernel(x_ref, w1_ref, b1_ref, w2_ref, o_ref):
    # Grid: (split s [core-parallel on v7x], hidden-tile h [reduction])
    h = pl.program_id(1)

    @pl.when(h == 0)
    def _init():
        # Fresh resident output block for this split -> start the partial at 0.
        o_ref[...] = jnp.zeros_like(o_ref)

    # Hidden tile: relu(x @ W1_tile + b1_tile).  bf16 inputs, f32 accumulation
    # on the MXU; bias-add / ReLU in f32 (no bf16 VPU on v5e).
    hid = jnp.dot(x_ref[...], w1_ref[0], preferred_element_type=jnp.float32)
    hid = jnp.maximum(hid + b1_ref[...], 0.0)

    # Accumulate this hidden tile's contribution to the split's partial logits.
    o_ref[0] += jnp.dot(hid.astype(w2_ref.dtype), w2_ref[...],
                        preferred_element_type=jnp.float32)


def prepare_params(w1, b1, w2, b2, *, hidden_tile=2048, num_splits=1,
                   weight_dtype=jnp.bfloat16):
    """Pad / cast / tile the parameters ONCE at init time.

    w1: (D_in, H), b1: (H,), w2: (H, C), b2: (C,)
    Returns:
      w1t: (n_tiles, Dp, hidden_tile) weight_dtype  -- contiguous per-tile W1
      b1p: (1, Hp) f32
      w2p: (Hp, Cp) weight_dtype
      b2 : (C,) f32
    Zero padding is exact: padded hidden units give relu(0 + 0) = 0 and padded
    class columns are sliced off in the wrapper.
    """
    assert hidden_tile % 128 == 0, "hidden_tile must be a multiple of 128"
    D, H = w1.shape
    C = w2.shape[1]
    Dp = _round_up(D, 8)                 # sublane alignment only (no 128 pad)
    Cp = _round_up(C, 128)
    Hp = _round_up(H, hidden_tile * num_splits)
    n_tiles = Hp // hidden_tile

    w1p = jnp.zeros((Dp, Hp), jnp.float32).at[:D, :H].set(w1.astype(jnp.float32))
    # Pre-tile: (Dp, Hp) -> (n_tiles, Dp, hidden_tile); each tile contiguous.
    w1t = jnp.transpose(w1p.reshape(Dp, n_tiles, hidden_tile), (1, 0, 2))
    w1t = w1t.astype(weight_dtype)

    b1p = jnp.zeros((1, Hp), jnp.float32).at[0, :H].set(b1.astype(jnp.float32))
    w2p = jnp.zeros((Hp, Cp), jnp.float32).at[:H, :C].set(w2.astype(jnp.float32))
    w2p = w2p.astype(weight_dtype)
    return w1t, b1p, w2p, b2.astype(jnp.float32)


@functools.partial(jax.jit, static_argnames=("num_splits",))
def mlp_forward(x, w1t, b1p, w2p, b2, *, num_splits=1):
    """x: (B, D_in); prepared params from prepare_params -> (B, C) f32 logits."""
    B, D = x.shape
    n_tiles, Dp, hidden_tile = w1t.shape
    Hp, Cp = w2p.shape
    C = b2.shape[0]
    Bp = _round_up(B, 8)

    # Robustness: a prepare/forward mismatch would silently mis-tile W1.
    assert Hp == n_tiles * hidden_tile, "W1 tiling does not match W2 padding"
    assert n_tiles % num_splits == 0, "num_splits must divide the tile count"
    tiles_per_split = n_tiles // num_splits

    cdt = w1t.dtype  # streamed / dot-input dtype (bf16 by default)
    # Only the tiny activation is padded / cast per call.
    xp = jnp.zeros((Bp, Dp), cdt).at[:B, :D].set(x.astype(cdt))

    # CORE_PARALLEL shards the split axis across v7x's two TensorCores; on
    # single-TC chips keep num_splits=1 (axis is then trivially sequential).
    sem0 = pltpu.CORE_PARALLEL if num_splits > 1 else pltpu.ARBITRARY

    partials = pl.pallas_call(
        _mlp_kernel,
        out_shape=jax.ShapeDtypeStruct((num_splits, Bp, Cp), jnp.float32),
        grid=(num_splits, tiles_per_split),
        in_specs=[
            # x: tiny, resident across the whole grid
            pl.BlockSpec((Bp, Dp), lambda s, h: (0, 0)),
            # W1 tile: one contiguous (Dp, hidden_tile) slab per grid step
            pl.BlockSpec((1, Dp, hidden_tile),
                         lambda s, h: (s * tiles_per_split + h, 0, 0)),
            # b1 tile
            pl.BlockSpec((1, hidden_tile),
                         lambda s, h: (0, s * tiles_per_split + h)),
            # W2 tile: (hidden_tile, Cp), contiguous rows
            pl.BlockSpec((hidden_tile, Cp),
                         lambda s, h: (s * tiles_per_split + h, 0)),
        ],
        # One resident f32 partial-logit block per split (accumulated in place).
        out_specs=pl.BlockSpec((1, Bp, Cp), lambda s, h: (s, 0, 0)),
        compiler_params=pltpu.CompilerParams(
            dimension_semantics=(sem0, pltpu.ARBITRARY),
            vmem_limit_bytes=32 * 1024 * 1024,
        ),
    )(xp, w1t, b1p, w2p)

    # Combine per-split partials, add the second-layer bias, drop padding.
    out = jnp.sum(partials, axis=0)[:B, :C] + b2
    return out


def init_params(key, inpsiz, hidensiz, numclases, dtype=jnp.float32):
    """Deterministic synthetic parameters (same shapes as the torch module)."""
    k1, k2, k3, k4 = jax.random.split(key, 4)
    s1 = 1.0 / jnp.sqrt(jnp.float32(inpsiz))
    s2 = 1.0 / jnp.sqrt(jnp.float32(hidensiz))
    w1 = jax.random.uniform(k1, (inpsiz, hidensiz), dtype, -s1, s1)
    b1 = jax.random.uniform(k2, (hidensiz,), dtype, -s1, s1)
    w2 = jax.random.uniform(k3, (hidensiz, numclases), dtype, -s2, s2)
    b2 = jax.random.uniform(k4, (numclases,), dtype, -s2, s2)
    return w1, b1, w2, b2


if __name__ == "__main__":
    # Small shapes consistent with the module's forward (784 -> hidden -> 10).
    batch = 8
    inpsiz = 784
    hidensiz = 4096   # module uses 15000; kept small for the demo, same structure
    numclases = 10

    hidden_tile = 2048
    num_splits = 1    # set >1 only on v7x (2 TensorCores, CORE_PARALLEL split)

    key = jax.random.PRNGKey(0)
    kx, kp = jax.random.split(key)
    x = jax.random.normal(kx, (batch, inpsiz), jnp.float32)
    w1, b1, w2, b2 = init_params(kp, inpsiz, hidensiz, numclases)

    # Pad / cast / tile parameters ONCE, outside the per-call forward path.
    w1t, b1p, w2p, b2f = prepare_params(
        w1, b1, w2, b2, hidden_tile=hidden_tile, num_splits=num_splits)

    out = mlp_forward(x, w1t, b1p, w2p, b2f, num_splits=num_splits)
    out = jax.block_until_ready(out)

    # Pure-JAX reference that mimics the kernel's numerics (bf16 dot inputs,
    # f32 accumulation / bias / ReLU) to validate padding + tiling exactly.
    xb = x.astype(jnp.bfloat16)
    w1b = w1.astype(jnp.bfloat16)
    w2b = w2.astype(jnp.bfloat16)
    hid = jnp.maximum(
        jnp.dot(xb, w1b, preferred_element_type=jnp.float32) + b1, 0.0)
    ref = jnp.dot(hid.astype(jnp.bfloat16), w2b,
                  preferred_element_type=jnp.float32) + b2

    assert out.shape == (batch, numclases)
    assert jnp.allclose(out, ref, atol=2e-3, rtol=2e-3), \
        float(jnp.max(jnp.abs(out - ref)))

    print("KERNEL_OK")
</pallas_src>

<mosaic_0001>
module attributes {stable_mosaic.version = 11 : i64} {
  func.func @_mlp_kernel(%arg0: i32, %arg1: i32, %arg2: memref<8x784xbf16, #tpu.memory_space<vmem>>, %arg3: memref<1x784x2048xbf16, #tpu.memory_space<vmem>>, %arg4: memref<1x2048xf32, #tpu.memory_space<vmem>>, %arg5: memref<2048x128xbf16, #tpu.memory_space<vmem>>, %arg6: memref<1x8x128xf32, #tpu.memory_space<vmem>>) attributes {dimension_semantics = [#tpu.dimension_semantics<arbitrary>, #tpu.dimension_semantics<arbitrary>], iteration_bounds = array<i64: 1, 2>, scalar_prefetch = 0 : i64, scratch_operands = 0 : i64, tpu.core_type = #tpu.core_type<tc>, window_params = [{pipeline_mode = #tpu.pipeline_mode<synchronous>, transform_indices = @transform_0, window_bounds = array<i64: 8, 784>}, {transform_indices = @transform_1, window_bounds = array<i64: 1, 784, 2048>}, {transform_indices = @transform_2, window_bounds = array<i64: 1, 2048>}, {transform_indices = @transform_3, window_bounds = array<i64: 2048, 128>}, {transform_indices = @transform_4, window_bounds = array<i64: 1, 8, 128>}]} {
    %c0_i32 = arith.constant 0 : i32
    %0 = arith.cmpi eq, %arg1, %c0_i32 : i32
    %1 = arith.extui %0 : i1 to i32
    %c0_i32_0 = arith.constant 0 : i32
    %2 = arith.cmpi ne, %1, %c0_i32_0 : i32
    scf.if %2 {
      %cst_17 = arith.constant 0.000000e+00 : f32
      %21 = vector.broadcast %cst_17 : f32 to vector<1x8x128xf32>
      %c0_18 = arith.constant 0 : index
      %c0_19 = arith.constant 0 : index
      %c0_20 = arith.constant 0 : index
      %22 = vector.load %arg6[%c0_18, %c0_19, %c0_20] : memref<1x8x128xf32, #tpu.memory_space<vmem>>, vector<1x8x128xf32>
      tpu.vector_store %arg6[%c0_18, %c0_19, %c0_20], %21 {strides = array<i32>} : memref<1x8x128xf32, #tpu.memory_space<vmem>>, vector<1x8x128xf32>,
    } else {
    }
    %c0 = arith.constant 0 : index
    %c0_1 = arith.constant 0 : index
    %3 = vector.load %arg2[%c0, %c0_1] : memref<8x784xbf16, #tpu.memory_space<vmem>>, vector<8x784xbf16>
    %c0_2 = arith.constant 0 : index
    %c0_3 = arith.constant 0 : index
    %c0_4 = arith.constant 0 : index
    %4 = vector.load %arg3[%c0_2, %c0_3, %c0_4] : memref<1x784x2048xbf16, #tpu.memory_space<vmem>>, vector<1x784x2048xbf16>
    %5 = vector.shape_cast %4 : vector<1x784x2048xbf16> to vector<784x2048xbf16>
    %cst = arith.constant dense<0.000000e+00> : vector<8x2048xf32>
    %6 = tpu.matmul %3, %5, %cst {dimension_numbers = #tpu.dot_dimension_numbers<[1], [0], [0], [1], [0, 0, 1, 1], [], []>} : vector<8x784xbf16>, vector<784x2048xbf16>, vector<8x2048xf32> -> vector<8x2048xf32>
    %c0_5 = arith.constant 0 : index
    %c0_6 = arith.constant 0 : index
    %7 = vector.load %arg4[%c0_5, %c0_6] : memref<1x2048xf32, #tpu.memory_space<vmem>>, vector<1x2048xf32>
    %8 = vector.broadcast %7 : vector<1x2048xf32> to vector<8x2048xf32>
    %9 = arith.addf %6, %8 : vector<8x2048xf32>
    %cst_7 = arith.constant 0.000000e+00 : f32
    %10 = vector.broadcast %cst_7 : f32 to vector<8x2048xf32>
    %11 = arith.maximumf %9, %10 : vector<8x2048xf32>
    %c0_8 = arith.constant 0 : index
    %c0_9 = arith.constant 0 : index
    %c0_10 = arith.constant 0 : index
    %12 = vector.load %arg6[%c0_8, %c0_9, %c0_10] : memref<1x8x128xf32, #tpu.memory_space<vmem>>, vector<1x8x128xf32>
    %13 = vector.shape_cast %12 : vector<1x8x128xf32> to vector<8x128xf32>
    %14 = arith.truncf %11 : vector<8x2048xf32> to vector<8x2048xbf16>
    %c0_11 = arith.constant 0 : index
    %c0_12 = arith.constant 0 : index
    %15 = vector.load %arg5[%c0_11, %c0_12] : memref<2048x128xbf16, #tpu.memory_space<vmem>>, vector<2048x128xbf16>
    %cst_13 = arith.constant dense<0.000000e+00> : vector<8x128xf32>
    %16 = tpu.matmul %14, %15, %cst_13 {dimension_numbers = #tpu.dot_dimension_numbers<[1], [0], [0], [1], [0, 0, 1, 1], [], []>} : vector<8x2048xbf16>, vector<2048x128xbf16>, vector<8x128xf32> -> vector<8x128xf32>
    %17 = arith.addf %13, %16 : vector<8x128xf32>
    %c0_14 = arith.constant 0 : index
    %c0_15 = arith.constant 0 : index
    %c0_16 = arith.constant 0 : index
    %18 = vector.load %arg6[%c0_14, %c0_15, %c0_16] : memref<1x8x128xf32, #tpu.memory_space<vmem>>, vector<1x8x128xf32>
    %19 = vector.shape_cast %18 : vector<1x8x128xf32> to vector<8x128xf32>
    %20 = vector.shape_cast %17 : vector<8x128xf32> to vector<1x8x128xf32>
    tpu.vector_store %arg6[%c0_14, %c0_15, %c0_16], %20 {strides = array<i32>} : memref<1x8x128xf32, #tpu.memory_space<vmem>>, vector<1x8x128xf32>,
    return
  }
  func.func @transform_0(%arg0: i32, %arg1: i32) -> (i32, i32) {
    %c0_i32 = arith.constant 0 : i32
    %c0_i32_0 = arith.constant 0 : i32
    %c0_i32_1 = arith.constant 0 : i32
    return %c0_i32, %c0_i32_0 : i32, i32
  }
  func.func @transform_1(%arg0: i32, %arg1: i32) -> (i32, i32, i32) {
    %c2_i32 = arith.constant 2 : i32
    %0 = arith.muli %arg0, %c2_i32 : i32
    %1 = arith.addi %0, %arg1 : i32
    %c0_i32 = arith.constant 0 : i32
    %c0_i32_0 = arith.constant 0 : i32
    %c0_i32_1 = arith.constant 0 : i32
    return %1, %c0_i32, %c0_i32_0 : i32, i32, i32
  }
  func.func @transform_2(%arg0: i32, %arg1: i32) -> (i32, i32) {
    %c2_i32 = arith.constant 2 : i32
    %0 = arith.muli %arg0, %c2_i32 : i32
    %1 = arith.addi %0, %arg1 : i32
    %c0_i32 = arith.constant 0 : i32
    %c0_i32_0 = arith.constant 0 : i32
    return %c0_i32, %1 : i32, i32
  }
  func.func @transform_3(%arg0: i32, %arg1: i32) -> (i32, i32) {
    %c2_i32 = arith.constant 2 : i32
    %0 = arith.muli %arg0, %c2_i32 : i32
    %1 = arith.addi %0, %arg1 : i32
    %c0_i32 = arith.constant 0 : i32
    %c0_i32_0 = arith.constant 0 : i32
    return %1, %c0_i32 : i32, i32
  }
  func.func @transform_4(%arg0: i32, %arg1: i32) -> (i32, i32, i32) {
    %c0_i32 = arith.constant 0 : i32
    %c0_i32_0 = arith.constant 0 : i32
    %c0_i32_1 = arith.constant 0 : i32
    return %arg0, %c0_i32, %c0_i32_0 : i32, i32, i32
  }
}

</mosaic_0001>

<bundles_post_ra>
// kernel: mlp_forward.1
= control target key start
LH: loop header
LB: loop body
LE: loop exit
PB: predicated region body
PF: predicated region fallthrough
CT: control target
= control target key end

     0   :  { %9 = vsyncpa [#allocation3], 0  ;;  %s10920_s0 = inlined_call_operand.vmem [shape: bf16[8,784], index: 0, kind: input, shape index: {}]   ;;  %s10921_s1 = inlined_call_operand.hbm [shape: bf16[2,784,2048], index: 1, kind: input, shape index: {}]   ;;  %s10922_s2 = inlined_call_operand.hbm [shape: f32[1,4096], index: 2, kind: input, shape index: {}]   ;;  %s10923_s3 = inlined_call_operand.hbm [shape: bf16[4096,128], index: 3, kind: input, shape index: {}]   ;;  %s10924_s4 = inlined_call_operand.vmem [shape: f32[1,8,128], index: 4, kind: output, shape index: {}]  }
   0x1   :  { %11 = vsyncpa [#allocation3 + $0x1], 0 }
   0x2   :  { %12 = vsyncpa [#allocation5], 0 }
   0x3   :  { %14 = vsyncpa [#allocation5 + $0x1], 0  ;;  %s9589_s15 = smov 0   ;;  %s9591_s16 = smov 0  }
   0x4   :  { %s9593_s17 = smov 0   ;;  %s9595_s18 = smov 0  }
   0x5   :  { %s9597_s19 = smov 0   ;;  %s9599_s20 = smov 0  }
   0x6 LB: > { %s10926_s21 = sadd.s32 4294967295, %s9554_s20   ;;  %s29_s22 = sadd.s32 1, %s9550_s19  ;;  %s9554_s20 = sphi %s9599_s20, %s20_s20   ;;  %s9550_s19 = sphi %s9597_s19, %s10938_s19   ;;  %s9546_s18 = sphi %s9595_s18, %s10937_s18   ;;  %s9542_s17 = sphi %s9593_s17, %s10936_s17   ;;  %s9538_s16 = sphi %s9591_s16, %s10935_s16   ;;  %s9534_s15 = sphi %s9589_s15, %s10934_s15  }
   0x7   : > { %p30_p0 = scmp.ge.s32.totalorder %s29_s22, 2  ;;  %s64_s23 = sadd.s32 1, %s9542_s17 }
   0x8   : > { %p71_p1 = scmp.ne.s32.totalorder %s9542_s17, %s9538_s16  ;;  %p72_p2 = scmp.eq.s32.totalorder %s9554_s20, 0 }
   0x9   : > { %s10940_s22 = smov (%p30_p0, %s29_s22), 0  ;;  %p77_p4 = scmp.ne.s32.totalorder %s9538_s16, %s9534_s15 }
   0xa   : > { %p73_p3 = por %p72_p2, %p71_p1  ;;  %s61_s24 = ssub.s32 %s9550_s19, %s10940_s22 }
   0xb   : > { %p78_p5 = scmp.eq.s32.totalorder %s10926_s21, 0  ;;  %p62_p6 = scmp.eq.s32.totalorder %s61_s24, 0 }
   0xc   : > { %p9218_p8 = scmp.lt.s32.totalorder %s9554_s20, 2  ;;  %s9639_s27 = sand.u32 1, %s9542_s17  }
   0xd   : > { %p9630_p7 = por %p78_p5, %p77_p4  ;;  %s213_s29 = sand.u32 1, %s9554_s20  }
   0xe   : > { %s9636_s26 = scalar_select %p62_p6, %s9542_s17, %s64_s23  }
   0xf   : > { %s10927_s25 = scalar_select %p9630_p7, 1, 0 }
  0x10   : > { %p9641_p9 = pnand %p9218_p8, %p73_p3  ;;  %s7969_s30 = sshll.u32 %s9639_s27, 4 }
  0x11   : > { %s8909_s5 = sshll.u32 %s9550_s19, 8  ;;  %s217_s9 = scalar_lea.vmem [#allocation4], %s7969_s30 }
  0x12   : > { %s9651_s8 = scalar_lea.hbm %s10922_s2, %s8909_s5  ;;  %s227_s10 = sshll.u32 %s217_s9, 4  ;;  %s9653_s10 = int_to_ptr.vmem [resolvable:$true] %s227_s10 }
  0x13   : > { %s7972_s11 = sshll.u32 %s9639_s27, 10  ;;  %s9656_s12 = scalar_lea.sflag [#allocation5], %s213_s29 }
  0x14   : > { %s9410_s13 = scalar_lea.hbm %s9651_s8, 256  ;;  %p9662_p11 = pneg %p9641_p9 }
  0x15   : > { %p9411_p10 = scmp.ne.s32.totalorder %s9651_s8, %s9410_s13  ;;  %s9415_s24 = scalar_lea.hbm %s10922_s2, 512 }
  0x16   : > { %p9416_p0 = scmp.lt.u32.totalorder %s9651_s8, %s10922_s2  ;;  %p9417_p1 = scmp.lt.u32.totalorder %s9415_s24, %s9410_s13 }
  0x17   : > { %p9413_p12 = pnand %p9662_p11, %p9411_p10  ;;  %p9419_p3 = scmp.lt.u32.totalorder %s9410_s13, %s9651_s8 }
  0x18   : > { %p9418_p2 = por %p9417_p1, %p9416_p0 }
  0x19   : > { %p9414_p13 = pneg %p9413_p12 }
  0x1a   : > { %p9420_p4 = por %p9419_p3, %p9418_p2 }
  0x1c   : > { %p9421_p5 = pnand %p9420_p4, %p9414_p13 }
  0x1e   : > { %9424 = shalt.err (!%p9421_p5)
}
  0x1f   : > { %s9425_s29 = scalar_lea.vmem %s9653_s10, 256  ;;  %s9556_s6 = smov [#allocation4]  }
  0x20   : > { %p9426_p6 = scmp.ne.s32.totalorder %s9653_s10, %s9425_s29  ;;  %s9430_s7 = sshll.u32 %s9556_s6, 4  ;;  %s9431_s7 = int_to_ptr.vmem [resolvable:$false] %s9430_s7 }
  0x21   : > { %s9432_s9 = scalar_lea.vmem %s9431_s7, 512  ;;  %p9433_p12 = scmp.lt.s32.totalorder %s9653_s10, %s9431_s7 }
  0x22   : > { %p9428_p8 = pnand %p9426_p6, %p9662_p11  ;;  %p9434_p7 = scmp.lt.s32.totalorder %s9432_s9, %s9425_s29 }
  0x24   : > { %p9429_p10 = pneg %p9428_p8  ;;  %p9435_p0 = por %p9434_p7, %p9433_p12 }
  0x26   : > { %p9436_p1 = pnand %p9435_p0, %p9429_p10 }
  0x28   : > { %9439 = shalt.err (!%p9436_p1)
}
  0x29   : > { %9214 = dma.hbm_to_vmem [thread:$0]  (!%p9641_p9), %s9651_s8, 256, %s9653_s10, %s9656_s12  }
  0x2a   : > { %p7975_p13 = scmp.ge.s32.totalorder %s9554_s20, 1  ;;  %p255_p2 = scmp.lt.s32.totalorder %s9554_s20, 3 }
  0x2b   : > { %s9199_s15 = smul.u32 6272, %s9639_s27  ;;  %s8910_s8 = sshll.u32 %s9550_s19, 14 }
  0x2c   : > { %p9688_p3 = pnand %p7975_p13, %p255_p2  ;;  %s9200_s23 = smul.u32 100352, %s9550_s19 }
  0x2d   : > { %s194_s29 = scalar_lea.vmem [#allocation2], %s9199_s15  ;;  %s191_s10 = scalar_lea.sflag [#allocation3], %s9639_s27 }
  0x2e   : > { %s10930_s13 = scalar_select %p9688_p3, 1, 0 }
  0x2f   : > { %s9697_s5 = scalar_lea.hbm %s10921_s1, %s9200_s23  ;;  %s203_s6 = sshll.u32 %s194_s29, 4  ;;  %s9699_s6 = int_to_ptr.vmem [resolvable:$true] %s203_s6 }
  0x30   : > { %s9440_s7 = scalar_lea.hbm %s9697_s5, 100352  ;;  %s9445_s23 = scalar_lea.hbm %s10921_s1, 200704 }
  0x31   : > { %p9441_p7 = scmp.ne.s32.totalorder %s9697_s5, %s9440_s7  ;;  %p9446_p6 = scmp.lt.u32.totalorder %s9697_s5, %s10921_s1 }
  0x32   : > { %p9447_p8 = scmp.lt.u32.totalorder %s9445_s23, %s9440_s7  ;;  %p9449_p12 = scmp.lt.u32.totalorder %s9440_s7, %s9697_s5 }
  0x33   : > { %p9443_p4 = pnand %p9441_p7, %p9662_p11 }
  0x34   : > { %p9448_p10 = por %p9447_p8, %p9446_p6 }
  0x35   : > { %p9444_p5 = pneg %p9443_p4 }
  0x36   : > { %p9450_p0 = por %p9449_p12, %p9448_p10 }
  0x38   : > { %p9451_p1 = pnand %p9450_p0, %p9444_p5 }
  0x3a   : > { %9454 = shalt.err (!%p9451_p1)
}
  0x3b   : > { %s9455_s15 = scalar_lea.vmem %s9699_s6, 100352  ;;  %s9557_s21 = smov [#allocation2]  }
  0x3c   : > { %p9456_p13 = scmp.ne.s32.totalorder %s9699_s6, %s9455_s15  ;;  %s9460_s29 = sshll.u32 %s9557_s21, 4  ;;  %s9461_s29 = int_to_ptr.vmem [resolvable:$false] %s9460_s29 }
  0x3d   : > { %s9462_s9 = scalar_lea.vmem %s9461_s29, 200704  ;;  %p9463_p4 = scmp.lt.s32.totalorder %s9699_s6, %s9461_s29 }
  0x3e   : > { %p9458_p2 = pnand %p9456_p13, %p9662_p11  ;;  %p9464_p3 = scmp.lt.s32.totalorder %s9462_s9, %s9455_s15 }
  0x40   : > { %p9459_p7 = pneg %p9458_p2  ;;  %p9465_p6 = por %p9464_p3, %p9463_p4 }
  0x42   : > { %p9466_p8 = pnand %p9465_p6, %p9459_p7 }
  0x44   : > { %9469 = shalt.err (!%p9466_p8)
}
  0x45   : > { %s9558_s7 = smov 1024   ;;  %s9559_s23 = smov 64  }
  0x46   : > { %9211 = dma.hbm_to_vmem [thread:$0]  (!%p9641_p9), %s9697_s5, 100352, %s9699_s6, %s191_s10, %s9558_s7, %s9558_s7, %s9559_s23  }
  0x47   : > { %s9732_s15 = scalar_lea.hbm %s10923_s3, %s8910_s8  ;;  %s238_s21 = scalar_lea.vmem [#allocation6], %s7972_s11 }
  0x48   : > { %s247_s29 = sshll.u32 %s238_s21, 4  ;;  %s9470_s9 = scalar_lea.hbm %s9732_s15, 16384  ;;  %s9736_s29 = int_to_ptr.vmem [resolvable:$true] %s247_s29 }
  0x49   : > { %p9471_p3 = scmp.ne.s32.totalorder %s9732_s15, %s9470_s9  ;;  %s9475_s10 = scalar_lea.hbm %s10923_s3, 32768 }
  0x4a   : > { %p9476_p12 = scmp.lt.u32.totalorder %s9732_s15, %s10923_s3  ;;  %p9477_p0 = scmp.lt.u32.totalorder %s9475_s10, %s9470_s9 }
  0x4b   : > { %p9473_p5 = pnand %p9471_p3, %p9662_p11  ;;  %p9479_p13 = scmp.lt.u32.totalorder %s9470_s9, %s9732_s15 }
  0x4c   : > { %p9478_p1 = por %p9477_p0, %p9476_p12 }
  0x4d   : > { %p9474_p10 = pneg %p9473_p5 }
  0x4e   : > { %p9480_p2 = por %p9479_p13, %p9478_p1 }
  0x50   : > { %p9481_p7 = pnand %p9480_p2, %p9474_p10 }
  0x52   : > { %9484 = shalt.err (!%p9481_p7)
}
  0x53   : > { %s9485_s27 = scalar_lea.vmem %s9736_s29, 16384  ;;  %s9560_s11 = smov [#allocation6]  }
  0x54   : > { %p9486_p4 = scmp.ne.s32.totalorder %s9736_s29, %s9485_s27  ;;  %s9490_s24 = sshll.u32 %s9560_s11, 4  ;;  %s9491_s24 = int_to_ptr.vmem [resolvable:$false] %s9490_s24 }
  0x55   : > { %s9492_s30 = scalar_lea.vmem %s9491_s24, 32768  ;;  %p9493_p3 = scmp.lt.s32.totalorder %s9736_s29, %s9491_s24 }
  0x56   : > { %p9488_p6 = pnand %p9486_p4, %p9662_p11  ;;  %p9494_p5 = scmp.lt.s32.totalorder %s9492_s30, %s9485_s27 }
  0x58   : > { %p9489_p8 = pneg %p9488_p6  ;;  %p9495_p12 = por %p9494_p5, %p9493_p3 }
  0x5a   : > { %p9496_p0 = pnand %p9495_p12, %p9489_p8 }
  0x5c   : > { %9499 = shalt.err (!%p9496_p0)
}
  0x5d   : > { %s9561_s21 = smov 4   ;;  %p10931_p11 = scmp.ne.s32.totalorder %s10930_s13, 0 }
  0x5e   : > { %9217 = dma.hbm_to_vmem [thread:$0]  (!%p9641_p9), %s9732_s15, 16384, %s9736_s29, %s9656_s12, %s9559_s23, %s9559_s23, %s9561_s21  }
  0x5f   : > { %259 = sbr.rel (%p10931_p11) target bundleno = 1378 (0x562), region = 36  ;;  %s261_s14 = sand.u32 (!%p10931_p11), 1, %s9538_s16  }
  0x60   : > { %s9201_s9 = smul.u32 (!%p10931_p11), 6272, %s261_s14  ;;  %s262_s5 = scalar_lea.sflag (!%p10931_p11), [#allocation3], %s261_s14 }
  0x61   : > { %p10932_p10 = scmp.ne.s32.totalorder (!%p10931_p11), %s10927_s25, 0 }
  0x62   : > { %s9765_s6 = scalar_lea.vmem (!%p10931_p11), [#allocation2], %s9201_s9 }
  0x66   : > { %9525 = dma.done.wait (%p10932_p10), %s262_s5, 100352  }
  0x67   : > { %9527 = vsyncadd (%p10932_p10), %s262_s5, 4294866944  ;;  %s10933_s28 = sadd.s32 4294967295, %s9554_s20   ;;  %s7976_s12 = sshll.u32 %s261_s14, 4 }
  0x68   : > { %s270_s10 = sand.u32 1, %s10933_s28   ;;  %s9773_s13 = scalar_lea.vmem [#allocation4], %s7976_s12 }
  0x69   : > { %s271_s23 = scalar_lea.sflag [#allocation5], %s270_s10 }
  0x6a   : > { %9529 = dma.done.wait (%p10932_p10), %s271_s23, 16640  }
  0x6b   : > { %9531 = vsyncadd (%p10932_p10), %s271_s23, 4294950656  ;;  %s7977_s15 = sshll.u32 %s261_s14, 10  ;;  %p7978_p9 = scmp.ne.s32.totalorder %s9546_s18, 0 }
  0x6c   : > { %s9779_s29 = scalar_lea.vmem [#allocation6], %s7977_s15  ;;  %v9562_v0 = vmov (!%p7978_p9), 0.0  }
  0x6d   : > { %333 = sbr.rel (%p7978_p9) target bundleno = 116 (0x74), region = 52  ;;  %334 = vst [vmem:[%s10924_s4] sm:$0xff] (!%p7978_p9), %v9562_v0 }
  0x74 PF: > { %v339_v1 = vld [vmem:[%s9765_s6] sm:$0xff]  ;;  %v340_v3 = vld [vmem:[%s9765_s6 + $0x8] sm:$0xff]  ;;  %vm5151_vm0 = vcmask 130048  }
  0x75   : > { %v347_v2 = vld [vmem:[%s9765_s6 + $0x40] sm:$0xff]  ;;  %v348_v5 = vld [vmem:[%s9765_s6 + $0x48] sm:$0xff] }
  0x76   : > { %v7987_v4 = vcombine.high %v339_v1, %v347_v2  ;;  %v7986_v6 = vcombine.low %v339_v1, %v347_v2  ;;  %v355_v7 = vld [vmem:[%s9765_s6 + $0x80] sm:$0xff]  ;;  %v7989_v9 = vcombine.high %v340_v3, %v348_v5  ;;  %v7988_v10 = vcombine.low %v340_v3, %v348_v5  ;;  %v356_v12 = vld [vmem:[%s9765_s6 + $0x88] sm:$0xff] }
  0x77   : > { %v363_v8 = vld [vmem:[%s9765_s6 + $0xc0] sm:$0xff]  ;;  %v364_v13 = vld [vmem:[%s9765_s6 + $0xc8] sm:$0xff] }
  0x78   : > { %v8003_v11 = vcombine.high %v355_v7, %v363_v8  ;;  %v371_v14 = vld [vmem:[%s9765_s6 + $0x100] sm:$0xff]  ;;  %5155 = vmatprep.subr.bf16.mxu0 %v7987_v4  ;;  %v8005_v15 = vcombine.high %v356_v12, %v364_v13  ;;  %v372_v17 = vld [vmem:[%s9765_s6 + $0x108] sm:$0xff]  ;;  %5319 = vmatprep.subr.bf16.mxu1 %v7989_v9  ;;  %v8002_v19 = vcombine.low %v355_v7, %v363_v8 }
  0x79   : > { %v379_v16 = vld [vmem:[%s9765_s6 + $0x140] sm:$0xff]  ;;  %v380_v18 = vld [vmem:[%s9765_s6 + $0x148] sm:$0xff]  ;;  %5156 = vmatpush1.bf16.msra.mxu0 %v7986_v6  ;;  %5320 = vmatpush1.bf16.msra.mxu1 %v7988_v10  ;;  %v8004_v20 = vcombine.low %v356_v12, %v364_v13 }
  0x7a   : > { %5157 = vmatprep.subr.bf16.mxu0 %v8003_v11  ;;  %v8019_v21 = vcombine.high %v371_v14, %v379_v16  ;;  %5321 = vmatprep.subr.bf16.mxu1 %v8005_v15  ;;  %v8021_v22 = vcombine.high %v372_v17, %v380_v18  ;;  %v387_v23 = vld [vmem:[%s9765_s6 + $0x180] sm:$0xff]  ;;  %v388_v25 = vld [vmem:[%s9765_s6 + $0x188] sm:$0xff]  ;;  %v8018_v27 = vcombine.low %v371_v14, %v379_v16 }
  0x7b   : > { %v395_v24 = vld [vmem:[%s9765_s6 + $0x1c0] sm:$0xff]  ;;  %v396_v26 = vld [vmem:[%s9765_s6 + $0x1c8] sm:$0xff]  ;;  %v8020_v28 = vcombine.low %v372_v17, %v380_v18 }
  0x7c   : > { %v8035_v29 = vcombine.high %v387_v23, %v395_v24  ;;  %v8037_v30 = vcombine.high %v388_v25, %v396_v26  ;;  %v403_v31 = vld [vmem:[%s9765_s6 + $0x200] sm:$0xff]  ;;  %v404_v33 = vld [vmem:[%s9765_s6 + $0x208] sm:$0xff]  ;;  %v8034_v35 = vcombine.low %v387_v23, %v395_v24  ;;  %v8036_v36 = vcombine.low %v388_v25, %v396_v26 }
  0x7d   : > { %5158 = vmatpush1.bf16.msra.mxu0 %v8002_v19  ;;  %5322 = vmatpush1.bf16.msra.mxu1 %v8004_v20  ;;  %v411_v32 = vld [vmem:[%s9765_s6 + $0x240] sm:$0xff]  ;;  %v412_v34 = vld [vmem:[%s9765_s6 + $0x248] sm:$0xff] }
  0x7e   : > { %5159 = vmatprep.subr.bf16.mxu0 %v8019_v21  ;;  %5323 = vmatprep.subr.bf16.mxu1 %v8021_v22  ;;  %v8051_v37 = vcombine.high %v403_v31, %v411_v32  ;;  %v8053_v38 = vcombine.high %v404_v33, %v412_v34  ;;  %v419_v39 = vld [vmem:[%s9765_s6 + $0x280] sm:$0xff]  ;;  %v420_v41 = vld [vmem:[%s9765_s6 + $0x288] sm:$0xff]  ;;  %v8050_v43 = vcombine.low %v403_v31, %v411_v32 }
  0x7f   : > { %v427_v40 = vld [vmem:[%s9765_s6 + $0x2c0] sm:$0xff]  ;;  %v428_v42 = vld [vmem:[%s9765_s6 + $0x2c8] sm:$0xff]  ;;  %v8052_v44 = vcombine.low %v404_v33, %v412_v34 }
  0x80   : > { %v8067_v45 = vcombine.high %v419_v39, %v427_v40  ;;  %v8069_v46 = vcombine.high %v420_v41, %v428_v42  ;;  %v435_v47 = vld [vmem:[%s9765_s6 + $0x300] sm:$0xff]  ;;  %v436_v49 = vld [vmem:[%s9765_s6 + $0x308] sm:$0xff]  ;;  %v8066_v51 = vcombine.low %v419_v39, %v427_v40  ;;  %v8068_v52 = vcombine.low %v420_v41, %v428_v42 }
  0x81   : > { %5160 = vmatpush1.bf16.msra.mxu0 %v8018_v27  ;;  %5324 = vmatpush1.bf16.msra.mxu1 %v8020_v28  ;;  %v443_v48 = vld [vmem:[%s9765_s6 + $0x340] sm:$0xff]  ;;  %v444_v50 = vld [vmem:[%s9765_s6 + $0x348] sm:$0xff] }
  0x82   : > { %5161 = vmatprep.subr.bf16.mxu0 %v8035_v29  ;;  %5325 = vmatprep.subr.bf16.mxu1 %v8037_v30  ;;  %v8083_v53 = vcombine.high %v435_v47, %v443_v48  ;;  %v9816_v54 = vld [vmem:[%s10920_s0] sm:$0xff]  ;;  %v8085_v55 = vcombine.high %v436_v49, %v444_v50  ;;  %v452_v59 = vld [vmem:[%s9765_s6 + $0x388] sm:$0xff]  ;;  %v8082_v61 = vcombine.low %v435_v47, %v443_v48 }
  0x83   : > { %v451_v56 = vld [vmem:[%s9765_s6 + $0x380] sm:$0xff]  ;;  %v9822_v58 = vcombine.high %v9816_v54, %v9816_v54  ;;  %v460_v60 = vld [vmem:[%s9765_s6 + $0x3c8] sm:$0xff]  ;;  %v8084_v62 = vcombine.low %v436_v49, %v444_v50 }
  0x84   : > { %v459_v57 = vld [vmem:[%s9765_s6 + $0x3c0] sm:$0xff]  ;;  %v8101_v0 = vcombine.high %v452_v59, %v460_v60  ;;  %v468_v3 = vld [vmem:[%s9765_s6 + $0x408] sm:$0xff]  ;;  %v8100_v6 = vcombine.low %v452_v59, %v460_v60 }
  0x85   : > { %5162 = vmatpush1.bf16.msra.mxu0 %v8034_v35  ;;  %5326 = vmatpush1.bf16.msra.mxu1 %v8036_v36  ;;  %v8099_v63 = vcombine.high %v451_v56, %v459_v57  ;;  %v467_v1 = vld [vmem:[%s9765_s6 + $0x400] sm:$0xff]  ;;  %v476_v4 = vld [vmem:[%s9765_s6 + $0x448] sm:$0xff]  ;;  %v8098_v5 = vcombine.low %v451_v56, %v459_v57 }
  0x86   : > { %5163 = vmatprep.subr.bf16.mxu0 %v8051_v37  ;;  %5327 = vmatprep.subr.bf16.mxu1 %v8053_v38  ;;  %v475_v2 = vld [vmem:[%s9765_s6 + $0x440] sm:$0xff]  ;;  %v8117_v8 = vcombine.high %v468_v3, %v476_v4  ;;  %v484_v11 = vld [vmem:[%s9765_s6 + $0x488] sm:$0xff]  ;;  %v8116_v14 = vcombine.low %v468_v3, %v476_v4 }
  0x87   : > { %5187 = vmatprep.mubr.bf16.mxu0 %v9822_v58  ;;  %5351 = vmatprep.mubr.bf16.mxu1 %v9822_v58  ;;  %v8115_v7 = vcombine.high %v467_v1, %v475_v2  ;;  %v483_v9 = vld [vmem:[%s9765_s6 + $0x480] sm:$0xff]  ;;  %v492_v12 = vld [vmem:[%s9765_s6 + $0x4c8] sm:$0xff]  ;;  %v8114_v13 = vcombine.low %v467_v1, %v475_v2 }
  0x88   : > { %v491_v10 = vld [vmem:[%s9765_s6 + $0x4c0] sm:$0xff]  ;;  %v8133_v16 = vcombine.high %v484_v11, %v492_v12  ;;  %v500_v19 = vld [vmem:[%s9765_s6 + $0x508] sm:$0xff]  ;;  %v8132_v22 = vcombine.low %v484_v11, %v492_v12 }
  0x89   : > { %5164 = vmatpush1.bf16.msra.mxu0 %v8050_v43  ;;  %5328 = vmatpush1.bf16.msra.mxu1 %v8052_v44  ;;  %v8131_v15 = vcombine.high %v483_v9, %v491_v10  ;;  %v499_v17 = vld [vmem:[%s9765_s6 + $0x500] sm:$0xff]  ;;  %v508_v20 = vld [vmem:[%s9765_s6 + $0x548] sm:$0xff]  ;;  %v8130_v21 = vcombine.low %v483_v9, %v491_v10 }
  0x8a   : > { %5165 = vmatprep.subr.bf16.mxu0 %v8067_v45  ;;  %5329 = vmatprep.subr.bf16.mxu1 %v8069_v46  ;;  %v507_v18 = vld [vmem:[%s9765_s6 + $0x540] sm:$0xff]  ;;  %v8149_v24 = vcombine.high %v500_v19, %v508_v20  ;;  %v516_v27 = vld [vmem:[%s9765_s6 + $0x588] sm:$0xff]  ;;  %v8148_v30 = vcombine.low %v500_v19, %v508_v20 }
  0x8b   : > { %v8147_v23 = vcombine.high %v499_v17, %v507_v18  ;;  %v515_v25 = vld [vmem:[%s9765_s6 + $0x580] sm:$0xff]  ;;  %v524_v28 = vld [vmem:[%s9765_s6 + $0x5c8] sm:$0xff]  ;;  %v8146_v29 = vcombine.low %v499_v17, %v507_v18 }
  0x8c   : > { %v523_v26 = vld [vmem:[%s9765_s6 + $0x5c0] sm:$0xff]  ;;  %v8165_v32 = vcombine.high %v516_v27, %v524_v28  ;;  %v532_v35 = vld [vmem:[%s9765_s6 + $0x608] sm:$0xff]  ;;  %v8164_v38 = vcombine.low %v516_v27, %v524_v28 }
  0x8d   : > { %5166 = vmatpush1.bf16.msra.mxu0 %v8066_v51  ;;  %5330 = vmatpush1.bf16.msra.mxu1 %v8068_v52  ;;  %v8163_v31 = vcombine.high %v515_v25, %v523_v26  ;;  %v531_v33 = vld [vmem:[%s9765_s6 + $0x600] sm:$0xff]  ;;  %v540_v36 = vld [vmem:[%s9765_s6 + $0x648] sm:$0xff]  ;;  %v8162_v37 = vcombine.low %v515_v25, %v523_v26 }
  0x8e   : > { %5167 = vmatprep.subr.bf16.mxu0 %v8083_v53  ;;  %5331 = vmatprep.subr.bf16.mxu1 %v8085_v55  ;;  %v539_v34 = vld [vmem:[%s9765_s6 + $0x640] sm:$0xff]  ;;  %v8181_v40 = vcombine.high %v532_v35, %v540_v36  ;;  %v548_v43 = vld [vmem:[%s9765_s6 + $0x688] sm:$0xff]  ;;  %v8180_v46 = vcombine.low %v532_v35, %v540_v36 }
  0x8f   : > { %v8179_v39 = vcombine.high %v531_v33, %v539_v34  ;;  %v547_v41 = vld [vmem:[%s9765_s6 + $0x680] sm:$0xff]  ;;  %v556_v44 = vld [vmem:[%s9765_s6 + $0x6c8] sm:$0xff]  ;;  %v8178_v45 = vcombine.low %v531_v33, %v539_v34 }
  0x90   : > { %v555_v42 = vld [vmem:[%s9765_s6 + $0x6c0] sm:$0xff]  ;;  %v8197_v48 = vcombine.high %v548_v43, %v556_v44  ;;  %v564_v51 = vld [vmem:[%s9765_s6 + $0x708] sm:$0xff]  ;;  %v8196_v55 = vcombine.low %v548_v43, %v556_v44 }
  0x91   : > { %5168 = vmatpush1.bf16.msra.mxu0 %v8082_v61  ;;  %5332 = vmatpush1.bf16.msra.mxu1 %v8084_v62  ;;  %v8195_v47 = vcombine.high %v547_v41, %v555_v42  ;;  %v563_v49 = vld [vmem:[%s9765_s6 + $0x700] sm:$0xff]  ;;  %v572_v52 = vld [vmem:[%s9765_s6 + $0x748] sm:$0xff]  ;;  %v8194_v53 = vcombine.low %v547_v41, %v555_v42 }
  0x92   : > { %5169 = vmatprep.subr.bf16.mxu0 %v8099_v63  ;;  %5333 = vmatprep.subr.bf16.mxu1 %v8101_v0  ;;  %v571_v50 = vld [vmem:[%s9765_s6 + $0x740] sm:$0xff]  ;;  %v8213_v57 = vcombine.high %v564_v51, %v572_v52  ;;  %v580_v61 = vld [vmem:[%s9765_s6 + $0x788] sm:$0xff]  ;;  %v8212_v0 = vcombine.low %v564_v51, %v572_v52 }
  0x93   : > { %v8211_v56 = vcombine.high %v563_v49, %v571_v50  ;;  %v579_v59 = vld [vmem:[%s9765_s6 + $0x780] sm:$0xff]  ;;  %v588_v62 = vld [vmem:[%s9765_s6 + $0x7c8] sm:$0xff]  ;;  %v8210_v63 = vcombine.low %v563_v49, %v571_v50 }
  0x94   : > { %v587_v60 = vld [vmem:[%s9765_s6 + $0x7c0] sm:$0xff]  ;;  %v8229_v2 = vcombine.high %v580_v61, %v588_v62 }
  0x95   : > { %5170 = vmatpush1.bf16.msra.mxu0 %v8098_v5  ;;  %5334 = vmatpush1.bf16.msra.mxu1 %v8100_v6  ;;  %v8227_v1 = vcombine.high %v579_v59, %v587_v60  ;;  %v595_v3 = vld [vmem:[%s9765_s6 + $0x800] sm:$0xff]  ;;  %v596_v5 = vld [vmem:[%s9765_s6 + $0x808] sm:$0xff] }
  0x96   : > { %5171 = vmatprep.subr.bf16.mxu0 %v8115_v7  ;;  %5335 = vmatprep.subr.bf16.mxu1 %v8117_v8  ;;  %v603_v4 = vld [vmem:[%s9765_s6 + $0x840] sm:$0xff]  ;;  %v604_v6 = vld [vmem:[%s9765_s6 + $0x848] sm:$0xff]  ;;  %v8226_v7 = vcombine.low %v579_v59, %v587_v60  ;;  %v8228_v8 = vcombine.low %v580_v61, %v588_v62 }
  0x97   : > { %v8243_v9 = vcombine.high %v595_v3, %v603_v4  ;;  %v8245_v10 = vcombine.high %v596_v5, %v604_v6  ;;  %v611_v11 = vld [vmem:[%s9765_s6 + $0x880] sm:$0xff]  ;;  %v8242_v17 = vcombine.low %v595_v3, %v603_v4  ;;  %v8244_v20 = vcombine.low %v596_v5, %v604_v6 }
  0x98   : > { %v619_v12 = vld [vmem:[%s9765_s6 + $0x8c0] sm:$0xff] }
  0x99   : > { %5172 = vmatpush1.bf16.msra.mxu0 %v8114_v13  ;;  %5336 = vmatpush1.bf16.msra.mxu1 %v8116_v14  ;;  %v9868_v13 = vcombine.low %v9816_v54, %v9816_v54  ;;  %v612_v14 = vld [vmem:[%s9765_s6 + $0x888] sm:$0xff]  ;;  %v627_v18 = vld [vmem:[%s9765_s6 + $0x900] sm:$0xff]  ;;  %v8258_v25 = vcombine.low %v611_v11, %v619_v12 }
  0x9a   : > { %5173 = vmatprep.subr.bf16.mxu0 %v8131_v15  ;;  %5337 = vmatprep.subr.bf16.mxu1 %v8133_v16  ;;  %v620_v15 = vld [vmem:[%s9765_s6 + $0x8c8] sm:$0xff]  ;;  %v635_v19 = vld [vmem:[%s9765_s6 + $0x940] sm:$0xff] }
  0x9b   : > { %v9875_v16 = vld [vmem:[%s10920_s0 + $0x8] sm:$0xff]  ;;  %v8261_v54 = vcombine.high %v612_v14, %v620_v15  ;;  %v8260_v26 = vcombine.low %v612_v14, %v620_v15  ;;  %v8275_v27 = vcombine.high %v627_v18, %v635_v19  ;;  %v8274_v33 = vcombine.low %v627_v18, %v635_v19  ;;  %v659_v34 = vld [vmem:[%s9765_s6 + $0xa00] sm:$0xff] }
  0x9c   : > { %v667_v35 = vld [vmem:[%s9765_s6 + $0xa40] sm:$0xff]  ;;  %v740_v18 = vld [vmem:[%s9765_s6 + $0xc88] sm:$0xff] }
  0x9d   : > { %5174 = vmatpush1.bf16.msra.mxu0 %v8130_v21  ;;  %5338 = vmatpush1.bf16.msra.mxu1 %v8132_v22  ;;  %v8259_v21 = vcombine.high %v611_v11, %v619_v12  ;;  %v9881_v22 = vcombine.high %v9875_v16, %v9875_v16  ;;  %v675_v42 = vld [vmem:[%s9765_s6 + $0xa80] sm:$0xff]  ;;  %v8306_v49 = vcombine.low %v659_v34, %v667_v35 }
  0x9e   : > { %5175 = vmatprep.subr.bf16.mxu0 %v8147_v23  ;;  %5339 = vmatprep.subr.bf16.mxu1 %v8149_v24  ;;  %v628_v23 = vld [vmem:[%s9765_s6 + $0x908] sm:$0xff]  ;;  %v683_v43 = vld [vmem:[%s9765_s6 + $0xac0] sm:$0xff] }
  0x9f   : > { %v636_v24 = vld [vmem:[%s9765_s6 + $0x948] sm:$0xff]  ;;  %v8323_v51 = vcombine.high %v675_v42, %v683_v43  ;;  %v691_v52 = vld [vmem:[%s9765_s6 + $0xb00] sm:$0xff]  ;;  %v8322_v59 = vcombine.low %v675_v42, %v683_v43 }
  0xa0   : > { %v8277_v28 = vcombine.high %v628_v23, %v636_v24  ;;  %v8276_v36 = vcombine.low %v628_v23, %v636_v24  ;;  %v707_v62 = vld [vmem:[%s9765_s6 + $0xb80] sm:$0xff]  ;;  %v788_v42 = vld [vmem:[%s9765_s6 + $0xe08] sm:$0xff] }
  0xa1   : > { %5176 = vmatpush1.bf16.msra.mxu0 %v8146_v29  ;;  %5340 = vmatpush1.bf16.msra.mxu1 %v8148_v30  ;;  %v643_v29 = vld [vmem:[%s9765_s6 + $0x980] sm:$0xff] }
  0xa2   : > { %5177 = vmatprep.subr.bf16.mxu0 %v8163_v31  ;;  %5341 = vmatprep.subr.bf16.mxu1 %v8165_v32  ;;  %v651_v30 = vld [vmem:[%s9765_s6 + $0x9c0] sm:$0xff]  ;;  %v644_v31 = vld [vmem:[%s9765_s6 + $0x988] sm:$0xff] }
  0xa3   : > { %v652_v32 = vld [vmem:[%s9765_s6 + $0x9c8] sm:$0xff]  ;;  %v8290_v41 = vcombine.low %v643_v29, %v651_v30  ;;  %v723_v6 = vld [vmem:[%s9765_s6 + $0xc00] sm:$0xff] }
  0xa4   : > { %v8292_v44 = vcombine.low %v644_v31, %v652_v32  ;;  %v739_v15 = vld [vmem:[%s9765_s6 + $0xc80] sm:$0xff] }
  0xa5   : > { %5178 = vmatpush1.bf16.msra.mxu0 %v8162_v37  ;;  %5342 = vmatpush1.bf16.msra.mxu1 %v8164_v38  ;;  %v8291_v37 = vcombine.high %v643_v29, %v651_v30  ;;  %v660_v38 = vld [vmem:[%s9765_s6 + $0xa08] sm:$0xff]  ;;  %v755_v24 = vld [vmem:[%s9765_s6 + $0xd00] sm:$0xff] }
  0xa6   : > { %5179 = vmatprep.subr.bf16.mxu0 %v8179_v39  ;;  %5343 = vmatprep.subr.bf16.mxu1 %v8181_v40  ;;  %v668_v39 = vld [vmem:[%s9765_s6 + $0xa48] sm:$0xff]  ;;  %v8293_v40 = vcombine.high %v644_v31, %v652_v32  ;;  %v771_v32 = vld [vmem:[%s9765_s6 + $0xd80] sm:$0xff] }
  0xa7   : > { %v8308_v50 = vcombine.low %v660_v38, %v668_v39 }
  0xa9   : > { %5180 = vmatpush1.bf16.msra.mxu0 %v8178_v45  ;;  %5344 = vmatpush1.bf16.msra.mxu1 %v8180_v46  ;;  %v8307_v45 = vcombine.high %v659_v34, %v667_v35  ;;  %v676_v46 = vld [vmem:[%s9765_s6 + $0xa88] sm:$0xff] }
  0xaa   : > { %5181 = vmatprep.subr.bf16.mxu0 %v8195_v47  ;;  %5345 = vmatprep.subr.bf16.mxu1 %v8197_v48  ;;  %v684_v47 = vld [vmem:[%s9765_s6 + $0xac8] sm:$0xff]  ;;  %v8309_v48 = vcombine.high %v660_v38, %v668_v39 }
  0xab   : > { %v8324_v60 = vcombine.low %v676_v46, %v684_v47  ;;  %v772_v34 = vld [vmem:[%s9765_s6 + $0xd88] sm:$0xff] }
  0xad   : > { %5182 = vmatpush1.bf16.msra.mxu0 %v8194_v53  ;;  %5346 = vmatpush1.bf16.msra.mxu1 %v8196_v55  ;;  %v699_v53 = vld [vmem:[%s9765_s6 + $0xb40] sm:$0xff]  ;;  %v692_v55 = vld [vmem:[%s9765_s6 + $0xb08] sm:$0xff] }
  0xae   : > { %5183 = vmatprep.subr.bf16.mxu0 %v8211_v56  ;;  %5347 = vmatprep.subr.bf16.mxu1 %v8213_v57  ;;  %v8325_v56 = vcombine.high %v676_v46, %v684_v47  ;;  %v700_v57 = vld [vmem:[%s9765_s6 + $0xb48] sm:$0xff]  ;;  %v8339_v61 = vcombine.high %v691_v52, %v699_v53  ;;  %v8338_v3 = vcombine.low %v691_v52, %v699_v53 }
  0xaf   : > { %v8340_v4 = vcombine.low %v692_v55, %v700_v57  ;;  %v812_v52 = vld [vmem:[%s9765_s6 + $0xec8] sm:$0xff] }
  0xb1   : > { %5184 = vmatpush1.bf16.msra.mxu0 %v8210_v63  ;;  %5348 = vmatpush1.bf16.msra.mxu1 %v8212_v0  ;;  %v715_v63 = vld [vmem:[%s9765_s6 + $0xbc0] sm:$0xff]  ;;  %v708_v0 = vld [vmem:[%s9765_s6 + $0xb88] sm:$0xff] }
  0xb2   : > { %5185 = vmatprep.subr.bf16.mxu0 %v8227_v1  ;;  %5349 = vmatprep.subr.bf16.mxu1 %v8229_v2  ;;  %v8341_v1 = vcombine.high %v692_v55, %v700_v57  ;;  %v716_v2 = vld [vmem:[%s9765_s6 + $0xbc8] sm:$0xff]  ;;  %v8355_v5 = vcombine.high %v707_v62, %v715_v63  ;;  %v8354_v11 = vcombine.low %v707_v62, %v715_v63  ;;  %v819_v57 = vld [vmem:[%s9765_s6 + $0xf00] sm:$0xff] }
  0xb3   : > { %v8356_v12 = vcombine.low %v708_v0, %v716_v2  ;;  %v828_v62 = vld [vmem:[%s9765_s6 + $0xf48] sm:$0xff] }
  0xb5   : > { %5186 = vmatpush1.bf16.msra.mxu0 %v8226_v7  ;;  %5350 = vmatpush1.bf16.msra.mxu1 %v8228_v8  ;;  %v731_v7 = vld [vmem:[%s9765_s6 + $0xc40] sm:$0xff]  ;;  %v724_v8 = vld [vmem:[%s9765_s6 + $0xc08] sm:$0xff] }
  0xb6   : > { %5196 = vmatprep.subr.bf16.mxu0 %v8243_v9  ;;  %5360 = vmatprep.subr.bf16.mxu1 %v8245_v10  ;;  %v8357_v9 = vcombine.high %v708_v0, %v716_v2  ;;  %v732_v10 = vld [vmem:[%s9765_s6 + $0xc48] sm:$0xff]  ;;  %v8371_v14 = vcombine.high %v723_v6, %v731_v7  ;;  %v835_v2 = vld [vmem:[%s9765_s6 + $0xf80] sm:$0xff] }
  0xb7   : > { %v8373_v19 = vcombine.high %v724_v8, %v732_v10 }
  0xb8   : > { %5188 = vmatmul.mubr.bf16.vlgmr.msra.gmra.mrb[0].mxu0 %v9868_v13  ;;  %5352 = vmatmul.mubr.bf16.vlgmr.msra.gmra.mrb[0].mxu1 %v9868_v13 }
  0xb9   : > { %5197 = vmatpush1.bf16.msra.mxu0 %v8242_v17  ;;  %5361 = vmatpush1.bf16.msra.mxu1 %v8244_v20  ;;  %v747_v17 = vld [vmem:[%s9765_s6 + $0xcc0] sm:$0xff]  ;;  %v748_v20 = vld [vmem:[%s9765_s6 + $0xcc8] sm:$0xff] }
  0xba   : > { %5198 = vmatprep.subr.bf16.mxu0 %v8259_v21  ;;  %5362 = vmatprep.subr.bf16.mxu1 %v8261_v54  ;;  %v8370_v21 = vcombine.low %v723_v6, %v731_v7  ;;  %v8372_v54 = vcombine.low %v724_v8, %v732_v10  ;;  %v8387_v23 = vcombine.high %v739_v15, %v747_v17  ;;  %v844_v6 = vld [vmem:[%s9765_s6 + $0xfc8] sm:$0xff]  ;;  %v851_v10 = vld [vmem:[%s9765_s6 + $0x1000] sm:$0xff] }
  0xbb   : > { %5228 = vmatprep.mubr.bf16.mxu0 %v9881_v22  ;;  %5392 = vmatprep.mubr.bf16.mxu1 %v9881_v22  ;;  %v8386_v29 = vcombine.low %v739_v15, %v747_v17  ;;  %v8388_v30 = vcombine.low %v740_v18, %v748_v20  ;;  %v860_v15 = vld [vmem:[%s9765_s6 + $0x1048] sm:$0xff] }
  0xbd   : > { %5199 = vmatpush1.bf16.msra.mxu0 %v8258_v25  ;;  %5363 = vmatpush1.bf16.msra.mxu1 %v8260_v26  ;;  %v763_v25 = vld [vmem:[%s9765_s6 + $0xd40] sm:$0xff]  ;;  %v756_v26 = vld [vmem:[%s9765_s6 + $0xd08] sm:$0xff] }
  0xbe   : > { %5200 = vmatprep.subr.bf16.mxu0 %v8275_v27  ;;  %5364 = vmatprep.subr.bf16.mxu1 %v8277_v28  ;;  %v8389_v27 = vcombine.high %v740_v18, %v748_v20  ;;  %v764_v28 = vld [vmem:[%s9765_s6 + $0xd48] sm:$0xff]  ;;  %v8403_v31 = vcombine.high %v755_v24, %v763_v25  ;;  %v867_v18 = vld [vmem:[%s9765_s6 + $0x1080] sm:$0xff] }
  0xbf   : > { %v8405_v35 = vcombine.high %v756_v26, %v764_v28  ;;  %v8404_v38 = vcombine.low %v756_v26, %v764_v28  ;;  %v9956_v26 = vcombine.low %v9875_v16, %v9875_v16 }
  0xc1   : > { %5201 = vmatpush1.bf16.msra.mxu0 %v8274_v33  ;;  %5365 = vmatpush1.bf16.msra.mxu1 %v8276_v36  ;;  %v779_v33 = vld [vmem:[%s9765_s6 + $0xdc0] sm:$0xff]  ;;  %v780_v36 = vld [vmem:[%s9765_s6 + $0xdc8] sm:$0xff] }
  0xc2   : > { %5202 = vmatprep.subr.bf16.mxu0 %v8291_v37  ;;  %5366 = vmatprep.subr.bf16.mxu1 %v8293_v40  ;;  %v8402_v37 = vcombine.low %v755_v24, %v763_v25  ;;  %v8419_v39 = vcombine.high %v771_v32, %v779_v33  ;;  %v787_v40 = vld [vmem:[%s9765_s6 + $0xe00] sm:$0xff]  ;;  %v8421_v43 = vcombine.high %v772_v34, %v780_v36  ;;  %v9952_v25 = vld [vmem:[%s10920_s0 + $0x10] sm:$0xff] }
  0xc3   : > { %v8420_v46 = vcombine.low %v772_v34, %v780_v36  ;;  %v892_v34 = vld [vmem:[%s9765_s6 + $0x1148] sm:$0xff]  ;;  %v9964_v16 = vcombine.high %v9952_v25, %v9952_v25 }
  0xc5   : > { %5203 = vmatpush1.bf16.msra.mxu0 %v8290_v41  ;;  %5367 = vmatpush1.bf16.msra.mxu1 %v8292_v44  ;;  %v795_v41 = vld [vmem:[%s9765_s6 + $0xe40] sm:$0xff]  ;;  %v796_v44 = vld [vmem:[%s9765_s6 + $0xe48] sm:$0xff] }
  0xc6   : > { %5204 = vmatprep.subr.bf16.mxu0 %v8307_v45  ;;  %5368 = vmatprep.subr.bf16.mxu1 %v8309_v48  ;;  %v8418_v45 = vcombine.low %v771_v32, %v779_v33  ;;  %v8435_v47 = vcombine.high %v787_v40, %v795_v41  ;;  %v803_v48 = vld [vmem:[%s9765_s6 + $0xe80] sm:$0xff]  ;;  %v8434_v53 = vcombine.low %v787_v40, %v795_v41  ;;  %v884_v32 = vld [vmem:[%s9765_s6 + $0x1108] sm:$0xff] }
  0xc7   : > { %v8436_v55 = vcombine.low %v788_v42, %v796_v44  ;;  %v900_v40 = vld [vmem:[%s9765_s6 + $0x1188] sm:$0xff]  ;;  %v8533_v41 = vcombine.high %v884_v32, %v892_v34 }
  0xc9   : > { %5205 = vmatpush1.bf16.msra.mxu0 %v8306_v49  ;;  %5369 = vmatpush1.bf16.msra.mxu1 %v8308_v50  ;;  %v811_v49 = vld [vmem:[%s9765_s6 + $0xec0] sm:$0xff]  ;;  %v804_v50 = vld [vmem:[%s9765_s6 + $0xe88] sm:$0xff] }
  0xca   : > { %5206 = vmatprep.subr.bf16.mxu0 %v8323_v51  ;;  %5370 = vmatprep.subr.bf16.mxu1 %v8325_v56  ;;  %v8437_v51 = vcombine.high %v788_v42, %v796_v44  ;;  %v8451_v56 = vcombine.high %v803_v48, %v811_v49  ;;  %v8450_v63 = vcombine.low %v803_v48, %v811_v49  ;;  %v908_v42 = vld [vmem:[%s9765_s6 + $0x11c8] sm:$0xff] }
  0xcb   : > { %v8452_v0 = vcombine.low %v804_v50, %v812_v52  ;;  %v8532_v44 = vcombine.low %v884_v32, %v892_v34  ;;  %v916_v48 = vld [vmem:[%s9765_s6 + $0x1208] sm:$0xff]  ;;  %v8549_v49 = vcombine.high %v900_v40, %v908_v42 }
  0xcc   : > { %v1004_v32 = vld [vmem:[%s9765_s6 + $0x14c8] sm:$0xff] }
  0xcd   : > { %5207 = vmatpush1.bf16.msra.mxu0 %v8322_v59  ;;  %5371 = vmatpush1.bf16.msra.mxu1 %v8324_v60  ;;  %v827_v59 = vld [vmem:[%s9765_s6 + $0xf40] sm:$0xff]  ;;  %v820_v60 = vld [vmem:[%s9765_s6 + $0xf08] sm:$0xff] }
  0xce   : > { %5208 = vmatprep.subr.bf16.mxu0 %v8339_v61  ;;  %5372 = vmatprep.subr.bf16.mxu1 %v8341_v1  ;;  %v8453_v61 = vcombine.high %v804_v50, %v812_v52  ;;  %v8467_v1 = vcombine.high %v819_v57, %v827_v59  ;;  %v8466_v7 = vcombine.low %v819_v57, %v827_v59  ;;  %v924_v50 = vld [vmem:[%s9765_s6 + $0x1248] sm:$0xff] }
  0xcf   : > { %v8468_v8 = vcombine.low %v820_v60, %v828_v62  ;;  %v8548_v52 = vcombine.low %v900_v40, %v908_v42  ;;  %v932_v57 = vld [vmem:[%s9765_s6 + $0x1288] sm:$0xff]  ;;  %v8565_v59 = vcombine.high %v916_v48, %v924_v50 }
  0xd0   : > { %v1020_v40 = vld [vmem:[%s9765_s6 + $0x1548] sm:$0xff] }
  0xd1   : > { %5209 = vmatpush1.bf16.msra.mxu0 %v8338_v3  ;;  %5373 = vmatpush1.bf16.msra.mxu1 %v8340_v4  ;;  %v843_v3 = vld [vmem:[%s9765_s6 + $0xfc0] sm:$0xff]  ;;  %v836_v4 = vld [vmem:[%s9765_s6 + $0xf88] sm:$0xff] }
  0xd2   : > { %5210 = vmatprep.subr.bf16.mxu0 %v8355_v5  ;;  %5374 = vmatprep.subr.bf16.mxu1 %v8357_v9  ;;  %v8469_v5 = vcombine.high %v820_v60, %v828_v62  ;;  %v8483_v9 = vcombine.high %v835_v2, %v843_v3  ;;  %v8482_v17 = vcombine.low %v835_v2, %v843_v3  ;;  %v940_v60 = vld [vmem:[%s9765_s6 + $0x12c8] sm:$0xff] }
  0xd3   : > { %v8564_v62 = vcombine.low %v916_v48, %v924_v50  ;;  %v948_v2 = vld [vmem:[%s9765_s6 + $0x1308] sm:$0xff]  ;;  %v8581_v3 = vcombine.high %v932_v57, %v940_v60 }
  0xd4   : > { %v1036_v48 = vld [vmem:[%s9765_s6 + $0x15c8] sm:$0xff] }
  0xd5   : > { %5211 = vmatpush1.bf16.msra.mxu0 %v8354_v11  ;;  %5375 = vmatpush1.bf16.msra.mxu1 %v8356_v12  ;;  %v859_v11 = vld [vmem:[%s9765_s6 + $0x1040] sm:$0xff]  ;;  %v852_v12 = vld [vmem:[%s9765_s6 + $0x1008] sm:$0xff] }
  0xd6   : > { %5212 = vmatprep.subr.bf16.mxu0 %v8371_v14  ;;  %5376 = vmatprep.subr.bf16.mxu1 %v8373_v19  ;;  %v8485_v14 = vcombine.high %v836_v4, %v844_v6  ;;  %v8484_v19 = vcombine.low %v836_v4, %v844_v6  ;;  %v8499_v20 = vcombine.high %v851_v10, %v859_v11  ;;  %v956_v4 = vld [vmem:[%s9765_s6 + $0x1348] sm:$0xff] }
  0xd7   : > { %v8501_v24 = vcombine.high %v852_v12, %v860_v15  ;;  %v8500_v28 = vcombine.low %v852_v12, %v860_v15  ;;  %v8580_v6 = vcombine.low %v932_v57, %v940_v60  ;;  %v972_v12 = vld [vmem:[%s9765_s6 + $0x13c8] sm:$0xff]  ;;  %v8596_v15 = vcombine.low %v948_v2, %v956_v4 }
  0xd8   : > { %v1052_v57 = vld [vmem:[%s9765_s6 + $0x1648] sm:$0xff] }
  0xd9   : > { %5213 = vmatpush1.bf16.msra.mxu0 %v8370_v21  ;;  %5377 = vmatpush1.bf16.msra.mxu1 %v8372_v54  ;;  %v875_v21 = vld [vmem:[%s9765_s6 + $0x10c0] sm:$0xff]  ;;  %v868_v54 = vld [vmem:[%s9765_s6 + $0x1088] sm:$0xff] }
  0xda   : > { %5214 = vmatprep.subr.bf16.mxu0 %v8387_v23  ;;  %5378 = vmatprep.subr.bf16.mxu1 %v8389_v27  ;;  %v876_v23 = vld [vmem:[%s9765_s6 + $0x10c8] sm:$0xff]  ;;  %v8498_v27 = vcombine.low %v851_v10, %v859_v11  ;;  %v8597_v11 = vcombine.high %v948_v2, %v956_v4 }
  0xdb   : > { %v8517_v33 = vcombine.high %v868_v54, %v876_v23  ;;  %v8516_v36 = vcombine.low %v868_v54, %v876_v23  ;;  %v964_v10 = vld [vmem:[%s9765_s6 + $0x1388] sm:$0xff] }
  0xdc   : > { %v988_v54 = vld [vmem:[%s9765_s6 + $0x1448] sm:$0xff] }
  0xdd   : > { %5215 = vmatpush1.bf16.msra.mxu0 %v8386_v29  ;;  %5379 = vmatpush1.bf16.msra.mxu1 %v8388_v30  ;;  %v8515_v29 = vcombine.high %v867_v18, %v875_v21  ;;  %v883_v30 = vld [vmem:[%s9765_s6 + $0x1100] sm:$0xff]  ;;  %v1068_v2 = vld [vmem:[%s9765_s6 + $0x16c8] sm:$0xff] }
  0xde   : > { %5216 = vmatprep.subr.bf16.mxu0 %v8403_v31  ;;  %5380 = vmatprep.subr.bf16.mxu1 %v8405_v35  ;;  %v891_v31 = vld [vmem:[%s9765_s6 + $0x1140] sm:$0xff]  ;;  %v8514_v35 = vcombine.low %v867_v18, %v875_v21  ;;  %v8613_v21 = vcombine.high %v964_v10, %v972_v12 }
  0xdf   : > { %v979_v18 = vld [vmem:[%s9765_s6 + $0x1400] sm:$0xff] }
  0xe1   : > { %5217 = vmatpush1.bf16.msra.mxu0 %v8402_v37  ;;  %5381 = vmatpush1.bf16.msra.mxu1 %v8404_v38  ;;  %v8531_v37 = vcombine.high %v883_v30, %v891_v31  ;;  %v899_v38 = vld [vmem:[%s9765_s6 + $0x1180] sm:$0xff] }
  0xe2   : > { %5218 = vmatprep.subr.bf16.mxu0 %v8419_v39  ;;  %5382 = vmatprep.subr.bf16.mxu1 %v8421_v43  ;;  %v907_v39 = vld [vmem:[%s9765_s6 + $0x11c0] sm:$0xff]  ;;  %v8530_v43 = vcombine.low %v883_v30, %v891_v31  ;;  %v996_v30 = vld [vmem:[%s9765_s6 + $0x1488] sm:$0xff] }
  0xe3   : > { %v8644_v42 = vcombine.low %v996_v30, %v1004_v32 }
  0xe5   : > { %5219 = vmatpush1.bf16.msra.mxu0 %v8418_v45  ;;  %5383 = vmatpush1.bf16.msra.mxu1 %v8420_v46  ;;  %v8547_v45 = vcombine.high %v899_v38, %v907_v39  ;;  %v915_v46 = vld [vmem:[%s9765_s6 + $0x1200] sm:$0xff] }
  0xe6   : > { %5220 = vmatprep.subr.bf16.mxu0 %v8435_v47  ;;  %5384 = vmatprep.subr.bf16.mxu1 %v8437_v51  ;;  %v923_v47 = vld [vmem:[%s9765_s6 + $0x1240] sm:$0xff]  ;;  %v8546_v51 = vcombine.low %v899_v38, %v907_v39  ;;  %v1012_v38 = vld [vmem:[%s9765_s6 + $0x1508] sm:$0xff]  ;;  %v8645_v39 = vcombine.high %v996_v30, %v1004_v32 }
  0xe7   : > { %v8660_v50 = vcombine.low %v1012_v38, %v1020_v40  ;;  %v1116_v30 = vld [vmem:[%s9765_s6 + $0x1848] sm:$0xff] }
  0xe9   : > { %5221 = vmatpush1.bf16.msra.mxu0 %v8434_v53  ;;  %5385 = vmatpush1.bf16.msra.mxu1 %v8436_v55  ;;  %v8563_v53 = vcombine.high %v915_v46, %v923_v47  ;;  %v931_v55 = vld [vmem:[%s9765_s6 + $0x1280] sm:$0xff] }
  0xea   : > { %5222 = vmatprep.subr.bf16.mxu0 %v8451_v56  ;;  %5386 = vmatprep.subr.bf16.mxu1 %v8453_v61  ;;  %v939_v56 = vld [vmem:[%s9765_s6 + $0x12c0] sm:$0xff]  ;;  %v8562_v61 = vcombine.low %v915_v46, %v923_v47  ;;  %v1028_v46 = vld [vmem:[%s9765_s6 + $0x1588] sm:$0xff]  ;;  %v8661_v47 = vcombine.high %v1012_v38, %v1020_v40  ;;  %v350_v40 = vld [vmem:[%s9765_s6 + $0x58] sm:$0xff] }
  0xeb   : > { %v8676_v60 = vcombine.low %v1028_v46, %v1036_v48 }
  0xed   : > { %5223 = vmatpush1.bf16.msra.mxu0 %v8450_v63  ;;  %5387 = vmatpush1.bf16.msra.mxu1 %v8452_v0  ;;  %v8579_v63 = vcombine.high %v931_v55, %v939_v56  ;;  %v947_v0 = vld [vmem:[%s9765_s6 + $0x1300] sm:$0xff] }
  0xee   : > { %5224 = vmatprep.subr.bf16.mxu0 %v8467_v1  ;;  %5388 = vmatprep.subr.bf16.mxu1 %v8469_v5  ;;  %v955_v1 = vld [vmem:[%s9765_s6 + $0x1340] sm:$0xff]  ;;  %v8578_v5 = vcombine.low %v931_v55, %v939_v56  ;;  %v1044_v55 = vld [vmem:[%s9765_s6 + $0x1608] sm:$0xff]  ;;  %v8677_v56 = vcombine.high %v1028_v46, %v1036_v48  ;;  %v9278_v46 = vld [vmem:[%s10920_s0 + $0x18] ss:$0 sps:$4 sm:$0xff]  }
  0xef   : > { %v8692_v4 = vcombine.low %v1044_v55, %v1052_v57  ;;  %v366_v48 = vld [vmem:[%s9765_s6 + $0xd8] sm:$0xff] }
  0xf1   : > { %5225 = vmatpush1.bf16.msra.mxu0 %v8466_v7  ;;  %5389 = vmatpush1.bf16.msra.mxu1 %v8468_v8  ;;  %v8595_v7 = vcombine.high %v947_v0, %v955_v1  ;;  %v963_v8 = vld [vmem:[%s9765_s6 + $0x1380] sm:$0xff] }
  0xf2   : > { %5226 = vmatprep.subr.bf16.mxu0 %v8483_v9  ;;  %5390 = vmatprep.subr.bf16.mxu1 %v8485_v14  ;;  %v971_v9 = vld [vmem:[%s9765_s6 + $0x13c0] sm:$0xff]  ;;  %v8594_v14 = vcombine.low %v947_v0, %v955_v1  ;;  %v1060_v0 = vld [vmem:[%s9765_s6 + $0x1688] sm:$0xff]  ;;  %v8693_v1 = vcombine.high %v1044_v55, %v1052_v57  ;;  %v381_v55 = vld [vmem:[%s9765_s6 + $0x150] sm:$0xff] }
  0xf3   : > { %v8610_v23 = vcombine.low %v963_v8, %v971_v9  ;;  %v382_v57 = vld [vmem:[%s9765_s6 + $0x158] sm:$0xff] }
  0xf5   : > { %5227 = vmatpush1.bf16.msra.mxu0 %v8482_v17  ;;  %5391 = vmatpush1.bf16.msra.mxu1 %v8484_v19  ;;  %v8611_v17 = vcombine.high %v963_v8, %v971_v9  ;;  %v987_v19 = vld [vmem:[%s9765_s6 + $0x1440] sm:$0xff]  ;;  %v1076_v8 = vld [vmem:[%s9765_s6 + $0x1708] sm:$0xff]  ;;  %v8709_v9 = vcombine.high %v1060_v0, %v1068_v2 }
  0xf6   : > { %5237 = vmatprep.subr.bf16.mxu0 %v8499_v20  ;;  %5401 = vmatprep.subr.bf16.mxu1 %v8501_v24  ;;  %v980_v20 = vld [vmem:[%s9765_s6 + $0x1408] sm:$0xff]  ;;  %v8612_v24 = vcombine.low %v964_v10, %v972_v12  ;;  %v8708_v12 = vcombine.low %v1060_v0, %v1068_v2  ;;  %v397_v0 = vld [vmem:[%s9765_s6 + $0x1d0] sm:$0xff]  ;;  %v398_v2 = vld [vmem:[%s9765_s6 + $0x1d8] sm:$0xff] }
  0xf7   : > { %v8629_v31 = vcombine.high %v980_v20, %v988_v54  ;;  %v8628_v34 = vcombine.low %v980_v20, %v988_v54  ;;  %v1084_v10 = vld [vmem:[%s9765_s6 + $0x1748] sm:$0xff] }
  0xf8   : > { %5229 = vmatmul.mubr.bf16.vlgmr.msra.gmra.mrb[0].mxu0 %v9956_v26  ;;  %5393 = vmatmul.mubr.bf16.vlgmr.msra.gmra.mrb[0].mxu1 %v9956_v26  ;;  %v1100_v20 = vld [vmem:[%s9765_s6 + $0x17c8] sm:$0xff]  ;;  %v8724_v54 = vcombine.low %v1076_v8, %v1084_v10 }
  0xf9   : > { %5238 = vmatpush1.bf16.msra.mxu0 %v8498_v27  ;;  %5402 = vmatpush1.bf16.msra.mxu1 %v8500_v28  ;;  %v8627_v27 = vcombine.high %v979_v18, %v987_v19  ;;  %v995_v28 = vld [vmem:[%s9765_s6 + $0x1480] sm:$0xff] }
  0xfa   : > { %5239 = vmatprep.subr.bf16.mxu0 %v8515_v29  ;;  %5403 = vmatprep.subr.bf16.mxu1 %v8517_v33  ;;  %v1003_v29 = vld [vmem:[%s9765_s6 + $0x14c0] sm:$0xff]  ;;  %v8626_v33 = vcombine.low %v979_v18, %v987_v19  ;;  %v1092_v18 = vld [vmem:[%s9765_s6 + $0x1788] sm:$0xff]  ;;  %v8725_v19 = vcombine.high %v1076_v8, %v1084_v10  ;;  %v413_v8 = vld [vmem:[%s9765_s6 + $0x250] sm:$0xff] }
  0xfb   : > { %5269 = vmatprep.mubr.bf16.mxu0 %v9964_v16  ;;  %5433 = vmatprep.mubr.bf16.mxu1 %v9964_v16  ;;  %v8740_v32 = vcombine.low %v1092_v18, %v1100_v20  ;;  %v414_v10 = vld [vmem:[%s9765_s6 + $0x258] sm:$0xff] }
  0xfd   : > { %5240 = vmatpush1.bf16.msra.mxu0 %v8514_v35  ;;  %5404 = vmatpush1.bf16.msra.mxu1 %v8516_v36  ;;  %v8643_v35 = vcombine.high %v995_v28, %v1003_v29  ;;  %v1011_v36 = vld [vmem:[%s9765_s6 + $0x1500] sm:$0xff] }
  0xfe   : > { %5241 = vmatprep.subr.bf16.mxu0 %v8531_v37  ;;  %5405 = vmatprep.subr.bf16.mxu1 %v8533_v41  ;;  %v1019_v37 = vld [vmem:[%s9765_s6 + $0x1540] sm:$0xff]  ;;  %v8642_v41 = vcombine.low %v995_v28, %v1003_v29  ;;  %v1108_v28 = vld [vmem:[%s9765_s6 + $0x1808] sm:$0xff]  ;;  %v8741_v29 = vcombine.high %v1092_v18, %v1100_v20  ;;  %v429_v18 = vld [vmem:[%s9765_s6 + $0x2d0] sm:$0xff] }
  0xff   : > { %v430_v20 = vld [vmem:[%s9765_s6 + $0x2d8] sm:$0xff] }
 0x101   : > { %5242 = vmatpush1.bf16.msra.mxu0 %v8530_v43  ;;  %5406 = vmatpush1.bf16.msra.mxu1 %v8532_v44  ;;  %v8659_v43 = vcombine.high %v1011_v36, %v1019_v37  ;;  %v1027_v44 = vld [vmem:[%s9765_s6 + $0x1580] sm:$0xff] }
 0x102   : > { %5243 = vmatprep.subr.bf16.mxu0 %v8547_v45  ;;  %5407 = vmatprep.subr.bf16.mxu1 %v8549_v49  ;;  %v1035_v45 = vld [vmem:[%s9765_s6 + $0x15c0] sm:$0xff]  ;;  %v8658_v49 = vcombine.low %v1011_v36, %v1019_v37  ;;  %v341_v36 = vld [vmem:[%s9765_s6 + $0x10] sm:$0xff] }
 0x103   : > { %v349_v37 = vld [vmem:[%s9765_s6 + $0x50] sm:$0xff] }
 0x105   : > { %5244 = vmatpush1.bf16.msra.mxu0 %v8546_v51  ;;  %5408 = vmatpush1.bf16.msra.mxu1 %v8548_v52  ;;  %v8675_v51 = vcombine.high %v1027_v44, %v1035_v45  ;;  %v1043_v52 = vld [vmem:[%s9765_s6 + $0x1600] sm:$0xff] }
 0x106   : > { %5245 = vmatprep.subr.bf16.mxu0 %v8563_v53  ;;  %5409 = vmatprep.subr.bf16.mxu1 %v8565_v59  ;;  %v1051_v53 = vld [vmem:[%s9765_s6 + $0x1640] sm:$0xff]  ;;  %v8674_v59 = vcombine.low %v1027_v44, %v1035_v45  ;;  %v357_v44 = vld [vmem:[%s9765_s6 + $0x90] sm:$0xff] }
 0x107   : > { %v365_v45 = vld [vmem:[%s9765_s6 + $0xd0] sm:$0xff] }
 0x109   : > { %5246 = vmatpush1.bf16.msra.mxu0 %v8562_v61  ;;  %5410 = vmatpush1.bf16.msra.mxu1 %v8564_v62  ;;  %v8691_v61 = vcombine.high %v1043_v52, %v1051_v53  ;;  %v1059_v62 = vld [vmem:[%s9765_s6 + $0x1680] sm:$0xff] }
 0x10a   : > { %5247 = vmatprep.subr.bf16.mxu0 %v8579_v63  ;;  %5411 = vmatprep.subr.bf16.mxu1 %v8581_v3  ;;  %v1067_v63 = vld [vmem:[%s9765_s6 + $0x16c0] sm:$0xff]  ;;  %v8690_v3 = vcombine.low %v1043_v52, %v1051_v53  ;;  %v373_v53 = vld [vmem:[%s9765_s6 + $0x110] sm:$0xff] }
 0x10d   : > { %5248 = vmatpush1.bf16.msra.mxu0 %v8578_v5  ;;  %5412 = vmatpush1.bf16.msra.mxu1 %v8580_v6  ;;  %v8707_v5 = vcombine.high %v1059_v62, %v1067_v63  ;;  %v1075_v6 = vld [vmem:[%s9765_s6 + $0x1700] sm:$0xff] }
 0x10e   : > { %5249 = vmatprep.subr.bf16.mxu0 %v8595_v7  ;;  %5413 = vmatprep.subr.bf16.mxu1 %v8597_v11  ;;  %v1083_v7 = vld [vmem:[%s9765_s6 + $0x1740] sm:$0xff]  ;;  %v8706_v11 = vcombine.low %v1059_v62, %v1067_v63  ;;  %v389_v63 = vld [vmem:[%s9765_s6 + $0x190] sm:$0xff] }
 0x111   : > { %5250 = vmatpush1.bf16.msra.mxu0 %v8594_v14  ;;  %5414 = vmatpush1.bf16.msra.mxu1 %v8596_v15  ;;  %v8723_v14 = vcombine.high %v1075_v6, %v1083_v7  ;;  %v1091_v15 = vld [vmem:[%s9765_s6 + $0x1780] sm:$0xff] }
 0x112   : > { %5251 = vmatprep.subr.bf16.mxu0 %v8611_v17  ;;  %5415 = vmatprep.subr.bf16.mxu1 %v8613_v21  ;;  %v1099_v17 = vld [vmem:[%s9765_s6 + $0x17c0] sm:$0xff]  ;;  %v8722_v21 = vcombine.low %v1075_v6, %v1083_v7  ;;  %v405_v7 = vld [vmem:[%s9765_s6 + $0x210] sm:$0xff] }
 0x115   : > { %5252 = vmatpush1.bf16.msra.mxu0 %v8610_v23  ;;  %5416 = vmatpush1.bf16.msra.mxu1 %v8612_v24  ;;  %v8739_v23 = vcombine.high %v1091_v15, %v1099_v17  ;;  %v1107_v24 = vld [vmem:[%s9765_s6 + $0x1800] sm:$0xff] }
 0x116   : > { %5253 = vmatprep.subr.bf16.mxu0 %v8627_v27  ;;  %5417 = vmatprep.subr.bf16.mxu1 %v8629_v31  ;;  %v1115_v27 = vld [vmem:[%s9765_s6 + $0x1840] sm:$0xff]  ;;  %v8738_v31 = vcombine.low %v1091_v15, %v1099_v17  ;;  %v421_v17 = vld [vmem:[%s9765_s6 + $0x290] sm:$0xff] }
 0x117   : > { %v8754_v38 = vcombine.low %v1107_v24, %v1115_v27 }
 0x119   : > { %5254 = vmatpush1.bf16.msra.mxu0 %v8626_v33  ;;  %5418 = vmatpush1.bf16.msra.mxu1 %v8628_v34  ;;  %v8755_v33 = vcombine.high %v1107_v24, %v1115_v27  ;;  %v8757_v34 = vcombine.high %v1108_v28, %v1116_v30  ;;  %v437_v27 = vld [vmem:[%s9765_s6 + $0x310] sm:$0xff] }
 0x11a   : > { %5255 = vmatprep.subr.bf16.mxu0 %v8643_v35  ;;  %5419 = vmatprep.subr.bf16.mxu1 %v8645_v39  ;;  %v10028_v35 = vcombine.low %v9952_v25, %v9952_v25  ;;  %v342_v39 = vld [vmem:[%s9765_s6 + $0x18] sm:$0xff]  ;;  %v9563_v25 = vmov 0  }
 0x11d   : > { %5256 = vmatpush1.bf16.msra.mxu0 %v8642_v41  ;;  %5420 = vmatpush1.bf16.msra.mxu1 %v8644_v42  ;;  %v8756_v41 = vcombine.low %v1108_v28, %v1116_v30  ;;  %v7991_v42 = vcombine.high %v341_v36, %v349_v37  ;;  %v445_v28 = vld [vmem:[%s9765_s6 + $0x350] sm:$0xff]  ;;  %v446_v30 = vld [vmem:[%s9765_s6 + $0x358] sm:$0xff] }
 0x11e   : > { %5257 = vmatprep.subr.bf16.mxu0 %v8659_v43  ;;  %5421 = vmatprep.subr.bf16.mxu1 %v8661_v47  ;;  %v7993_v43 = vcombine.high %v342_v39, %v350_v40  ;;  %v358_v47 = vld [vmem:[%s9765_s6 + $0x98] sm:$0xff] }
 0x11f   : > { %v8009_v52 = vcombine.high %v358_v47, %v366_v48 }
 0x121   : > { %5258 = vmatpush1.bf16.msra.mxu0 %v8658_v49  ;;  %5422 = vmatpush1.bf16.msra.mxu1 %v8660_v50  ;;  %v7990_v49 = vcombine.low %v341_v36, %v349_v37  ;;  %v7992_v50 = vcombine.low %v342_v39, %v350_v40  ;;  %v453_v36 = vld [vmem:[%s9765_s6 + $0x390] sm:$0xff]  ;;  %v462_v39 = vld [vmem:[%s9765_s6 + $0x3d8] sm:$0xff]  ;;  %v8086_v40 = vcombine.low %v437_v27, %v445_v28 }
 0x122   : > { %5259 = vmatprep.subr.bf16.mxu0 %v8675_v51  ;;  %5423 = vmatprep.subr.bf16.mxu1 %v8677_v56  ;;  %v8007_v51 = vcombine.high %v357_v44, %v365_v45  ;;  %v374_v56 = vld [vmem:[%s9765_s6 + $0x118] sm:$0xff]  ;;  %v461_v37 = vld [vmem:[%s9765_s6 + $0x3d0] sm:$0xff] }
 0x123   : > { %v8025_v62 = vcombine.high %v374_v56, %v382_v57 }
 0x125   : > { %5260 = vmatpush1.bf16.msra.mxu0 %v8674_v59  ;;  %5424 = vmatpush1.bf16.msra.mxu1 %v8676_v60  ;;  %v8006_v59 = vcombine.low %v357_v44, %v365_v45  ;;  %v8008_v60 = vcombine.low %v358_v47, %v366_v48  ;;  %v469_v44 = vld [vmem:[%s9765_s6 + $0x410] sm:$0xff]  ;;  %v478_v47 = vld [vmem:[%s9765_s6 + $0x458] sm:$0xff]  ;;  %v8102_v48 = vcombine.low %v453_v36, %v461_v37 }
 0x126   : > { %5261 = vmatprep.subr.bf16.mxu0 %v8691_v61  ;;  %5425 = vmatprep.subr.bf16.mxu1 %v8693_v1  ;;  %v8023_v61 = vcombine.high %v373_v53, %v381_v55  ;;  %v390_v1 = vld [vmem:[%s9765_s6 + $0x198] sm:$0xff]  ;;  %v477_v45 = vld [vmem:[%s9765_s6 + $0x450] sm:$0xff] }
 0x127   : > { %v8041_v6 = vcombine.high %v390_v1, %v398_v2 }
 0x129   : > { %5262 = vmatpush1.bf16.msra.mxu0 %v8690_v3  ;;  %5426 = vmatpush1.bf16.msra.mxu1 %v8692_v4  ;;  %v8022_v3 = vcombine.low %v373_v53, %v381_v55  ;;  %v8024_v4 = vcombine.low %v374_v56, %v382_v57  ;;  %v493_v53 = vld [vmem:[%s9765_s6 + $0x4d0] sm:$0xff]  ;;  %v486_v55 = vld [vmem:[%s9765_s6 + $0x498] sm:$0xff]  ;;  %v8118_v57 = vcombine.low %v469_v44, %v477_v45 }
 0x12a   : > { %5263 = vmatprep.subr.bf16.mxu0 %v8707_v5  ;;  %5427 = vmatprep.subr.bf16.mxu1 %v8709_v9  ;;  %v8039_v5 = vcombine.high %v389_v63, %v397_v0  ;;  %v406_v9 = vld [vmem:[%s9765_s6 + $0x218] sm:$0xff] }
 0x12b   : > { %v8057_v15 = vcombine.high %v406_v9, %v414_v10  ;;  %v494_v56 = vld [vmem:[%s9765_s6 + $0x4d8] sm:$0xff] }
 0x12d   : > { %5264 = vmatpush1.bf16.msra.mxu0 %v8706_v11  ;;  %5428 = vmatpush1.bf16.msra.mxu1 %v8708_v12  ;;  %v8038_v11 = vcombine.low %v389_v63, %v397_v0  ;;  %v8040_v12 = vcombine.low %v390_v1, %v398_v2  ;;  %v509_v63 = vld [vmem:[%s9765_s6 + $0x550] sm:$0xff]  ;;  %v502_v0 = vld [vmem:[%s9765_s6 + $0x518] sm:$0xff] }
 0x12e   : > { %5265 = vmatprep.subr.bf16.mxu0 %v8723_v14  ;;  %5429 = vmatprep.subr.bf16.mxu1 %v8725_v19  ;;  %v8055_v14 = vcombine.high %v405_v7, %v413_v8  ;;  %v422_v19 = vld [vmem:[%s9765_s6 + $0x298] sm:$0xff] }
 0x12f   : > { %v8073_v24 = vcombine.high %v422_v19, %v430_v20  ;;  %v510_v1 = vld [vmem:[%s9765_s6 + $0x558] sm:$0xff] }
 0x131   : > { %5266 = vmatpush1.bf16.msra.mxu0 %v8722_v21  ;;  %5430 = vmatpush1.bf16.msra.mxu1 %v8724_v54  ;;  %v8054_v21 = vcombine.low %v405_v7, %v413_v8  ;;  %v8056_v54 = vcombine.low %v406_v9, %v414_v10  ;;  %v525_v7 = vld [vmem:[%s9765_s6 + $0x5d0] sm:$0xff]  ;;  %v518_v8 = vld [vmem:[%s9765_s6 + $0x598] sm:$0xff] }
 0x132   : > { %5267 = vmatprep.subr.bf16.mxu0 %v8739_v23  ;;  %5431 = vmatprep.subr.bf16.mxu1 %v8741_v29  ;;  %v8071_v23 = vcombine.high %v421_v17, %v429_v18  ;;  %v438_v29 = vld [vmem:[%s9765_s6 + $0x318] sm:$0xff] }
 0x133   : > { %v526_v9 = vld [vmem:[%s9765_s6 + $0x5d8] sm:$0xff] }
 0x135   : > { %5268 = vmatpush1.bf16.msra.mxu0 %v8738_v31  ;;  %5432 = vmatpush1.bf16.msra.mxu1 %v8740_v32  ;;  %v8070_v31 = vcombine.low %v421_v17, %v429_v18  ;;  %v8072_v32 = vcombine.low %v422_v19, %v430_v20  ;;  %v541_v17 = vld [vmem:[%s9765_s6 + $0x650] sm:$0xff]  ;;  %v534_v18 = vld [vmem:[%s9765_s6 + $0x618] sm:$0xff] }
 0x136   : > { %5278 = vmatprep.subr.bf16.mxu0 %v8755_v33  ;;  %5442 = vmatprep.subr.bf16.mxu1 %v8757_v34  ;;  %v8087_v33 = vcombine.high %v437_v27, %v445_v28  ;;  %v8089_v34 = vcombine.high %v438_v29, %v446_v30  ;;  %v542_v19 = vld [vmem:[%s9765_s6 + $0x658] sm:$0xff]  ;;  %v557_v27 = vld [vmem:[%s9765_s6 + $0x6d0] sm:$0xff] }
 0x137   : > { %v550_v28 = vld [vmem:[%s9765_s6 + $0x698] sm:$0xff] }
 0x138   : > { %5270 = vmatmul.mubr.bf16.vlgmr.msra.gmra.mrb[0].mxu0 %v10028_v35  ;;  %5434 = vmatmul.mubr.bf16.vlgmr.msra.gmra.mrb[0].mxu1 %v10028_v35 }
 0x139   : > { %5279 = vmatpush1.bf16.msra.mxu0 %v8754_v38  ;;  %5443 = vmatpush1.bf16.msra.mxu1 %v8756_v41  ;;  %v454_v38 = vld [vmem:[%s9765_s6 + $0x398] sm:$0xff]  ;;  %v8088_v41 = vcombine.low %v438_v29, %v446_v30 }
 0x13a   : > { %5310 = vmatprep.mubr.bf16.mxu0 %v9563_v25  ;;  %5474 = vmatprep.mubr.bf16.mxu1 %v9563_v25  ;;  %v558_v29 = vld [vmem:[%s9765_s6 + $0x6d8] sm:$0xff] }
 0x13b   : > { %5483 = vmatprep.subr.bf16.mxu0 %v7991_v42  ;;  %5647 = vmatprep.subr.bf16.mxu1 %v7993_v43  ;;  %v8103_v42 = vcombine.high %v453_v36, %v461_v37  ;;  %v8105_v43 = vcombine.high %v454_v38, %v462_v39  ;;  %v573_v36 = vld [vmem:[%s9765_s6 + $0x750] sm:$0xff]  ;;  %v566_v37 = vld [vmem:[%s9765_s6 + $0x718] sm:$0xff] }
 0x144   : > { %8770 = vmatmul.mubr.msk.bf16.vlgmr.msra.gmra.mrb[0].mxu0 %vm5151_vm0, %v9278_v46  ;;  %8771 = vmatmul.mubr.msk.bf16.vlgmr.msra.gmra.mrb[0].mxu1 %vm5151_vm0, %v9278_v46  ;;  %v470_v46 = vld [vmem:[%s9765_s6 + $0x418] sm:$0xff] }
 0x145   : > { %5484 = vmatpush1.bf16.msra.mxu0 %v7990_v49  ;;  %5648 = vmatpush1.bf16.msra.mxu1 %v7992_v50  ;;  %v8104_v49 = vcombine.low %v454_v38, %v462_v39  ;;  %v8119_v50 = vcombine.high %v469_v44, %v477_v45  ;;  %v574_v38 = vld [vmem:[%s9765_s6 + $0x758] sm:$0xff]  ;;  %v589_v44 = vld [vmem:[%s9765_s6 + $0x7d0] sm:$0xff] }
 0x146   : > { %5485 = vmatprep.subr.bf16.mxu0 %v8007_v51  ;;  %5649 = vmatprep.subr.bf16.mxu1 %v8009_v52  ;;  %v8121_v51 = vcombine.high %v470_v46, %v478_v47  ;;  %v485_v52 = vld [vmem:[%s9765_s6 + $0x490] sm:$0xff]  ;;  %v582_v45 = vld [vmem:[%s9765_s6 + $0x798] sm:$0xff] }
 0x147   : > { %5515 = vmatprep.mubr.bf16.mxu0 %v9822_v58  ;;  %5679 = vmatprep.mubr.bf16.mxu1 %v9822_v58  ;;  %v8134_v2 = vcombine.low %v485_v52, %v493_v53 }
 0x149   : > { %5486 = vmatpush1.bf16.msra.mxu0 %v8006_v59  ;;  %5650 = vmatpush1.bf16.msra.mxu1 %v8008_v60  ;;  %v8120_v59 = vcombine.low %v470_v46, %v478_v47  ;;  %v8135_v60 = vcombine.high %v485_v52, %v493_v53  ;;  %v590_v46 = vld [vmem:[%s9765_s6 + $0x7d8] sm:$0xff]  ;;  %v605_v52 = vld [vmem:[%s9765_s6 + $0x850] sm:$0xff] }
 0x14a   : > { %5487 = vmatprep.subr.bf16.mxu0 %v8023_v61  ;;  %5651 = vmatprep.subr.bf16.mxu1 %v8025_v62  ;;  %v8137_v61 = vcombine.high %v486_v55, %v494_v56  ;;  %v501_v62 = vld [vmem:[%s9765_s6 + $0x510] sm:$0xff]  ;;  %v598_v53 = vld [vmem:[%s9765_s6 + $0x818] sm:$0xff] }
 0x14b   : > { %v8150_v10 = vcombine.low %v501_v62, %v509_v63 }
 0x14d   : > { %5488 = vmatpush1.bf16.msra.mxu0 %v8022_v3  ;;  %5652 = vmatpush1.bf16.msra.mxu1 %v8024_v4  ;;  %v8136_v3 = vcombine.low %v486_v55, %v494_v56  ;;  %v8151_v4 = vcombine.high %v501_v62, %v509_v63  ;;  %v606_v55 = vld [vmem:[%s9765_s6 + $0x858] sm:$0xff]  ;;  %v621_v62 = vld [vmem:[%s9765_s6 + $0x8d0] sm:$0xff] }
 0x14e   : > { %5489 = vmatprep.subr.bf16.mxu0 %v8039_v5  ;;  %5653 = vmatprep.subr.bf16.mxu1 %v8041_v6  ;;  %v8153_v5 = vcombine.high %v502_v0, %v510_v1  ;;  %v517_v6 = vld [vmem:[%s9765_s6 + $0x590] sm:$0xff]  ;;  %v614_v63 = vld [vmem:[%s9765_s6 + $0x898] sm:$0xff] }
 0x14f   : > { %v8166_v20 = vcombine.low %v517_v6, %v525_v7 }
 0x151   : > { %5490 = vmatpush1.bf16.msra.mxu0 %v8038_v11  ;;  %5654 = vmatpush1.bf16.msra.mxu1 %v8040_v12  ;;  %v8152_v11 = vcombine.low %v502_v0, %v510_v1  ;;  %v8167_v12 = vcombine.high %v517_v6, %v525_v7  ;;  %v622_v0 = vld [vmem:[%s9765_s6 + $0x8d8] sm:$0xff]  ;;  %v637_v6 = vld [vmem:[%s9765_s6 + $0x950] sm:$0xff] }
 0x152   : > { %5491 = vmatprep.subr.bf16.mxu0 %v8055_v14  ;;  %5655 = vmatprep.subr.bf16.mxu1 %v8057_v15  ;;  %v8169_v14 = vcombine.high %v518_v8, %v526_v9  ;;  %v533_v15 = vld [vmem:[%s9765_s6 + $0x610] sm:$0xff]  ;;  %v630_v7 = vld [vmem:[%s9765_s6 + $0x918] sm:$0xff] }
 0x153   : > { %v8182_v30 = vcombine.low %v533_v15, %v541_v17 }
 0x155   : > { %5492 = vmatpush1.bf16.msra.mxu0 %v8054_v21  ;;  %5656 = vmatpush1.bf16.msra.mxu1 %v8056_v54  ;;  %v8168_v21 = vcombine.low %v518_v8, %v526_v9  ;;  %v8183_v54 = vcombine.high %v533_v15, %v541_v17  ;;  %v638_v8 = vld [vmem:[%s9765_s6 + $0x958] sm:$0xff]  ;;  %v653_v15 = vld [vmem:[%s9765_s6 + $0x9d0] sm:$0xff] }
 0x156   : > { %5493 = vmatprep.subr.bf16.mxu0 %v8071_v23  ;;  %5657 = vmatprep.subr.bf16.mxu1 %v8073_v24  ;;  %v8185_v23 = vcombine.high %v534_v18, %v542_v19  ;;  %v549_v24 = vld [vmem:[%s9765_s6 + $0x690] sm:$0xff]  ;;  %v646_v17 = vld [vmem:[%s9765_s6 + $0x998] sm:$0xff] }
 0x157   : > { %v8198_v39 = vcombine.low %v549_v24, %v557_v27 }
 0x159   : > { %5494 = vmatpush1.bf16.msra.mxu0 %v8070_v31  ;;  %5658 = vmatpush1.bf16.msra.mxu1 %v8072_v32  ;;  %v8184_v31 = vcombine.low %v534_v18, %v542_v19  ;;  %v8199_v32 = vcombine.high %v549_v24, %v557_v27  ;;  %v654_v18 = vld [vmem:[%s9765_s6 + $0x9d8] sm:$0xff]  ;;  %v669_v24 = vld [vmem:[%s9765_s6 + $0xa50] sm:$0xff] }
 0x15a   : > { %5495 = vmatprep.subr.bf16.mxu0 %v8087_v33  ;;  %5659 = vmatprep.subr.bf16.mxu1 %v8089_v34  ;;  %v8201_v33 = vcombine.high %v550_v28, %v558_v29  ;;  %v565_v34 = vld [vmem:[%s9765_s6 + $0x710] sm:$0xff]  ;;  %v662_v27 = vld [vmem:[%s9765_s6 + $0xa18] sm:$0xff] }
 0x15b   : > { %v8214_v47 = vcombine.low %v565_v34, %v573_v36 }
 0x15d   : > { %5496 = vmatpush1.bf16.msra.mxu0 %v8086_v40  ;;  %5660 = vmatpush1.bf16.msra.mxu1 %v8088_v41  ;;  %v8200_v40 = vcombine.low %v550_v28, %v558_v29  ;;  %v8215_v41 = vcombine.high %v565_v34, %v573_v36  ;;  %v670_v28 = vld [vmem:[%s9765_s6 + $0xa58] sm:$0xff]  ;;  %v685_v34 = vld [vmem:[%s9765_s6 + $0xad0] sm:$0xff] }
 0x15e   : > { %5497 = vmatprep.subr.bf16.mxu0 %v8103_v42  ;;  %5661 = vmatprep.subr.bf16.mxu1 %v8105_v43  ;;  %v8217_v42 = vcombine.high %v566_v37, %v574_v38  ;;  %v581_v43 = vld [vmem:[%s9765_s6 + $0x790] sm:$0xff]  ;;  %v678_v36 = vld [vmem:[%s9765_s6 + $0xa98] sm:$0xff] }
 0x15f   : > { %v8230_v56 = vcombine.low %v581_v43, %v589_v44 }
 0x161   : > { %5498 = vmatpush1.bf16.msra.mxu0 %v8102_v48  ;;  %5662 = vmatpush1.bf16.msra.mxu1 %v8104_v49  ;;  %v8216_v48 = vcombine.low %v566_v37, %v574_v38  ;;  %v8231_v49 = vcombine.high %v581_v43, %v589_v44  ;;  %v686_v37 = vld [vmem:[%s9765_s6 + $0xad8] sm:$0xff]  ;;  %v701_v43 = vld [vmem:[%s9765_s6 + $0xb50] sm:$0xff] }
 0x162   : > { %5499 = vmatprep.subr.bf16.mxu0 %v8119_v50  ;;  %5663 = vmatprep.subr.bf16.mxu1 %v8121_v51  ;;  %v8233_v50 = vcombine.high %v582_v45, %v590_v46  ;;  %v597_v51 = vld [vmem:[%s9765_s6 + $0x810] sm:$0xff]  ;;  %v694_v44 = vld [vmem:[%s9765_s6 + $0xb18] sm:$0xff] }
 0x163   : > { %v8246_v1 = vcombine.low %v597_v51, %v605_v52 }
 0x165   : > { %5500 = vmatpush1.bf16.msra.mxu0 %v8118_v57  ;;  %5664 = vmatpush1.bf16.msra.mxu1 %v8120_v59  ;;  %v8232_v57 = vcombine.low %v582_v45, %v590_v46  ;;  %v8247_v59 = vcombine.high %v597_v51, %v605_v52  ;;  %v702_v45 = vld [vmem:[%s9765_s6 + $0xb58] sm:$0xff]  ;;  %v717_v51 = vld [vmem:[%s9765_s6 + $0xbd0] sm:$0xff] }
 0x166   : > { %5501 = vmatprep.subr.bf16.mxu0 %v8135_v60  ;;  %5665 = vmatprep.subr.bf16.mxu1 %v8137_v61  ;;  %v8249_v60 = vcombine.high %v598_v53, %v606_v55  ;;  %v613_v61 = vld [vmem:[%s9765_s6 + $0x890] sm:$0xff]  ;;  %v710_v52 = vld [vmem:[%s9765_s6 + $0xb98] sm:$0xff] }
 0x167   : > { %v8262_v9 = vcombine.low %v613_v61, %v621_v62 }
 0x169   : > { %5502 = vmatpush1.bf16.msra.mxu0 %v8134_v2  ;;  %5666 = vmatpush1.bf16.msra.mxu1 %v8136_v3  ;;  %v8248_v2 = vcombine.low %v598_v53, %v606_v55  ;;  %v8263_v3 = vcombine.high %v613_v61, %v621_v62  ;;  %v718_v53 = vld [vmem:[%s9765_s6 + $0xbd8] sm:$0xff]  ;;  %v733_v61 = vld [vmem:[%s9765_s6 + $0xc50] sm:$0xff] }
 0x16a   : > { %5503 = vmatprep.subr.bf16.mxu0 %v8151_v4  ;;  %5667 = vmatprep.subr.bf16.mxu1 %v8153_v5  ;;  %v8265_v4 = vcombine.high %v614_v63, %v622_v0  ;;  %v629_v5 = vld [vmem:[%s9765_s6 + $0x910] sm:$0xff]  ;;  %v726_v62 = vld [vmem:[%s9765_s6 + $0xc18] sm:$0xff] }
 0x16b   : > { %v8278_v19 = vcombine.low %v629_v5, %v637_v6 }
 0x16d   : > { %5504 = vmatpush1.bf16.msra.mxu0 %v8150_v10  ;;  %5668 = vmatpush1.bf16.msra.mxu1 %v8152_v11  ;;  %v8264_v10 = vcombine.low %v614_v63, %v622_v0  ;;  %v8279_v11 = vcombine.high %v629_v5, %v637_v6  ;;  %v734_v63 = vld [vmem:[%s9765_s6 + $0xc58] sm:$0xff]  ;;  %v749_v5 = vld [vmem:[%s9765_s6 + $0xcd0] sm:$0xff] }
 0x16e   : > { %5505 = vmatprep.subr.bf16.mxu0 %v8167_v12  ;;  %5669 = vmatprep.subr.bf16.mxu1 %v8169_v14  ;;  %v8281_v12 = vcombine.high %v630_v7, %v638_v8  ;;  %v645_v14 = vld [vmem:[%s9765_s6 + $0x990] sm:$0xff]  ;;  %v742_v6 = vld [vmem:[%s9765_s6 + $0xc98] sm:$0xff] }
 0x16f   : > { %v8294_v29 = vcombine.low %v645_v14, %v653_v15 }
 0x171   : > { %5506 = vmatpush1.bf16.msra.mxu0 %v8166_v20  ;;  %5670 = vmatpush1.bf16.msra.mxu1 %v8168_v21  ;;  %v8280_v20 = vcombine.low %v630_v7, %v638_v8  ;;  %v8295_v21 = vcombine.high %v645_v14, %v653_v15  ;;  %v750_v7 = vld [vmem:[%s9765_s6 + $0xcd8] sm:$0xff]  ;;  %v765_v14 = vld [vmem:[%s9765_s6 + $0xd50] sm:$0xff] }
 0x172   : > { %5507 = vmatprep.subr.bf16.mxu0 %v8183_v54  ;;  %5671 = vmatprep.subr.bf16.mxu1 %v8185_v23  ;;  %v8297_v54 = vcombine.high %v646_v17, %v654_v18  ;;  %v661_v23 = vld [vmem:[%s9765_s6 + $0xa10] sm:$0xff]  ;;  %v758_v15 = vld [vmem:[%s9765_s6 + $0xd18] sm:$0xff] }
 0x173   : > { %v8310_v38 = vcombine.low %v661_v23, %v669_v24 }
 0x175   : > { %5508 = vmatpush1.bf16.msra.mxu0 %v8182_v30  ;;  %5672 = vmatpush1.bf16.msra.mxu1 %v8184_v31  ;;  %v8296_v30 = vcombine.low %v646_v17, %v654_v18  ;;  %v8311_v31 = vcombine.high %v661_v23, %v669_v24  ;;  %v766_v17 = vld [vmem:[%s9765_s6 + $0xd58] sm:$0xff]  ;;  %v781_v23 = vld [vmem:[%s9765_s6 + $0xdd0] sm:$0xff] }
 0x176   : > { %5509 = vmatprep.subr.bf16.mxu0 %v8199_v32  ;;  %5673 = vmatprep.subr.bf16.mxu1 %v8201_v33  ;;  %v8313_v32 = vcombine.high %v662_v27, %v670_v28  ;;  %v677_v33 = vld [vmem:[%s9765_s6 + $0xa90] sm:$0xff]  ;;  %v774_v24 = vld [vmem:[%s9765_s6 + $0xd98] sm:$0xff] }
 0x177   : > { %v8326_v46 = vcombine.low %v677_v33, %v685_v34 }
 0x179   : > { %5510 = vmatpush1.bf16.msra.mxu0 %v8198_v39  ;;  %5674 = vmatpush1.bf16.msra.mxu1 %v8200_v40  ;;  %v8312_v39 = vcombine.low %v662_v27, %v670_v28  ;;  %v8327_v40 = vcombine.high %v677_v33, %v685_v34  ;;  %v782_v27 = vld [vmem:[%s9765_s6 + $0xdd8] sm:$0xff]  ;;  %v797_v33 = vld [vmem:[%s9765_s6 + $0xe50] sm:$0xff] }
 0x17a   : > { %5511 = vmatprep.subr.bf16.mxu0 %v8215_v41  ;;  %5675 = vmatprep.subr.bf16.mxu1 %v8217_v42  ;;  %v8329_v41 = vcombine.high %v678_v36, %v686_v37  ;;  %v693_v42 = vld [vmem:[%s9765_s6 + $0xb10] sm:$0xff]  ;;  %v790_v34 = vld [vmem:[%s9765_s6 + $0xe18] sm:$0xff] }
 0x17b   : > { %v8342_v55 = vcombine.low %v693_v42, %v701_v43 }
 0x17d   : > { %5512 = vmatpush1.bf16.msra.mxu0 %v8214_v47  ;;  %5676 = vmatpush1.bf16.msra.mxu1 %v8216_v48  ;;  %v8328_v47 = vcombine.low %v678_v36, %v686_v37  ;;  %v8343_v48 = vcombine.high %v693_v42, %v701_v43  ;;  %v798_v36 = vld [vmem:[%s9765_s6 + $0xe58] sm:$0xff]  ;;  %v813_v42 = vld [vmem:[%s9765_s6 + $0xed0] sm:$0xff] }
 0x17e   : > { %5513 = vmatprep.subr.bf16.mxu0 %v8231_v49  ;;  %5677 = vmatprep.subr.bf16.mxu1 %v8233_v50  ;;  %v8345_v49 = vcombine.high %v694_v44, %v702_v45  ;;  %v709_v50 = vld [vmem:[%s9765_s6 + $0xb90] sm:$0xff]  ;;  %v806_v43 = vld [vmem:[%s9765_s6 + $0xe98] sm:$0xff] }
 0x17f   : > { %v8358_v0 = vcombine.low %v709_v50, %v717_v51 }
 0x181   : > { %5514 = vmatpush1.bf16.msra.mxu0 %v8230_v56  ;;  %5678 = vmatpush1.bf16.msra.mxu1 %v8232_v57  ;;  %v8344_v56 = vcombine.low %v694_v44, %v702_v45  ;;  %v8359_v57 = vcombine.high %v709_v50, %v717_v51  ;;  %v814_v44 = vld [vmem:[%s9765_s6 + $0xed8] sm:$0xff]  ;;  %v829_v50 = vld [vmem:[%s9765_s6 + $0xf50] sm:$0xff] }
 0x182   : > { %5524 = vmatprep.subr.bf16.mxu0 %v8247_v59  ;;  %5688 = vmatprep.subr.bf16.mxu1 %v8249_v60  ;;  %v8361_v59 = vcombine.high %v710_v52, %v718_v53  ;;  %v725_v60 = vld [vmem:[%s9765_s6 + $0xc10] sm:$0xff]  ;;  %v822_v51 = vld [vmem:[%s9765_s6 + $0xf18] sm:$0xff] }
 0x183   : > { %v8374_v8 = vcombine.low %v725_v60, %v733_v61 }
 0x184   : > { %5516 = vmatmul.mubr.bf16.vlgmr.msra.gmra.mrb[4].mxu0 %v9868_v13  ;;  %5680 = vmatmul.mubr.bf16.vlgmr.msra.gmra.mrb[4].mxu1 %v9868_v13 }
 0x185   : > { %5525 = vmatpush1.bf16.msra.mxu0 %v8246_v1  ;;  %5689 = vmatpush1.bf16.msra.mxu1 %v8248_v2  ;;  %v8360_v1 = vcombine.low %v710_v52, %v718_v53  ;;  %v8375_v2 = vcombine.high %v725_v60, %v733_v61  ;;  %v830_v52 = vld [vmem:[%s9765_s6 + $0xf58] sm:$0xff]  ;;  %v845_v60 = vld [vmem:[%s9765_s6 + $0xfd0] sm:$0xff] }
 0x186   : > { %5526 = vmatprep.subr.bf16.mxu0 %v8263_v3  ;;  %5690 = vmatprep.subr.bf16.mxu1 %v8265_v4  ;;  %v8377_v3 = vcombine.high %v726_v62, %v734_v63  ;;  %v741_v4 = vld [vmem:[%s9765_s6 + $0xc90] sm:$0xff]  ;;  %v838_v61 = vld [vmem:[%s9765_s6 + $0xf98] sm:$0xff] }
 0x187   : > { %5556 = vmatprep.mubr.bf16.mxu0 %v9881_v22  ;;  %5720 = vmatprep.mubr.bf16.mxu1 %v9881_v22  ;;  %v8390_v18 = vcombine.low %v741_v4, %v749_v5 }
 0x189   : > { %5527 = vmatpush1.bf16.msra.mxu0 %v8262_v9  ;;  %5691 = vmatpush1.bf16.msra.mxu1 %v8264_v10  ;;  %v8376_v9 = vcombine.low %v726_v62, %v734_v63  ;;  %v8391_v10 = vcombine.high %v741_v4, %v749_v5  ;;  %v846_v62 = vld [vmem:[%s9765_s6 + $0xfd8] sm:$0xff]  ;;  %v861_v4 = vld [vmem:[%s9765_s6 + $0x1050] sm:$0xff] }
 0x18a   : > { %5528 = vmatprep.subr.bf16.mxu0 %v8279_v11  ;;  %5692 = vmatprep.subr.bf16.mxu1 %v8281_v12  ;;  %v8393_v11 = vcombine.high %v742_v6, %v750_v7  ;;  %v757_v12 = vld [vmem:[%s9765_s6 + $0xd10] sm:$0xff]  ;;  %v854_v5 = vld [vmem:[%s9765_s6 + $0x1018] sm:$0xff] }
 0x18b   : > { %v8406_v28 = vcombine.low %v757_v12, %v765_v14 }
 0x18d   : > { %5529 = vmatpush1.bf16.msra.mxu0 %v8278_v19  ;;  %5693 = vmatpush1.bf16.msra.mxu1 %v8280_v20  ;;  %v8392_v19 = vcombine.low %v742_v6, %v750_v7  ;;  %v8407_v20 = vcombine.high %v757_v12, %v765_v14  ;;  %v862_v6 = vld [vmem:[%s9765_s6 + $0x1058] sm:$0xff]  ;;  %v877_v12 = vld [vmem:[%s9765_s6 + $0x10d0] sm:$0xff] }
 0x18e   : > { %5530 = vmatprep.subr.bf16.mxu0 %v8295_v21  ;;  %5694 = vmatprep.subr.bf16.mxu1 %v8297_v54  ;;  %v8409_v21 = vcombine.high %v758_v15, %v766_v17  ;;  %v773_v54 = vld [vmem:[%s9765_s6 + $0xd90] sm:$0xff]  ;;  %v870_v14 = vld [vmem:[%s9765_s6 + $0x1098] sm:$0xff] }
 0x18f   : > { %v8422_v37 = vcombine.low %v773_v54, %v781_v23 }
 0x191   : > { %5531 = vmatpush1.bf16.msra.mxu0 %v8294_v29  ;;  %5695 = vmatpush1.bf16.msra.mxu1 %v8296_v30  ;;  %v8408_v29 = vcombine.low %v758_v15, %v766_v17  ;;  %v8423_v30 = vcombine.high %v773_v54, %v781_v23  ;;  %v878_v15 = vld [vmem:[%s9765_s6 + $0x10d8] sm:$0xff]  ;;  %v893_v54 = vld [vmem:[%s9765_s6 + $0x1150] sm:$0xff] }
 0x192   : > { %5532 = vmatprep.subr.bf16.mxu0 %v8311_v31  ;;  %5696 = vmatprep.subr.bf16.mxu1 %v8313_v32  ;;  %v8425_v31 = vcombine.high %v774_v24, %v782_v27  ;;  %v789_v32 = vld [vmem:[%s9765_s6 + $0xe10] sm:$0xff]  ;;  %v886_v23 = vld [vmem:[%s9765_s6 + $0x1118] sm:$0xff] }
 0x193   : > { %v8438_v45 = vcombine.low %v789_v32, %v797_v33 }
 0x195   : > { %5533 = vmatpush1.bf16.msra.mxu0 %v8310_v38  ;;  %5697 = vmatpush1.bf16.msra.mxu1 %v8312_v39  ;;  %v8424_v38 = vcombine.low %v774_v24, %v782_v27  ;;  %v8439_v39 = vcombine.high %v789_v32, %v797_v33  ;;  %v894_v24 = vld [vmem:[%s9765_s6 + $0x1158] sm:$0xff]  ;;  %v909_v32 = vld [vmem:[%s9765_s6 + $0x11d0] sm:$0xff] }
 0x196   : > { %5534 = vmatprep.subr.bf16.mxu0 %v8327_v40  ;;  %5698 = vmatprep.subr.bf16.mxu1 %v8329_v41  ;;  %v8441_v40 = vcombine.high %v790_v34, %v798_v36  ;;  %v805_v41 = vld [vmem:[%s9765_s6 + $0xe90] sm:$0xff]  ;;  %v902_v33 = vld [vmem:[%s9765_s6 + $0x1198] sm:$0xff] }
 0x197   : > { %v8454_v53 = vcombine.low %v805_v41, %v813_v42 }
 0x199   : > { %5535 = vmatpush1.bf16.msra.mxu0 %v8326_v46  ;;  %5699 = vmatpush1.bf16.msra.mxu1 %v8328_v47  ;;  %v8440_v46 = vcombine.low %v790_v34, %v798_v36  ;;  %v8455_v47 = vcombine.high %v805_v41, %v813_v42  ;;  %v910_v34 = vld [vmem:[%s9765_s6 + $0x11d8] sm:$0xff]  ;;  %v925_v41 = vld [vmem:[%s9765_s6 + $0x1250] sm:$0xff] }
 0x19a   : > { %5536 = vmatprep.subr.bf16.mxu0 %v8343_v48  ;;  %5700 = vmatprep.subr.bf16.mxu1 %v8345_v49  ;;  %v8457_v48 = vcombine.high %v806_v43, %v814_v44  ;;  %v821_v49 = vld [vmem:[%s9765_s6 + $0xf10] sm:$0xff]  ;;  %v918_v42 = vld [vmem:[%s9765_s6 + $0x1218] sm:$0xff] }
 0x19b   : > { %v8470_v63 = vcombine.low %v821_v49, %v829_v50 }
 0x19d   : > { %5537 = vmatpush1.bf16.msra.mxu0 %v8342_v55  ;;  %5701 = vmatpush1.bf16.msra.mxu1 %v8344_v56  ;;  %v8456_v55 = vcombine.low %v806_v43, %v814_v44  ;;  %v8471_v56 = vcombine.high %v821_v49, %v829_v50  ;;  %v926_v43 = vld [vmem:[%s9765_s6 + $0x1258] sm:$0xff]  ;;  %v941_v49 = vld [vmem:[%s9765_s6 + $0x12d0] sm:$0xff] }
 0x19e   : > { %5538 = vmatprep.subr.bf16.mxu0 %v8359_v57  ;;  %5702 = vmatprep.subr.bf16.mxu1 %v8361_v59  ;;  %v8473_v57 = vcombine.high %v822_v51, %v830_v52  ;;  %v837_v59 = vld [vmem:[%s9765_s6 + $0xf90] sm:$0xff]  ;;  %v934_v50 = vld [vmem:[%s9765_s6 + $0x1298] sm:$0xff] }
 0x19f   : > { %v8486_v7 = vcombine.low %v837_v59, %v845_v60 }
 0x1a1   : > { %5539 = vmatpush1.bf16.msra.mxu0 %v8358_v0  ;;  %5703 = vmatpush1.bf16.msra.mxu1 %v8360_v1  ;;  %v8472_v0 = vcombine.low %v822_v51, %v830_v52  ;;  %v8487_v1 = vcombine.high %v837_v59, %v845_v60  ;;  %v942_v51 = vld [vmem:[%s9765_s6 + $0x12d8] sm:$0xff]  ;;  %v957_v59 = vld [vmem:[%s9765_s6 + $0x1350] sm:$0xff] }
 0x1a2   : > { %5540 = vmatprep.subr.bf16.mxu0 %v8375_v2  ;;  %5704 = vmatprep.subr.bf16.mxu1 %v8377_v3  ;;  %v8489_v2 = vcombine.high %v838_v61, %v846_v62  ;;  %v853_v3 = vld [vmem:[%s9765_s6 + $0x1010] sm:$0xff]  ;;  %v950_v60 = vld [vmem:[%s9765_s6 + $0x1318] sm:$0xff] }
 0x1a3   : > { %v8502_v17 = vcombine.low %v853_v3, %v861_v4 }
 0x1a5   : > { %5541 = vmatpush1.bf16.msra.mxu0 %v8374_v8  ;;  %5705 = vmatpush1.bf16.msra.mxu1 %v8376_v9  ;;  %v8488_v8 = vcombine.low %v838_v61, %v846_v62  ;;  %v8503_v9 = vcombine.high %v853_v3, %v861_v4  ;;  %v958_v61 = vld [vmem:[%s9765_s6 + $0x1358] sm:$0xff]  ;;  %v973_v3 = vld [vmem:[%s9765_s6 + $0x13d0] sm:$0xff] }
 0x1a6   : > { %5542 = vmatprep.subr.bf16.mxu0 %v8391_v10  ;;  %5706 = vmatprep.subr.bf16.mxu1 %v8393_v11  ;;  %v8505_v10 = vcombine.high %v854_v5, %v862_v6  ;;  %v869_v11 = vld [vmem:[%s9765_s6 + $0x1090] sm:$0xff]  ;;  %v966_v4 = vld [vmem:[%s9765_s6 + $0x1398] sm:$0xff] }
 0x1a7   : > { %v8518_v27 = vcombine.low %v869_v11, %v877_v12 }
 0x1a9   : > { %5543 = vmatpush1.bf16.msra.mxu0 %v8390_v18  ;;  %5707 = vmatpush1.bf16.msra.mxu1 %v8392_v19  ;;  %v8504_v18 = vcombine.low %v854_v5, %v862_v6  ;;  %v8519_v19 = vcombine.high %v869_v11, %v877_v12  ;;  %v974_v5 = vld [vmem:[%s9765_s6 + $0x13d8] sm:$0xff]  ;;  %v989_v11 = vld [vmem:[%s9765_s6 + $0x1450] sm:$0xff] }
 0x1aa   : > { %5544 = vmatprep.subr.bf16.mxu0 %v8407_v20  ;;  %5708 = vmatprep.subr.bf16.mxu1 %v8409_v21  ;;  %v8521_v20 = vcombine.high %v870_v14, %v878_v15  ;;  %v885_v21 = vld [vmem:[%s9765_s6 + $0x1110] sm:$0xff]  ;;  %v982_v12 = vld [vmem:[%s9765_s6 + $0x1418] sm:$0xff] }
 0x1ab   : > { %v8534_v36 = vcombine.low %v885_v21, %v893_v54 }
 0x1ad   : > { %5545 = vmatpush1.bf16.msra.mxu0 %v8406_v28  ;;  %5709 = vmatpush1.bf16.msra.mxu1 %v8408_v29  ;;  %v8520_v28 = vcombine.low %v870_v14, %v878_v15  ;;  %v8535_v29 = vcombine.high %v885_v21, %v893_v54  ;;  %v990_v14 = vld [vmem:[%s9765_s6 + $0x1458] sm:$0xff]  ;;  %v1005_v21 = vld [vmem:[%s9765_s6 + $0x14d0] sm:$0xff] }
 0x1ae   : > { %5546 = vmatprep.subr.bf16.mxu0 %v8423_v30  ;;  %5710 = vmatprep.subr.bf16.mxu1 %v8425_v31  ;;  %v8537_v30 = vcombine.high %v886_v23, %v894_v24  ;;  %v901_v31 = vld [vmem:[%s9765_s6 + $0x1190] sm:$0xff]  ;;  %v998_v54 = vld [vmem:[%s9765_s6 + $0x1498] sm:$0xff] }
 0x1af   : > { %v8550_v44 = vcombine.low %v901_v31, %v909_v32 }
 0x1b1   : > { %5547 = vmatpush1.bf16.msra.mxu0 %v8422_v37  ;;  %5711 = vmatpush1.bf16.msra.mxu1 %v8424_v38  ;;  %v8536_v37 = vcombine.low %v886_v23, %v894_v24  ;;  %v8551_v38 = vcombine.high %v901_v31, %v909_v32  ;;  %v1006_v23 = vld [vmem:[%s9765_s6 + $0x14d8] sm:$0xff]  ;;  %v1021_v31 = vld [vmem:[%s9765_s6 + $0x1550] sm:$0xff] }
 0x1b2   : > { %5548 = vmatprep.subr.bf16.mxu0 %v8439_v39  ;;  %5712 = vmatprep.subr.bf16.mxu1 %v8441_v40  ;;  %v8553_v39 = vcombine.high %v902_v33, %v910_v34  ;;  %v917_v40 = vld [vmem:[%s9765_s6 + $0x1210] sm:$0xff]  ;;  %v1014_v32 = vld [vmem:[%s9765_s6 + $0x1518] sm:$0xff] }
 0x1b3   : > { %v8566_v52 = vcombine.low %v917_v40, %v925_v41 }
 0x1b5   : > { %5549 = vmatpush1.bf16.msra.mxu0 %v8438_v45  ;;  %5713 = vmatpush1.bf16.msra.mxu1 %v8440_v46  ;;  %v8552_v45 = vcombine.low %v902_v33, %v910_v34  ;;  %v8567_v46 = vcombine.high %v917_v40, %v925_v41  ;;  %v1022_v33 = vld [vmem:[%s9765_s6 + $0x1558] sm:$0xff]  ;;  %v1037_v40 = vld [vmem:[%s9765_s6 + $0x15d0] sm:$0xff] }
 0x1b6   : > { %5550 = vmatprep.subr.bf16.mxu0 %v8455_v47  ;;  %5714 = vmatprep.subr.bf16.mxu1 %v8457_v48  ;;  %v8569_v47 = vcombine.high %v918_v42, %v926_v43  ;;  %v933_v48 = vld [vmem:[%s9765_s6 + $0x1290] sm:$0xff]  ;;  %v1030_v41 = vld [vmem:[%s9765_s6 + $0x1598] sm:$0xff] }
 0x1b7   : > { %v8582_v62 = vcombine.low %v933_v48, %v941_v49 }
 0x1b9   : > { %5551 = vmatpush1.bf16.msra.mxu0 %v8454_v53  ;;  %5715 = vmatpush1.bf16.msra.mxu1 %v8456_v55  ;;  %v8568_v53 = vcombine.low %v918_v42, %v926_v43  ;;  %v8583_v55 = vcombine.high %v933_v48, %v941_v49  ;;  %v1038_v42 = vld [vmem:[%s9765_s6 + $0x15d8] sm:$0xff]  ;;  %v1053_v48 = vld [vmem:[%s9765_s6 + $0x1650] sm:$0xff] }
 0x1ba   : > { %5552 = vmatprep.subr.bf16.mxu0 %v8471_v56  ;;  %5716 = vmatprep.subr.bf16.mxu1 %v8473_v57  ;;  %v8585_v56 = vcombine.high %v934_v50, %v942_v51  ;;  %v949_v57 = vld [vmem:[%s9765_s6 + $0x1310] sm:$0xff]  ;;  %v1046_v49 = vld [vmem:[%s9765_s6 + $0x1618] sm:$0xff] }
 0x1bb   : > { %v8598_v6 = vcombine.low %v949_v57, %v957_v59 }
 0x1bd   : > { %5553 = vmatpush1.bf16.msra.mxu0 %v8470_v63  ;;  %5717 = vmatpush1.bf16.msra.mxu1 %v8472_v0  ;;  %v8584_v63 = vcombine.low %v934_v50, %v942_v51  ;;  %v8599_v0 = vcombine.high %v949_v57, %v957_v59  ;;  %v1054_v50 = vld [vmem:[%s9765_s6 + $0x1658] sm:$0xff]  ;;  %v1069_v57 = vld [vmem:[%s9765_s6 + $0x16d0] sm:$0xff] }
 0x1be   : > { %5554 = vmatprep.subr.bf16.mxu0 %v8487_v1  ;;  %5718 = vmatprep.subr.bf16.mxu1 %v8489_v2  ;;  %v8601_v1 = vcombine.high %v950_v60, %v958_v61  ;;  %v965_v2 = vld [vmem:[%s9765_s6 + $0x1390] sm:$0xff]  ;;  %v1062_v59 = vld [vmem:[%s9765_s6 + $0x1698] sm:$0xff] }
 0x1bf   : > { %v8614_v15 = vcombine.low %v965_v2, %v973_v3 }
 0x1c1   : > { %5555 = vmatpush1.bf16.msra.mxu0 %v8486_v7  ;;  %5719 = vmatpush1.bf16.msra.mxu1 %v8488_v8  ;;  %v8600_v7 = vcombine.low %v950_v60, %v958_v61  ;;  %v8615_v8 = vcombine.high %v965_v2, %v973_v3  ;;  %v1070_v60 = vld [vmem:[%s9765_s6 + $0x16d8] sm:$0xff]  ;;  %v1085_v2 = vld [vmem:[%s9765_s6 + $0x1750] sm:$0xff] }
 0x1c2   : > { %5565 = vmatprep.subr.bf16.mxu0 %v8503_v9  ;;  %5729 = vmatprep.subr.bf16.mxu1 %v8505_v10  ;;  %v8617_v9 = vcombine.high %v966_v4, %v974_v5  ;;  %v981_v10 = vld [vmem:[%s9765_s6 + $0x1410] sm:$0xff]  ;;  %v1078_v3 = vld [vmem:[%s9765_s6 + $0x1718] sm:$0xff] }
 0x1c3   : > { %v8630_v24 = vcombine.low %v981_v10, %v989_v11 }
 0x1c4   : > { %5557 = vmatmul.mubr.bf16.vlgmr.msra.gmra.mrb[4].mxu0 %v9956_v26  ;;  %5721 = vmatmul.mubr.bf16.vlgmr.msra.gmra.mrb[4].mxu1 %v9956_v26 }
 0x1c5   : > { %5566 = vmatpush1.bf16.msra.mxu0 %v8502_v17  ;;  %5730 = vmatpush1.bf16.msra.mxu1 %v8504_v18  ;;  %v8616_v17 = vcombine.low %v966_v4, %v974_v5  ;;  %v8631_v18 = vcombine.high %v981_v10, %v989_v11  ;;  %v1086_v4 = vld [vmem:[%s9765_s6 + $0x1758] sm:$0xff]  ;;  %v1101_v10 = vld [vmem:[%s9765_s6 + $0x17d0] sm:$0xff] }
 0x1c6   : > { %5567 = vmatprep.subr.bf16.mxu0 %v8519_v19  ;;  %5731 = vmatprep.subr.bf16.mxu1 %v8521_v20  ;;  %v8633_v19 = vcombine.high %v982_v12, %v990_v14  ;;  %v997_v20 = vld [vmem:[%s9765_s6 + $0x1490] sm:$0xff]  ;;  %v1094_v11 = vld [vmem:[%s9765_s6 + $0x1798] sm:$0xff] }
 0x1c7   : > { %5597 = vmatprep.mubr.bf16.mxu0 %v9964_v16  ;;  %5761 = vmatprep.mubr.bf16.mxu1 %v9964_v16  ;;  %v8646_v34 = vcombine.low %v997_v20, %v1005_v21 }
 0x1c9   : > { %5568 = vmatpush1.bf16.msra.mxu0 %v8518_v27  ;;  %5732 = vmatpush1.bf16.msra.mxu1 %v8520_v28  ;;  %v8632_v27 = vcombine.low %v982_v12, %v990_v14  ;;  %v8647_v28 = vcombine.high %v997_v20, %v1005_v21  ;;  %v1102_v12 = vld [vmem:[%s9765_s6 + $0x17d8] sm:$0xff]  ;;  %v1117_v20 = vld [vmem:[%s9765_s6 + $0x1850] sm:$0xff] }
 0x1ca   : > { %5569 = vmatprep.subr.bf16.mxu0 %v8535_v29  ;;  %5733 = vmatprep.subr.bf16.mxu1 %v8537_v30  ;;  %v8649_v29 = vcombine.high %v998_v54, %v1006_v23  ;;  %v1013_v30 = vld [vmem:[%s9765_s6 + $0x1510] sm:$0xff]  ;;  %v1110_v21 = vld [vmem:[%s9765_s6 + $0x1818] sm:$0xff] }
 0x1cb   : > { %v8662_v43 = vcombine.low %v1013_v30, %v1021_v31 }
 0x1cd   : > { %5570 = vmatpush1.bf16.msra.mxu0 %v8534_v36  ;;  %5734 = vmatpush1.bf16.msra.mxu1 %v8536_v37  ;;  %v8648_v36 = vcombine.low %v998_v54, %v1006_v23  ;;  %v8663_v37 = vcombine.high %v1013_v30, %v1021_v31  ;;  %v1118_v54 = vld [vmem:[%s9765_s6 + $0x1858] sm:$0xff]  ;;  %v351_v30 = vld [vmem:[%s9765_s6 + $0x60] sm:$0xff] }
 0x1ce   : > { %5571 = vmatprep.subr.bf16.mxu0 %v8551_v38  ;;  %5735 = vmatprep.subr.bf16.mxu1 %v8553_v39  ;;  %v8665_v38 = vcombine.high %v1014_v32, %v1022_v33  ;;  %v1029_v39 = vld [vmem:[%s9765_s6 + $0x1590] sm:$0xff] }
 0x1cf   : > { %v8678_v51 = vcombine.low %v1029_v39, %v1037_v40 }
 0x1d1   : > { %5572 = vmatpush1.bf16.msra.mxu0 %v8550_v44  ;;  %5736 = vmatpush1.bf16.msra.mxu1 %v8552_v45  ;;  %v8664_v44 = vcombine.low %v1014_v32, %v1022_v33  ;;  %v8679_v45 = vcombine.high %v1029_v39, %v1037_v40  ;;  %v344_v32 = vld [vmem:[%s9765_s6 + $0x28] sm:$0xff]  ;;  %v367_v39 = vld [vmem:[%s9765_s6 + $0xe0] sm:$0xff] }
 0x1d2   : > { %5573 = vmatprep.subr.bf16.mxu0 %v8567_v46  ;;  %5737 = vmatprep.subr.bf16.mxu1 %v8569_v47  ;;  %v8681_v46 = vcombine.high %v1030_v41, %v1038_v42  ;;  %v1045_v47 = vld [vmem:[%s9765_s6 + $0x1610] sm:$0xff]  ;;  %v352_v33 = vld [vmem:[%s9765_s6 + $0x68] sm:$0xff] }
 0x1d3   : > { %v8694_v61 = vcombine.low %v1045_v47, %v1053_v48  ;;  %v360_v40 = vld [vmem:[%s9765_s6 + $0xa8] sm:$0xff] }
 0x1d5   : > { %5574 = vmatpush1.bf16.msra.mxu0 %v8566_v52  ;;  %5738 = vmatpush1.bf16.msra.mxu1 %v8568_v53  ;;  %v8680_v52 = vcombine.low %v1030_v41, %v1038_v42  ;;  %v8695_v53 = vcombine.high %v1045_v47, %v1053_v48  ;;  %v368_v41 = vld [vmem:[%s9765_s6 + $0xe8] sm:$0xff]  ;;  %v383_v47 = vld [vmem:[%s9765_s6 + $0x160] sm:$0xff]  ;;  %v9407_v48 = vld [vmem:[%s10920_s0 + $0x18] ss:$0 sps:$4 sm:$0xff]  }
 0x1d6   : > { %5575 = vmatprep.subr.bf16.mxu0 %v8583_v55  ;;  %5739 = vmatprep.subr.bf16.mxu1 %v8585_v56  ;;  %v8697_v55 = vcombine.high %v1046_v49, %v1054_v50  ;;  %v1061_v56 = vld [vmem:[%s9765_s6 + $0x1690] sm:$0xff] }
 0x1d7   : > { %v8710_v5 = vcombine.low %v1061_v56, %v1069_v57 }
 0x1d9   : > { %5576 = vmatpush1.bf16.msra.mxu0 %v8582_v62  ;;  %5740 = vmatpush1.bf16.msra.mxu1 %v8584_v63  ;;  %v8696_v62 = vcombine.low %v1046_v49, %v1054_v50  ;;  %v8711_v63 = vcombine.high %v1061_v56, %v1069_v57  ;;  %v376_v49 = vld [vmem:[%s9765_s6 + $0x128] sm:$0xff]  ;;  %v391_v56 = vld [vmem:[%s9765_s6 + $0x1a0] sm:$0xff] }
 0x1da   : > { %5577 = vmatprep.subr.bf16.mxu0 %v8599_v0  ;;  %5741 = vmatprep.subr.bf16.mxu1 %v8601_v1  ;;  %v8713_v0 = vcombine.high %v1062_v59, %v1070_v60  ;;  %v1077_v1 = vld [vmem:[%s9765_s6 + $0x1710] sm:$0xff]  ;;  %v384_v50 = vld [vmem:[%s9765_s6 + $0x168] sm:$0xff]  ;;  %v399_v57 = vld [vmem:[%s9765_s6 + $0x1e0] sm:$0xff] }
 0x1db   : > { %v8726_v14 = vcombine.low %v1077_v1, %v1085_v2 }
 0x1dd   : > { %5578 = vmatpush1.bf16.msra.mxu0 %v8598_v6  ;;  %5742 = vmatpush1.bf16.msra.mxu1 %v8600_v7  ;;  %v8712_v6 = vcombine.low %v1062_v59, %v1070_v60  ;;  %v8727_v7 = vcombine.high %v1077_v1, %v1085_v2  ;;  %v392_v59 = vld [vmem:[%s9765_s6 + $0x1a8] sm:$0xff]  ;;  %v407_v2 = vld [vmem:[%s9765_s6 + $0x220] sm:$0xff] }
 0x1de   : > { %5579 = vmatprep.subr.bf16.mxu0 %v8615_v8  ;;  %5743 = vmatprep.subr.bf16.mxu1 %v8617_v9  ;;  %v8729_v8 = vcombine.high %v1078_v3, %v1086_v4  ;;  %v1093_v9 = vld [vmem:[%s9765_s6 + $0x1790] sm:$0xff]  ;;  %v400_v60 = vld [vmem:[%s9765_s6 + $0x1e8] sm:$0xff] }
 0x1df   : > { %v8742_v23 = vcombine.low %v1093_v9, %v1101_v10  ;;  %v8045_v1 = vcombine.high %v392_v59, %v400_v60 }
 0x1e1   : > { %5580 = vmatpush1.bf16.msra.mxu0 %v8614_v15  ;;  %5744 = vmatpush1.bf16.msra.mxu1 %v8616_v17  ;;  %v8728_v15 = vcombine.low %v1078_v3, %v1086_v4  ;;  %v8743_v17 = vcombine.high %v1093_v9, %v1101_v10  ;;  %v415_v3 = vld [vmem:[%s9765_s6 + $0x260] sm:$0xff]  ;;  %v8042_v10 = vcombine.low %v391_v56, %v399_v57 }
 0x1e2   : > { %5581 = vmatprep.subr.bf16.mxu0 %v8631_v18  ;;  %5745 = vmatprep.subr.bf16.mxu1 %v8633_v19  ;;  %v8745_v18 = vcombine.high %v1094_v11, %v1102_v12  ;;  %v1109_v19 = vld [vmem:[%s9765_s6 + $0x1810] sm:$0xff] }
 0x1e3   : > { %v8758_v31 = vcombine.low %v1109_v19, %v1117_v20 }
 0x1e5   : > { %5582 = vmatpush1.bf16.msra.mxu0 %v8630_v24  ;;  %5746 = vmatpush1.bf16.msra.mxu1 %v8632_v27  ;;  %v8744_v24 = vcombine.low %v1094_v11, %v1102_v12  ;;  %v8759_v27 = vcombine.high %v1109_v19, %v1117_v20  ;;  %v423_v19 = vld [vmem:[%s9765_s6 + $0x2a0] sm:$0xff] }
 0x1e6   : > { %5583 = vmatprep.subr.bf16.mxu0 %v8647_v28  ;;  %5747 = vmatprep.subr.bf16.mxu1 %v8649_v29  ;;  %v8761_v28 = vcombine.high %v1110_v21, %v1118_v54  ;;  %v343_v29 = vld [vmem:[%s9765_s6 + $0x20] sm:$0xff] }
 0x1e7   : > { %v7994_v42 = vcombine.low %v343_v29, %v351_v30  ;;  %v431_v20 = vld [vmem:[%s9765_s6 + $0x2e0] sm:$0xff] }
 0x1e9   : > { %5584 = vmatpush1.bf16.msra.mxu0 %v8646_v34  ;;  %5748 = vmatpush1.bf16.msra.mxu1 %v8648_v36  ;;  %v8760_v34 = vcombine.low %v1110_v21, %v1118_v54  ;;  %v7995_v36 = vcombine.high %v343_v29, %v351_v30  ;;  %v424_v21 = vld [vmem:[%s9765_s6 + $0x2a8] sm:$0xff]  ;;  %v439_v29 = vld [vmem:[%s9765_s6 + $0x320] sm:$0xff] }
 0x1ea   : > { %5585 = vmatprep.subr.bf16.mxu0 %v8663_v37  ;;  %5749 = vmatprep.subr.bf16.mxu1 %v8665_v38  ;;  %v7997_v37 = vcombine.high %v344_v32, %v352_v33  ;;  %v359_v38 = vld [vmem:[%s9765_s6 + $0xa0] sm:$0xff]  ;;  %v432_v54 = vld [vmem:[%s9765_s6 + $0x2e8] sm:$0xff] }
 0x1eb   : > { %v447_v30 = vld [vmem:[%s9765_s6 + $0x360] sm:$0xff] }
 0x1ed   : > { %5586 = vmatpush1.bf16.msra.mxu0 %v8662_v43  ;;  %5750 = vmatpush1.bf16.msra.mxu1 %v8664_v44  ;;  %v7996_v43 = vcombine.low %v344_v32, %v352_v33  ;;  %v8011_v44 = vcombine.high %v359_v38, %v367_v39  ;;  %v448_v32 = vld [vmem:[%s9765_s6 + $0x368] sm:$0xff]  ;;  %v8074_v33 = vcombine.low %v423_v19, %v431_v20 }
 0x1ee   : > { %5587 = vmatprep.subr.bf16.mxu0 %v8679_v45  ;;  %5751 = vmatprep.subr.bf16.mxu1 %v8681_v46  ;;  %v8013_v45 = vcombine.high %v360_v40, %v368_v41  ;;  %v375_v46 = vld [vmem:[%s9765_s6 + $0x120] sm:$0xff] }
 0x1f1   : > { %5588 = vmatpush1.bf16.msra.mxu0 %v8678_v51  ;;  %5752 = vmatpush1.bf16.msra.mxu1 %v8680_v52  ;;  %v8010_v51 = vcombine.low %v359_v38, %v367_v39  ;;  %v8012_v52 = vcombine.low %v360_v40, %v368_v41  ;;  %v455_v38 = vld [vmem:[%s9765_s6 + $0x3a0] sm:$0xff]  ;;  %v456_v40 = vld [vmem:[%s9765_s6 + $0x3a8] sm:$0xff] }
 0x1f2   : > { %5589 = vmatprep.subr.bf16.mxu0 %v8695_v53  ;;  %5753 = vmatprep.subr.bf16.mxu1 %v8697_v55  ;;  %v8027_v53 = vcombine.high %v375_v46, %v383_v47  ;;  %v8029_v55 = vcombine.high %v376_v49, %v384_v50  ;;  %v463_v39 = vld [vmem:[%s9765_s6 + $0x3e0] sm:$0xff]  ;;  %v464_v41 = vld [vmem:[%s9765_s6 + $0x3e8] sm:$0xff] }
 0x1f5   : > { %5590 = vmatpush1.bf16.msra.mxu0 %v8694_v61  ;;  %5754 = vmatpush1.bf16.msra.mxu1 %v8696_v62  ;;  %v8026_v61 = vcombine.low %v375_v46, %v383_v47  ;;  %v8028_v62 = vcombine.low %v376_v49, %v384_v50  ;;  %v471_v46 = vld [vmem:[%s9765_s6 + $0x420] sm:$0xff]  ;;  %v480_v49 = vld [vmem:[%s9765_s6 + $0x468] sm:$0xff]  ;;  %v8106_v50 = vcombine.low %v455_v38, %v463_v39 }
 0x1f6   : > { %5591 = vmatprep.subr.bf16.mxu0 %v8711_v63  ;;  %5755 = vmatprep.subr.bf16.mxu1 %v8713_v0  ;;  %v8043_v63 = vcombine.high %v391_v56, %v399_v57  ;;  %v479_v47 = vld [vmem:[%s9765_s6 + $0x460] sm:$0xff]  ;;  %v488_v57 = vld [vmem:[%s9765_s6 + $0x4a8] sm:$0xff] }
 0x1f7   : > { %v495_v56 = vld [vmem:[%s9765_s6 + $0x4e0] sm:$0xff] }
 0x1f9   : > { %5592 = vmatpush1.bf16.msra.mxu0 %v8710_v5  ;;  %5756 = vmatpush1.bf16.msra.mxu1 %v8712_v6  ;;  %v408_v6 = vld [vmem:[%s9765_s6 + $0x228] sm:$0xff] }
 0x1fa   : > { %5593 = vmatprep.subr.bf16.mxu0 %v8727_v7  ;;  %5757 = vmatprep.subr.bf16.mxu1 %v8729_v8  ;;  %v416_v7 = vld [vmem:[%s9765_s6 + $0x268] sm:$0xff] }
 0x1fd   : > { %5594 = vmatpush1.bf16.msra.mxu0 %v8726_v14  ;;  %5758 = vmatpush1.bf16.msra.mxu1 %v8728_v15  ;;  %v8044_v14 = vcombine.low %v392_v59, %v400_v60  ;;  %v8059_v15 = vcombine.high %v407_v2, %v415_v3  ;;  %v496_v59 = vld [vmem:[%s9765_s6 + $0x4e8] sm:$0xff]  ;;  %v8122_v60 = vcombine.low %v471_v46, %v479_v47 }
 0x1fe   : > { %5595 = vmatprep.subr.bf16.mxu0 %v8743_v17  ;;  %5759 = vmatprep.subr.bf16.mxu1 %v8745_v18  ;;  %v8061_v18 = vcombine.high %v408_v6, %v416_v7 }
 0x201   : > { %5596 = vmatpush1.bf16.msra.mxu0 %v8742_v23  ;;  %5760 = vmatpush1.bf16.msra.mxu1 %v8744_v24  ;;  %v8058_v23 = vcombine.low %v407_v2, %v415_v3  ;;  %v8060_v24 = vcombine.low %v408_v6, %v416_v7  ;;  %v511_v2 = vld [vmem:[%s9765_s6 + $0x560] sm:$0xff]  ;;  %v504_v3 = vld [vmem:[%s9765_s6 + $0x528] sm:$0xff] }
 0x202   : > { %5606 = vmatprep.subr.bf16.mxu0 %v8759_v27  ;;  %5770 = vmatprep.subr.bf16.mxu1 %v8761_v28  ;;  %v8075_v27 = vcombine.high %v423_v19, %v431_v20  ;;  %v8077_v28 = vcombine.high %v424_v21, %v432_v54  ;;  %v512_v6 = vld [vmem:[%s9765_s6 + $0x568] sm:$0xff] }
 0x203   : > { %v8156_v19 = vcombine.low %v504_v3, %v512_v6 }
 0x204   : > { %5598 = vmatmul.mubr.bf16.vlgmr.msra.gmra.mrb[4].mxu0 %v10028_v35  ;;  %5762 = vmatmul.mubr.bf16.vlgmr.msra.gmra.mrb[4].mxu1 %v10028_v35 }
 0x205   : > { %5607 = vmatpush1.bf16.msra.mxu0 %v8758_v31  ;;  %5771 = vmatpush1.bf16.msra.mxu1 %v8760_v34  ;;  %v440_v31 = vld [vmem:[%s9765_s6 + $0x328] sm:$0xff]  ;;  %v8076_v34 = vcombine.low %v424_v21, %v432_v54  ;;  %v535_v54 = vld [vmem:[%s9765_s6 + $0x620] sm:$0xff] }
 0x206   : > { %5638 = vmatprep.mubr.bf16.mxu0 %v9563_v25  ;;  %5802 = vmatprep.mubr.bf16.mxu1 %v9563_v25 }
 0x207   : > { %5811 = vmatprep.subr.bf16.mxu0 %v7995_v36  ;;  %5975 = vmatprep.subr.bf16.mxu1 %v7997_v37  ;;  %v8091_v36 = vcombine.high %v439_v29, %v447_v30  ;;  %v8093_v37 = vcombine.high %v440_v31, %v448_v32 }
 0x210   : > { %8772 = vmatmul.mubr.msk.bf16.vlgmr.msra.gmra.mrb[4].mxu0 %vm5151_vm0, %v9407_v48  ;;  %8773 = vmatmul.mubr.msk.bf16.vlgmr.msra.gmra.mrb[4].mxu1 %vm5151_vm0, %v9407_v48  ;;  %v472_v48 = vld [vmem:[%s9765_s6 + $0x428] sm:$0xff] }
 0x211   : > { %5812 = vmatpush1.bf16.msra.mxu0 %v7994_v42  ;;  %5976 = vmatpush1.bf16.msra.mxu1 %v7996_v43  ;;  %v8090_v42 = vcombine.low %v439_v29, %v447_v30  ;;  %v8092_v43 = vcombine.low %v440_v31, %v448_v32  ;;  %v551_v32 = vld [vmem:[%s9765_s6 + $0x6a0] sm:$0xff] }
 0x212   : > { %5813 = vmatprep.subr.bf16.mxu0 %v8011_v44  ;;  %5977 = vmatprep.subr.bf16.mxu1 %v8013_v45  ;;  %v8107_v44 = vcombine.high %v455_v38, %v463_v39  ;;  %v8109_v45 = vcombine.high %v456_v40, %v464_v41 }
 0x213   : > { %5843 = vmatprep.mubr.bf16.mxu0 %v9822_v58  ;;  %6007 = vmatprep.mubr.bf16.mxu1 %v9822_v58 }
 0x215   : > { %5814 = vmatpush1.bf16.msra.mxu0 %v8010_v51  ;;  %5978 = vmatpush1.bf16.msra.mxu1 %v8012_v52  ;;  %v8108_v51 = vcombine.low %v456_v40, %v464_v41  ;;  %v8123_v52 = vcombine.high %v471_v46, %v479_v47  ;;  %v567_v41 = vld [vmem:[%s9765_s6 + $0x720] sm:$0xff] }
 0x216   : > { %5815 = vmatprep.subr.bf16.mxu0 %v8027_v53  ;;  %5979 = vmatprep.subr.bf16.mxu1 %v8029_v55  ;;  %v8125_v53 = vcombine.high %v472_v48, %v480_v49  ;;  %v487_v55 = vld [vmem:[%s9765_s6 + $0x4a0] sm:$0xff] }
 0x217   : > { %v10272_v0 = vpop.f32.mrb[0].mxu0  ;;  %v10276_v4 = vpop.f32.mrb[0].mxu1  ;;  %v8138_v7 = vcombine.low %v487_v55, %v495_v56 }
 0x218   : > { %v10278_v5 = vpop.f32.mrb[1].mxu0  ;;  %v10282_v8 = vpop.f32.mrb[1].mxu1 }
 0x219   : > { %5816 = vmatpush1.bf16.msra.mxu0 %v8026_v61  ;;  %v5316_v9 = vpop.f32.mrb[2].mxu0  ;;  %5980 = vmatpush1.bf16.msra.mxu1 %v8028_v62  ;;  %v5480_v11 = vpop.f32.mrb[2].mxu1  ;;  %v8124_v61 = vcombine.low %v472_v48, %v480_v49  ;;  %v8139_v62 = vcombine.high %v487_v55, %v495_v56  ;;  %v583_v49 = vld [vmem:[%s9765_s6 + $0x7a0] sm:$0xff] }
 0x21a   : > { %v5317_v12 = vpop.f32.mrb[3].mxu0  ;;  %5817 = vmatprep.subr.bf16.mxu0 %v8043_v63  ;;  %v5481_v17 = vpop.f32.mrb[3].mxu1  ;;  %5981 = vmatprep.subr.bf16.mxu1 %v8045_v1  ;;  %v8141_v63 = vcombine.high %v488_v57, %v496_v59  ;;  %v503_v1 = vld [vmem:[%s9765_s6 + $0x520] sm:$0xff]  ;;  %v8140_v9 = vcombine.low %v488_v57, %v496_v59  ;;  %v8157_v11 = vcombine.high %v504_v3, %v512_v6 }
 0x21b   : > { %v519_v12 = vld [vmem:[%s9765_s6 + $0x5a0] sm:$0xff]  ;;  %v528_v17 = vld [vmem:[%s9765_s6 + $0x5e8] sm:$0xff] }
 0x21c   : > { %v599_v59 = vld [vmem:[%s9765_s6 + $0x820] sm:$0xff] }
 0x21d   : > { %5818 = vmatpush1.bf16.msra.mxu0 %v8042_v10  ;;  %5982 = vmatpush1.bf16.msra.mxu1 %v8044_v14  ;;  %v8155_v10 = vcombine.high %v503_v1, %v511_v2  ;;  %v527_v14 = vld [vmem:[%s9765_s6 + $0x5e0] sm:$0xff] }
 0x21e   : > { %5819 = vmatprep.subr.bf16.mxu0 %v8059_v15  ;;  %5983 = vmatprep.subr.bf16.mxu1 %v8061_v18  ;;  %v520_v15 = vld [vmem:[%s9765_s6 + $0x5a8] sm:$0xff]  ;;  %v8154_v18 = vcombine.low %v503_v1, %v511_v2  ;;  %v8171_v20 = vcombine.high %v519_v12, %v527_v14  ;;  %v615_v6 = vld [vmem:[%s9765_s6 + $0x8a0] sm:$0xff] }
 0x21f   : > { %v8173_v21 = vcombine.high %v520_v15, %v528_v17  ;;  %v8172_v29 = vcombine.low %v520_v15, %v528_v17  ;;  %v631_v17 = vld [vmem:[%s9765_s6 + $0x920] sm:$0xff] }
 0x221   : > { %5820 = vmatpush1.bf16.msra.mxu0 %v8058_v23  ;;  %5984 = vmatpush1.bf16.msra.mxu1 %v8060_v24  ;;  %v543_v23 = vld [vmem:[%s9765_s6 + $0x660] sm:$0xff]  ;;  %v536_v24 = vld [vmem:[%s9765_s6 + $0x628] sm:$0xff] }
 0x222   : > { %5821 = vmatprep.subr.bf16.mxu0 %v8075_v27  ;;  %5985 = vmatprep.subr.bf16.mxu1 %v8077_v28  ;;  %v544_v27 = vld [vmem:[%s9765_s6 + $0x668] sm:$0xff]  ;;  %v8170_v28 = vcombine.low %v519_v12, %v527_v14  ;;  %v8187_v30 = vcombine.high %v535_v54, %v543_v23 }
 0x223   : > { %v8189_v31 = vcombine.high %v536_v24, %v544_v27  ;;  %v8188_v38 = vcombine.low %v536_v24, %v544_v27  ;;  %v647_v27 = vld [vmem:[%s9765_s6 + $0x9a0] sm:$0xff] }
 0x225   : > { %5822 = vmatpush1.bf16.msra.mxu0 %v8074_v33  ;;  %5986 = vmatpush1.bf16.msra.mxu1 %v8076_v34  ;;  %v559_v33 = vld [vmem:[%s9765_s6 + $0x6e0] sm:$0xff]  ;;  %v552_v34 = vld [vmem:[%s9765_s6 + $0x6a8] sm:$0xff] }
 0x226   : > { %5823 = vmatprep.subr.bf16.mxu0 %v8091_v36  ;;  %5987 = vmatprep.subr.bf16.mxu1 %v8093_v37  ;;  %v560_v36 = vld [vmem:[%s9765_s6 + $0x6e8] sm:$0xff]  ;;  %v8186_v37 = vcombine.low %v535_v54, %v543_v23  ;;  %v8203_v39 = vcombine.high %v551_v32, %v559_v33 }
 0x227   : > { %v8205_v40 = vcombine.high %v552_v34, %v560_v36  ;;  %v8204_v46 = vcombine.low %v552_v34, %v560_v36  ;;  %v663_v36 = vld [vmem:[%s9765_s6 + $0xa20] sm:$0xff] }
 0x229   : > { %5824 = vmatpush1.bf16.msra.mxu0 %v8090_v42  ;;  %5988 = vmatpush1.bf16.msra.mxu1 %v8092_v43  ;;  %v575_v42 = vld [vmem:[%s9765_s6 + $0x760] sm:$0xff]  ;;  %v568_v43 = vld [vmem:[%s9765_s6 + $0x728] sm:$0xff] }
 0x22a   : > { %5825 = vmatprep.subr.bf16.mxu0 %v8107_v44  ;;  %5989 = vmatprep.subr.bf16.mxu1 %v8109_v45  ;;  %v576_v44 = vld [vmem:[%s9765_s6 + $0x768] sm:$0xff]  ;;  %v8202_v45 = vcombine.low %v551_v32, %v559_v33  ;;  %v8219_v47 = vcombine.high %v567_v41, %v575_v42 }
 0x22b   : > { %v8221_v48 = vcombine.high %v568_v43, %v576_v44  ;;  %v8220_v55 = vcombine.low %v568_v43, %v576_v44  ;;  %v679_v44 = vld [vmem:[%s9765_s6 + $0xaa0] sm:$0xff] }
 0x22d   : > { %5826 = vmatpush1.bf16.msra.mxu0 %v8106_v50  ;;  %5990 = vmatpush1.bf16.msra.mxu1 %v8108_v51  ;;  %v591_v50 = vld [vmem:[%s9765_s6 + $0x7e0] sm:$0xff]  ;;  %v584_v51 = vld [vmem:[%s9765_s6 + $0x7a8] sm:$0xff] }
 0x22e   : > { %5827 = vmatprep.subr.bf16.mxu0 %v8123_v52  ;;  %5991 = vmatprep.subr.bf16.mxu1 %v8125_v53  ;;  %v592_v52 = vld [vmem:[%s9765_s6 + $0x7e8] sm:$0xff]  ;;  %v8218_v53 = vcombine.low %v567_v41, %v575_v42  ;;  %v8235_v56 = vcombine.high %v583_v49, %v591_v50 }
 0x22f   : > { %v8237_v57 = vcombine.high %v584_v51, %v592_v52  ;;  %v8236_v1 = vcombine.low %v584_v51, %v592_v52  ;;  %v695_v52 = vld [vmem:[%s9765_s6 + $0xb20] sm:$0xff] }
 0x231   : > { %5828 = vmatpush1.bf16.msra.mxu0 %v8122_v60  ;;  %5992 = vmatpush1.bf16.msra.mxu1 %v8124_v61  ;;  %v607_v60 = vld [vmem:[%s9765_s6 + $0x860] sm:$0xff]  ;;  %v600_v61 = vld [vmem:[%s9765_s6 + $0x828] sm:$0xff] }
 0x232   : > { %5829 = vmatprep.subr.bf16.mxu0 %v8139_v62  ;;  %5993 = vmatprep.subr.bf16.mxu1 %v8141_v63  ;;  %v608_v62 = vld [vmem:[%s9765_s6 + $0x868] sm:$0xff]  ;;  %v8234_v63 = vcombine.low %v583_v49, %v591_v50  ;;  %v8251_v2 = vcombine.high %v599_v59, %v607_v60 }
 0x233   : > { %v8253_v3 = vcombine.high %v600_v61, %v608_v62  ;;  %v8252_v12 = vcombine.low %v600_v61, %v608_v62  ;;  %v711_v62 = vld [vmem:[%s9765_s6 + $0xba0] sm:$0xff] }
 0x235   : > { %5830 = vmatpush1.bf16.msra.mxu0 %v8138_v7  ;;  %5994 = vmatpush1.bf16.msra.mxu1 %v8140_v9  ;;  %v623_v7 = vld [vmem:[%s9765_s6 + $0x8e0] sm:$0xff]  ;;  %v616_v9 = vld [vmem:[%s9765_s6 + $0x8a8] sm:$0xff] }
 0x236   : > { %5831 = vmatprep.subr.bf16.mxu0 %v8155_v10  ;;  %5995 = vmatprep.subr.bf16.mxu1 %v8157_v11  ;;  %v624_v10 = vld [vmem:[%s9765_s6 + $0x8e8] sm:$0xff]  ;;  %v8250_v11 = vcombine.low %v599_v59, %v607_v60  ;;  %v8267_v14 = vcombine.high %v615_v6, %v623_v7 }
 0x237   : > { %v8269_v15 = vcombine.high %v616_v9, %v624_v10  ;;  %v8268_v54 = vcombine.low %v616_v9, %v624_v10  ;;  %v727_v10 = vld [vmem:[%s9765_s6 + $0xc20] sm:$0xff] }
 0x239   : > { %5832 = vmatpush1.bf16.msra.mxu0 %v8154_v18  ;;  %5996 = vmatpush1.bf16.msra.mxu1 %v8156_v19  ;;  %v639_v18 = vld [vmem:[%s9765_s6 + $0x960] sm:$0xff]  ;;  %v632_v19 = vld [vmem:[%s9765_s6 + $0x928] sm:$0xff] }
 0x23a   : > { %5833 = vmatprep.subr.bf16.mxu0 %v8171_v20  ;;  %5997 = vmatprep.subr.bf16.mxu1 %v8173_v21  ;;  %v640_v20 = vld [vmem:[%s9765_s6 + $0x968] sm:$0xff]  ;;  %v8266_v21 = vcombine.low %v615_v6, %v623_v7  ;;  %v8283_v23 = vcombine.high %v631_v17, %v639_v18 }
 0x23b   : > { %v8285_v24 = vcombine.high %v632_v19, %v640_v20  ;;  %v8284_v32 = vcombine.low %v632_v19, %v640_v20  ;;  %v743_v20 = vld [vmem:[%s9765_s6 + $0xca0] sm:$0xff] }
 0x23d   : > { %5834 = vmatpush1.bf16.msra.mxu0 %v8170_v28  ;;  %5998 = vmatpush1.bf16.msra.mxu1 %v8172_v29  ;;  %v655_v28 = vld [vmem:[%s9765_s6 + $0x9e0] sm:$0xff]  ;;  %v648_v29 = vld [vmem:[%s9765_s6 + $0x9a8] sm:$0xff] }
 0x23e   : > { %5835 = vmatprep.subr.bf16.mxu0 %v8187_v30  ;;  %5999 = vmatprep.subr.bf16.mxu1 %v8189_v31  ;;  %v656_v30 = vld [vmem:[%s9765_s6 + $0x9e8] sm:$0xff]  ;;  %v8282_v31 = vcombine.low %v631_v17, %v639_v18  ;;  %v8299_v33 = vcombine.high %v647_v27, %v655_v28 }
 0x23f   : > { %v8301_v34 = vcombine.high %v648_v29, %v656_v30  ;;  %v8300_v41 = vcombine.low %v648_v29, %v656_v30  ;;  %v759_v30 = vld [vmem:[%s9765_s6 + $0xd20] sm:$0xff] }
 0x241   : > { %5836 = vmatpush1.bf16.msra.mxu0 %v8186_v37  ;;  %6000 = vmatpush1.bf16.msra.mxu1 %v8188_v38  ;;  %v671_v37 = vld [vmem:[%s9765_s6 + $0xa60] sm:$0xff]  ;;  %v664_v38 = vld [vmem:[%s9765_s6 + $0xa28] sm:$0xff] }
 0x242   : > { %5837 = vmatprep.subr.bf16.mxu0 %v8203_v39  ;;  %6001 = vmatprep.subr.bf16.mxu1 %v8205_v40  ;;  %v672_v39 = vld [vmem:[%s9765_s6 + $0xa68] sm:$0xff]  ;;  %v8298_v40 = vcombine.low %v647_v27, %v655_v28  ;;  %v8315_v42 = vcombine.high %v663_v36, %v671_v37 }
 0x243   : > { %v8317_v43 = vcombine.high %v664_v38, %v672_v39  ;;  %v8316_v49 = vcombine.low %v664_v38, %v672_v39  ;;  %v775_v39 = vld [vmem:[%s9765_s6 + $0xda0] sm:$0xff] }
 0x245   : > { %5838 = vmatpush1.bf16.msra.mxu0 %v8202_v45  ;;  %6002 = vmatpush1.bf16.msra.mxu1 %v8204_v46  ;;  %v687_v45 = vld [vmem:[%s9765_s6 + $0xae0] sm:$0xff]  ;;  %v680_v46 = vld [vmem:[%s9765_s6 + $0xaa8] sm:$0xff] }
 0x246   : > { %5839 = vmatprep.subr.bf16.mxu0 %v8219_v47  ;;  %6003 = vmatprep.subr.bf16.mxu1 %v8221_v48  ;;  %v688_v47 = vld [vmem:[%s9765_s6 + $0xae8] sm:$0xff]  ;;  %v8314_v48 = vcombine.low %v663_v36, %v671_v37  ;;  %v8331_v50 = vcombine.high %v679_v44, %v687_v45 }
 0x247   : > { %v8333_v51 = vcombine.high %v680_v46, %v688_v47  ;;  %v8332_v59 = vcombine.low %v680_v46, %v688_v47  ;;  %v791_v47 = vld [vmem:[%s9765_s6 + $0xe20] sm:$0xff] }
 0x249   : > { %5840 = vmatpush1.bf16.msra.mxu0 %v8218_v53  ;;  %6004 = vmatpush1.bf16.msra.mxu1 %v8220_v55  ;;  %v703_v53 = vld [vmem:[%s9765_s6 + $0xb60] sm:$0xff]  ;;  %v696_v55 = vld [vmem:[%s9765_s6 + $0xb28] sm:$0xff] }
 0x24a   : > { %5841 = vmatprep.subr.bf16.mxu0 %v8235_v56  ;;  %6005 = vmatprep.subr.bf16.mxu1 %v8237_v57  ;;  %v704_v56 = vld [vmem:[%s9765_s6 + $0xb68] sm:$0xff]  ;;  %v8330_v57 = vcombine.low %v679_v44, %v687_v45  ;;  %v8347_v60 = vcombine.high %v695_v52, %v703_v53 }
 0x24b   : > { %v8349_v61 = vcombine.high %v696_v55, %v704_v56  ;;  %v8348_v6 = vcombine.low %v696_v55, %v704_v56  ;;  %v807_v56 = vld [vmem:[%s9765_s6 + $0xea0] sm:$0xff] }
 0x24d   : > { %5842 = vmatpush1.bf16.msra.mxu0 %v8234_v63  ;;  %6006 = vmatpush1.bf16.msra.mxu1 %v8236_v1  ;;  %v719_v63 = vld [vmem:[%s9765_s6 + $0xbe0] sm:$0xff]  ;;  %v712_v1 = vld [vmem:[%s9765_s6 + $0xba8] sm:$0xff] }
 0x24e   : > { %5852 = vmatprep.subr.bf16.mxu0 %v8251_v2  ;;  %6016 = vmatprep.subr.bf16.mxu1 %v8253_v3  ;;  %v720_v2 = vld [vmem:[%s9765_s6 + $0xbe8] sm:$0xff]  ;;  %v8346_v3 = vcombine.low %v695_v52, %v703_v53  ;;  %v8363_v7 = vcombine.high %v711_v62, %v719_v63 }
 0x24f   : > { %v8365_v9 = vcombine.high %v712_v1, %v720_v2  ;;  %v8364_v17 = vcombine.low %v712_v1, %v720_v2  ;;  %v823_v2 = vld [vmem:[%s9765_s6 + $0xf20] sm:$0xff] }
 0x250   : > { %5844 = vmatmul.mubr.bf16.vlgmr.msra.gmra.mrb[8].mxu0 %v9868_v13  ;;  %6008 = vmatmul.mubr.bf16.vlgmr.msra.gmra.mrb[8].mxu1 %v9868_v13 }
 0x251   : > { %5853 = vmatpush1.bf16.msra.mxu0 %v8250_v11  ;;  %6017 = vmatpush1.bf16.msra.mxu1 %v8252_v12  ;;  %v735_v11 = vld [vmem:[%s9765_s6 + $0xc60] sm:$0xff]  ;;  %v728_v12 = vld [vmem:[%s9765_s6 + $0xc28] sm:$0xff] }
 0x252   : > { %5854 = vmatprep.subr.bf16.mxu0 %v8267_v14  ;;  %6018 = vmatprep.subr.bf16.mxu1 %v8269_v15  ;;  %v736_v14 = vld [vmem:[%s9765_s6 + $0xc68] sm:$0xff]  ;;  %v8362_v15 = vcombine.low %v711_v62, %v719_v63  ;;  %v8379_v18 = vcombine.high %v727_v10, %v735_v11 }
 0x253   : > { %5884 = vmatprep.mubr.bf16.mxu0 %v9881_v22  ;;  %6048 = vmatprep.mubr.bf16.mxu1 %v9881_v22  ;;  %v8381_v19 = vcombine.high %v728_v12, %v736_v14  ;;  %v8380_v27 = vcombine.low %v728_v12, %v736_v14  ;;  %v839_v14 = vld [vmem:[%s9765_s6 + $0xfa0] sm:$0xff] }
 0x255   : > { %5855 = vmatpush1.bf16.msra.mxu0 %v8266_v21  ;;  %6019 = vmatpush1.bf16.msra.mxu1 %v8268_v54  ;;  %v751_v21 = vld [vmem:[%s9765_s6 + $0xce0] sm:$0xff]  ;;  %v744_v54 = vld [vmem:[%s9765_s6 + $0xca8] sm:$0xff] }
 0x256   : > { %5856 = vmatprep.subr.bf16.mxu0 %v8283_v23  ;;  %6020 = vmatprep.subr.bf16.mxu1 %v8285_v24  ;;  %v752_v23 = vld [vmem:[%s9765_s6 + $0xce8] sm:$0xff]  ;;  %v8378_v24 = vcombine.low %v727_v10, %v735_v11  ;;  %v8395_v28 = vcombine.high %v743_v20, %v751_v21 }
 0x257   : > { %v8397_v29 = vcombine.high %v744_v54, %v752_v23  ;;  %v8396_v36 = vcombine.low %v744_v54, %v752_v23  ;;  %v855_v23 = vld [vmem:[%s9765_s6 + $0x1020] sm:$0xff] }
 0x259   : > { %5857 = vmatpush1.bf16.msra.mxu0 %v8282_v31  ;;  %6021 = vmatpush1.bf16.msra.mxu1 %v8284_v32  ;;  %v767_v31 = vld [vmem:[%s9765_s6 + $0xd60] sm:$0xff]  ;;  %v760_v32 = vld [vmem:[%s9765_s6 + $0xd28] sm:$0xff] }
 0x25a   : > { %5858 = vmatprep.subr.bf16.mxu0 %v8299_v33  ;;  %6022 = vmatprep.subr.bf16.mxu1 %v8301_v34  ;;  %v768_v33 = vld [vmem:[%s9765_s6 + $0xd68] sm:$0xff]  ;;  %v8394_v34 = vcombine.low %v743_v20, %v751_v21  ;;  %v8411_v37 = vcombine.high %v759_v30, %v767_v31 }
 0x25b   : > { %v8413_v38 = vcombine.high %v760_v32, %v768_v33  ;;  %v8412_v44 = vcombine.low %v760_v32, %v768_v33  ;;  %v871_v33 = vld [vmem:[%s9765_s6 + $0x10a0] sm:$0xff] }
 0x25d   : > { %5859 = vmatpush1.bf16.msra.mxu0 %v8298_v40  ;;  %6023 = vmatpush1.bf16.msra.mxu1 %v8300_v41  ;;  %v783_v40 = vld [vmem:[%s9765_s6 + $0xde0] sm:$0xff]  ;;  %v776_v41 = vld [vmem:[%s9765_s6 + $0xda8] sm:$0xff] }
 0x25e   : > { %5860 = vmatprep.subr.bf16.mxu0 %v8315_v42  ;;  %6024 = vmatprep.subr.bf16.mxu1 %v8317_v43  ;;  %v784_v42 = vld [vmem:[%s9765_s6 + $0xde8] sm:$0xff]  ;;  %v8410_v43 = vcombine.low %v759_v30, %v767_v31  ;;  %v8427_v45 = vcombine.high %v775_v39, %v783_v40 }
 0x25f   : > { %v8429_v46 = vcombine.high %v776_v41, %v784_v42  ;;  %v8428_v52 = vcombine.low %v776_v41, %v784_v42  ;;  %v887_v42 = vld [vmem:[%s9765_s6 + $0x1120] sm:$0xff] }
 0x261   : > { %5861 = vmatpush1.bf16.msra.mxu0 %v8314_v48  ;;  %6025 = vmatpush1.bf16.msra.mxu1 %v8316_v49  ;;  %v799_v48 = vld [vmem:[%s9765_s6 + $0xe60] sm:$0xff]  ;;  %v792_v49 = vld [vmem:[%s9765_s6 + $0xe28] sm:$0xff] }
 0x262   : > { %5862 = vmatprep.subr.bf16.mxu0 %v8331_v50  ;;  %6026 = vmatprep.subr.bf16.mxu1 %v8333_v51  ;;  %v800_v50 = vld [vmem:[%s9765_s6 + $0xe68] sm:$0xff]  ;;  %v8426_v51 = vcombine.low %v775_v39, %v783_v40  ;;  %v8443_v53 = vcombine.high %v791_v47, %v799_v48 }
 0x263   : > { %v8445_v55 = vcombine.high %v792_v49, %v800_v50  ;;  %v8444_v62 = vcombine.low %v792_v49, %v800_v50  ;;  %v903_v50 = vld [vmem:[%s9765_s6 + $0x11a0] sm:$0xff] }
 0x265   : > { %5863 = vmatpush1.bf16.msra.mxu0 %v8330_v57  ;;  %6027 = vmatpush1.bf16.msra.mxu1 %v8332_v59  ;;  %v815_v57 = vld [vmem:[%s9765_s6 + $0xee0] sm:$0xff]  ;;  %v808_v59 = vld [vmem:[%s9765_s6 + $0xea8] sm:$0xff] }
 0x266   : > { %5864 = vmatprep.subr.bf16.mxu0 %v8347_v60  ;;  %6028 = vmatprep.subr.bf16.mxu1 %v8349_v61  ;;  %v816_v60 = vld [vmem:[%s9765_s6 + $0xee8] sm:$0xff]  ;;  %v8442_v61 = vcombine.low %v791_v47, %v799_v48  ;;  %v8459_v63 = vcombine.high %v807_v56, %v815_v57 }
 0x267   : > { %v8461_v1 = vcombine.high %v808_v59, %v816_v60  ;;  %v8460_v10 = vcombine.low %v808_v59, %v816_v60  ;;  %v919_v60 = vld [vmem:[%s9765_s6 + $0x1220] sm:$0xff] }
 0x269   : > { %5865 = vmatpush1.bf16.msra.mxu0 %v8346_v3  ;;  %6029 = vmatpush1.bf16.msra.mxu1 %v8348_v6  ;;  %v831_v3 = vld [vmem:[%s9765_s6 + $0xf60] sm:$0xff]  ;;  %v824_v6 = vld [vmem:[%s9765_s6 + $0xf28] sm:$0xff] }
 0x26a   : > { %5866 = vmatprep.subr.bf16.mxu0 %v8363_v7  ;;  %6030 = vmatprep.subr.bf16.mxu1 %v8365_v9  ;;  %v832_v7 = vld [vmem:[%s9765_s6 + $0xf68] sm:$0xff]  ;;  %v8458_v9 = vcombine.low %v807_v56, %v815_v57  ;;  %v8475_v11 = vcombine.high %v823_v2, %v831_v3 }
 0x26b   : > { %v8477_v12 = vcombine.high %v824_v6, %v832_v7  ;;  %v8476_v20 = vcombine.low %v824_v6, %v832_v7  ;;  %v935_v7 = vld [vmem:[%s9765_s6 + $0x12a0] sm:$0xff] }
 0x26d   : > { %5867 = vmatpush1.bf16.msra.mxu0 %v8362_v15  ;;  %6031 = vmatpush1.bf16.msra.mxu1 %v8364_v17  ;;  %v847_v15 = vld [vmem:[%s9765_s6 + $0xfe0] sm:$0xff]  ;;  %v840_v17 = vld [vmem:[%s9765_s6 + $0xfa8] sm:$0xff] }
 0x26e   : > { %5868 = vmatprep.subr.bf16.mxu0 %v8379_v18  ;;  %6032 = vmatprep.subr.bf16.mxu1 %v8381_v19  ;;  %v848_v18 = vld [vmem:[%s9765_s6 + $0xfe8] sm:$0xff]  ;;  %v8474_v19 = vcombine.low %v823_v2, %v831_v3  ;;  %v8491_v21 = vcombine.high %v839_v14, %v847_v15 }
 0x26f   : > { %v8493_v54 = vcombine.high %v840_v17, %v848_v18  ;;  %v8492_v30 = vcombine.low %v840_v17, %v848_v18  ;;  %v951_v18 = vld [vmem:[%s9765_s6 + $0x1320] sm:$0xff] }
 0x271   : > { %5869 = vmatpush1.bf16.msra.mxu0 %v8378_v24  ;;  %6033 = vmatpush1.bf16.msra.mxu1 %v8380_v27  ;;  %v863_v24 = vld [vmem:[%s9765_s6 + $0x1060] sm:$0xff]  ;;  %v856_v27 = vld [vmem:[%s9765_s6 + $0x1028] sm:$0xff] }
 0x272   : > { %5870 = vmatprep.subr.bf16.mxu0 %v8395_v28  ;;  %6034 = vmatprep.subr.bf16.mxu1 %v8397_v29  ;;  %v864_v28 = vld [vmem:[%s9765_s6 + $0x1068] sm:$0xff]  ;;  %v8490_v29 = vcombine.low %v839_v14, %v847_v15  ;;  %v8507_v31 = vcombine.high %v855_v23, %v863_v24 }
 0x273   : > { %v8509_v32 = vcombine.high %v856_v27, %v864_v28  ;;  %v8508_v39 = vcombine.low %v856_v27, %v864_v28  ;;  %v967_v28 = vld [vmem:[%s9765_s6 + $0x13a0] sm:$0xff] }
 0x275   : > { %5871 = vmatpush1.bf16.msra.mxu0 %v8394_v34  ;;  %6035 = vmatpush1.bf16.msra.mxu1 %v8396_v36  ;;  %v879_v34 = vld [vmem:[%s9765_s6 + $0x10e0] sm:$0xff]  ;;  %v872_v36 = vld [vmem:[%s9765_s6 + $0x10a8] sm:$0xff] }
 0x276   : > { %5872 = vmatprep.subr.bf16.mxu0 %v8411_v37  ;;  %6036 = vmatprep.subr.bf16.mxu1 %v8413_v38  ;;  %v880_v37 = vld [vmem:[%s9765_s6 + $0x10e8] sm:$0xff]  ;;  %v8506_v38 = vcombine.low %v855_v23, %v863_v24  ;;  %v8523_v40 = vcombine.high %v871_v33, %v879_v34 }
 0x277   : > { %v8525_v41 = vcombine.high %v872_v36, %v880_v37  ;;  %v8524_v47 = vcombine.low %v872_v36, %v880_v37  ;;  %v983_v37 = vld [vmem:[%s9765_s6 + $0x1420] sm:$0xff] }
 0x279   : > { %5873 = vmatpush1.bf16.msra.mxu0 %v8410_v43  ;;  %6037 = vmatpush1.bf16.msra.mxu1 %v8412_v44  ;;  %v895_v43 = vld [vmem:[%s9765_s6 + $0x1160] sm:$0xff]  ;;  %v888_v44 = vld [vmem:[%s9765_s6 + $0x1128] sm:$0xff] }
 0x27a   : > { %5874 = vmatprep.subr.bf16.mxu0 %v8427_v45  ;;  %6038 = vmatprep.subr.bf16.mxu1 %v8429_v46  ;;  %v896_v45 = vld [vmem:[%s9765_s6 + $0x1168] sm:$0xff]  ;;  %v8522_v46 = vcombine.low %v871_v33, %v879_v34  ;;  %v8539_v48 = vcombine.high %v887_v42, %v895_v43 }
 0x27b   : > { %v8541_v49 = vcombine.high %v888_v44, %v896_v45  ;;  %v8540_v56 = vcombine.low %v888_v44, %v896_v45  ;;  %v999_v45 = vld [vmem:[%s9765_s6 + $0x14a0] sm:$0xff] }
 0x27d   : > { %5875 = vmatpush1.bf16.msra.mxu0 %v8426_v51  ;;  %6039 = vmatpush1.bf16.msra.mxu1 %v8428_v52  ;;  %v911_v51 = vld [vmem:[%s9765_s6 + $0x11e0] sm:$0xff]  ;;  %v904_v52 = vld [vmem:[%s9765_s6 + $0x11a8] sm:$0xff] }
 0x27e   : > { %5876 = vmatprep.subr.bf16.mxu0 %v8443_v53  ;;  %6040 = vmatprep.subr.bf16.mxu1 %v8445_v55  ;;  %v912_v53 = vld [vmem:[%s9765_s6 + $0x11e8] sm:$0xff]  ;;  %v8538_v55 = vcombine.low %v887_v42, %v895_v43  ;;  %v8555_v57 = vcombine.high %v903_v50, %v911_v51 }
 0x27f   : > { %v8557_v59 = vcombine.high %v904_v52, %v912_v53  ;;  %v8556_v2 = vcombine.low %v904_v52, %v912_v53  ;;  %v1015_v53 = vld [vmem:[%s9765_s6 + $0x1520] sm:$0xff] }
 0x281   : > { %5877 = vmatpush1.bf16.msra.mxu0 %v8442_v61  ;;  %6041 = vmatpush1.bf16.msra.mxu1 %v8444_v62  ;;  %v927_v61 = vld [vmem:[%s9765_s6 + $0x1260] sm:$0xff]  ;;  %v920_v62 = vld [vmem:[%s9765_s6 + $0x1228] sm:$0xff] }
 0x282   : > { %5878 = vmatprep.subr.bf16.mxu0 %v8459_v63  ;;  %6042 = vmatprep.subr.bf16.mxu1 %v8461_v1  ;;  %v928_v63 = vld [vmem:[%s9765_s6 + $0x1268] sm:$0xff]  ;;  %v8554_v1 = vcombine.low %v903_v50, %v911_v51  ;;  %v8571_v3 = vcombine.high %v919_v60, %v927_v61 }
 0x283   : > { %v8573_v6 = vcombine.high %v920_v62, %v928_v63  ;;  %v8572_v14 = vcombine.low %v920_v62, %v928_v63  ;;  %v1031_v63 = vld [vmem:[%s9765_s6 + $0x15a0] sm:$0xff] }
 0x285   : > { %5879 = vmatpush1.bf16.msra.mxu0 %v8458_v9  ;;  %6043 = vmatpush1.bf16.msra.mxu1 %v8460_v10  ;;  %v943_v9 = vld [vmem:[%s9765_s6 + $0x12e0] sm:$0xff]  ;;  %v936_v10 = vld [vmem:[%s9765_s6 + $0x12a8] sm:$0xff] }
 0x286   : > { %5880 = vmatprep.subr.bf16.mxu0 %v8475_v11  ;;  %6044 = vmatprep.subr.bf16.mxu1 %v8477_v12  ;;  %v944_v11 = vld [vmem:[%s9765_s6 + $0x12e8] sm:$0xff]  ;;  %v8570_v12 = vcombine.low %v919_v60, %v927_v61  ;;  %v8587_v15 = vcombine.high %v935_v7, %v943_v9 }
 0x287   : > { %v8589_v17 = vcombine.high %v936_v10, %v944_v11  ;;  %v8588_v23 = vcombine.low %v936_v10, %v944_v11  ;;  %v1047_v11 = vld [vmem:[%s9765_s6 + $0x1620] sm:$0xff] }
 0x289   : > { %5881 = vmatpush1.bf16.msra.mxu0 %v8474_v19  ;;  %6045 = vmatpush1.bf16.msra.mxu1 %v8476_v20  ;;  %v959_v19 = vld [vmem:[%s9765_s6 + $0x1360] sm:$0xff]  ;;  %v952_v20 = vld [vmem:[%s9765_s6 + $0x1328] sm:$0xff] }
 0x28a   : > { %5882 = vmatprep.subr.bf16.mxu0 %v8491_v21  ;;  %6046 = vmatprep.subr.bf16.mxu1 %v8493_v54  ;;  %v960_v21 = vld [vmem:[%s9765_s6 + $0x1368] sm:$0xff]  ;;  %v8586_v54 = vcombine.low %v935_v7, %v943_v9  ;;  %v8603_v24 = vcombine.high %v951_v18, %v959_v19 }
 0x28b   : > { %v8605_v27 = vcombine.high %v952_v20, %v960_v21  ;;  %v8604_v33 = vcombine.low %v952_v20, %v960_v21  ;;  %v1063_v21 = vld [vmem:[%s9765_s6 + $0x16a0] sm:$0xff] }
 0x28d   : > { %5883 = vmatpush1.bf16.msra.mxu0 %v8490_v29  ;;  %6047 = vmatpush1.bf16.msra.mxu1 %v8492_v30  ;;  %v975_v29 = vld [vmem:[%s9765_s6 + $0x13e0] sm:$0xff]  ;;  %v968_v30 = vld [vmem:[%s9765_s6 + $0x13a8] sm:$0xff] }
 0x28e   : > { %5893 = vmatprep.subr.bf16.mxu0 %v8507_v31  ;;  %6057 = vmatprep.subr.bf16.mxu1 %v8509_v32  ;;  %v976_v31 = vld [vmem:[%s9765_s6 + $0x13e8] sm:$0xff]  ;;  %v8602_v32 = vcombine.low %v951_v18, %v959_v19  ;;  %v8619_v34 = vcombine.high %v967_v28, %v975_v29 }
 0x28f   : > { %v8621_v36 = vcombine.high %v968_v30, %v976_v31  ;;  %v8620_v42 = vcombine.low %v968_v30, %v976_v31  ;;  %v1079_v31 = vld [vmem:[%s9765_s6 + $0x1720] sm:$0xff] }
 0x290   : > { %5885 = vmatmul.mubr.bf16.vlgmr.msra.gmra.mrb[8].mxu0 %v9956_v26  ;;  %6049 = vmatmul.mubr.bf16.vlgmr.msra.gmra.mrb[8].mxu1 %v9956_v26 }
 0x291   : > { %5894 = vmatpush1.bf16.msra.mxu0 %v8506_v38  ;;  %6058 = vmatpush1.bf16.msra.mxu1 %v8508_v39  ;;  %v991_v38 = vld [vmem:[%s9765_s6 + $0x1460] sm:$0xff]  ;;  %v984_v39 = vld [vmem:[%s9765_s6 + $0x1428] sm:$0xff] }
 0x292   : > { %5895 = vmatprep.subr.bf16.mxu0 %v8523_v40  ;;  %6059 = vmatprep.subr.bf16.mxu1 %v8525_v41  ;;  %v992_v40 = vld [vmem:[%s9765_s6 + $0x1468] sm:$0xff]  ;;  %v8618_v41 = vcombine.low %v967_v28, %v975_v29  ;;  %v8635_v43 = vcombine.high %v983_v37, %v991_v38 }
 0x293   : > { %5925 = vmatprep.mubr.bf16.mxu0 %v9964_v16  ;;  %6089 = vmatprep.mubr.bf16.mxu1 %v9964_v16  ;;  %v8637_v44 = vcombine.high %v984_v39, %v992_v40  ;;  %v8636_v50 = vcombine.low %v984_v39, %v992_v40  ;;  %v1095_v40 = vld [vmem:[%s9765_s6 + $0x17a0] sm:$0xff] }
 0x295   : > { %5896 = vmatpush1.bf16.msra.mxu0 %v8522_v46  ;;  %6060 = vmatpush1.bf16.msra.mxu1 %v8524_v47  ;;  %v1007_v46 = vld [vmem:[%s9765_s6 + $0x14e0] sm:$0xff]  ;;  %v1000_v47 = vld [vmem:[%s9765_s6 + $0x14a8] sm:$0xff] }
 0x296   : > { %5897 = vmatprep.subr.bf16.mxu0 %v8539_v48  ;;  %6061 = vmatprep.subr.bf16.mxu1 %v8541_v49  ;;  %v1008_v48 = vld [vmem:[%s9765_s6 + $0x14e8] sm:$0xff]  ;;  %v8634_v49 = vcombine.low %v983_v37, %v991_v38  ;;  %v8651_v51 = vcombine.high %v999_v45, %v1007_v46 }
 0x297   : > { %v8653_v52 = vcombine.high %v1000_v47, %v1008_v48  ;;  %v8652_v60 = vcombine.low %v1000_v47, %v1008_v48  ;;  %v1111_v48 = vld [vmem:[%s9765_s6 + $0x1820] sm:$0xff] }
 0x299   : > { %5898 = vmatpush1.bf16.msra.mxu0 %v8538_v55  ;;  %6062 = vmatpush1.bf16.msra.mxu1 %v8540_v56  ;;  %v1023_v55 = vld [vmem:[%s9765_s6 + $0x1560] sm:$0xff]  ;;  %v1016_v56 = vld [vmem:[%s9765_s6 + $0x1528] sm:$0xff] }
 0x29a   : > { %5899 = vmatprep.subr.bf16.mxu0 %v8555_v57  ;;  %6063 = vmatprep.subr.bf16.mxu1 %v8557_v59  ;;  %v1024_v57 = vld [vmem:[%s9765_s6 + $0x1568] sm:$0xff]  ;;  %v8650_v59 = vcombine.low %v999_v45, %v1007_v46  ;;  %v8667_v61 = vcombine.high %v1015_v53, %v1023_v55 }
 0x29b   : > { %v8669_v62 = vcombine.high %v1016_v56, %v1024_v57  ;;  %v8668_v7 = vcombine.low %v1016_v56, %v1024_v57  ;;  %v345_v57 = vld [vmem:[%s9765_s6 + $0x30] sm:$0xff] }
 0x29d   : > { %5900 = vmatpush1.bf16.msra.mxu0 %v8554_v1  ;;  %6064 = vmatpush1.bf16.msra.mxu1 %v8556_v2  ;;  %v1039_v1 = vld [vmem:[%s9765_s6 + $0x15e0] sm:$0xff]  ;;  %v1032_v2 = vld [vmem:[%s9765_s6 + $0x15a8] sm:$0xff] }
 0x29e   : > { %5901 = vmatprep.subr.bf16.mxu0 %v8571_v3  ;;  %6065 = vmatprep.subr.bf16.mxu1 %v8573_v6  ;;  %v1040_v3 = vld [vmem:[%s9765_s6 + $0x15e8] sm:$0xff]  ;;  %v8666_v6 = vcombine.low %v1015_v53, %v1023_v55  ;;  %v8683_v9 = vcombine.high %v1031_v63, %v1039_v1 }
 0x29f   : > { %v8685_v10 = vcombine.high %v1032_v2, %v1040_v3  ;;  %v8684_v18 = vcombine.low %v1032_v2, %v1040_v3  ;;  %v361_v3 = vld [vmem:[%s9765_s6 + $0xb0] sm:$0xff] }
 0x2a1   : > { %5902 = vmatpush1.bf16.msra.mxu0 %v8570_v12  ;;  %6066 = vmatpush1.bf16.msra.mxu1 %v8572_v14  ;;  %v1055_v12 = vld [vmem:[%s9765_s6 + $0x1660] sm:$0xff]  ;;  %v1048_v14 = vld [vmem:[%s9765_s6 + $0x1628] sm:$0xff] }
 0x2a2   : > { %5903 = vmatprep.subr.bf16.mxu0 %v8587_v15  ;;  %6067 = vmatprep.subr.bf16.mxu1 %v8589_v17  ;;  %v1056_v15 = vld [vmem:[%s9765_s6 + $0x1668] sm:$0xff]  ;;  %v8682_v17 = vcombine.low %v1031_v63, %v1039_v1  ;;  %v8699_v19 = vcombine.high %v1047_v11, %v1055_v12 }
 0x2a3   : > { %v8701_v20 = vcombine.high %v1048_v14, %v1056_v15  ;;  %v8700_v28 = vcombine.low %v1048_v14, %v1056_v15  ;;  %v377_v15 = vld [vmem:[%s9765_s6 + $0x130] sm:$0xff] }
 0x2a5   : > { %5904 = vmatpush1.bf16.msra.mxu0 %v8586_v54  ;;  %6068 = vmatpush1.bf16.msra.mxu1 %v8588_v23  ;;  %v1071_v54 = vld [vmem:[%s9765_s6 + $0x16e0] sm:$0xff]  ;;  %v1064_v23 = vld [vmem:[%s9765_s6 + $0x16a8] sm:$0xff] }
 0x2a6   : > { %5905 = vmatprep.subr.bf16.mxu0 %v8603_v24  ;;  %6069 = vmatprep.subr.bf16.mxu1 %v8605_v27  ;;  %v1072_v24 = vld [vmem:[%s9765_s6 + $0x16e8] sm:$0xff]  ;;  %v8698_v27 = vcombine.low %v1047_v11, %v1055_v12  ;;  %v8715_v29 = vcombine.high %v1063_v21, %v1071_v54 }
 0x2a7   : > { %v8717_v30 = vcombine.high %v1064_v23, %v1072_v24  ;;  %v8716_v37 = vcombine.low %v1064_v23, %v1072_v24 }
 0x2a9   : > { %5906 = vmatpush1.bf16.msra.mxu0 %v8602_v32  ;;  %6070 = vmatpush1.bf16.msra.mxu1 %v8604_v33  ;;  %v1087_v32 = vld [vmem:[%s9765_s6 + $0x1760] sm:$0xff]  ;;  %v1080_v33 = vld [vmem:[%s9765_s6 + $0x1728] sm:$0xff] }
 0x2aa   : > { %5907 = vmatprep.subr.bf16.mxu0 %v8619_v34  ;;  %6071 = vmatprep.subr.bf16.mxu1 %v8621_v36  ;;  %v1088_v34 = vld [vmem:[%s9765_s6 + $0x1768] sm:$0xff]  ;;  %v8714_v36 = vcombine.low %v1063_v21, %v1071_v54  ;;  %v8731_v38 = vcombine.high %v1079_v31, %v1087_v32 }
 0x2ab   : > { %v8733_v39 = vcombine.high %v1080_v33, %v1088_v34  ;;  %v8732_v45 = vcombine.low %v1080_v33, %v1088_v34 }
 0x2ad   : > { %5908 = vmatpush1.bf16.msra.mxu0 %v8618_v41  ;;  %6072 = vmatpush1.bf16.msra.mxu1 %v8620_v42  ;;  %v1103_v41 = vld [vmem:[%s9765_s6 + $0x17e0] sm:$0xff]  ;;  %v1096_v42 = vld [vmem:[%s9765_s6 + $0x17a8] sm:$0xff] }
 0x2ae   : > { %5909 = vmatprep.subr.bf16.mxu0 %v8635_v43  ;;  %6073 = vmatprep.subr.bf16.mxu1 %v8637_v44  ;;  %v1104_v43 = vld [vmem:[%s9765_s6 + $0x17e8] sm:$0xff]  ;;  %v8730_v44 = vcombine.low %v1079_v31, %v1087_v32  ;;  %v8747_v46 = vcombine.high %v1095_v40, %v1103_v41 }
 0x2af   : > { %v8749_v47 = vcombine.high %v1096_v42, %v1104_v43  ;;  %v8748_v53 = vcombine.low %v1096_v42, %v1104_v43 }
 0x2b1   : > { %5910 = vmatpush1.bf16.msra.mxu0 %v8634_v49  ;;  %6074 = vmatpush1.bf16.msra.mxu1 %v8636_v50  ;;  %v1119_v49 = vld [vmem:[%s9765_s6 + $0x1860] sm:$0xff]  ;;  %v1112_v50 = vld [vmem:[%s9765_s6 + $0x1828] sm:$0xff] }
 0x2b2   : > { %5911 = vmatprep.subr.bf16.mxu0 %v8651_v51  ;;  %6075 = vmatprep.subr.bf16.mxu1 %v8653_v52  ;;  %v1120_v51 = vld [vmem:[%s9765_s6 + $0x1868] sm:$0xff]  ;;  %v8746_v52 = vcombine.low %v1095_v40, %v1103_v41  ;;  %v8763_v55 = vcombine.high %v1111_v48, %v1119_v49  ;;  %v410_v41 = vld [vmem:[%s9765_s6 + $0x238] sm:$0xff] }
 0x2b3   : > { %v8765_v56 = vcombine.high %v1112_v50, %v1120_v51  ;;  %v8764_v63 = vcombine.low %v1112_v50, %v1120_v51  ;;  %v425_v51 = vld [vmem:[%s9765_s6 + $0x2b0] sm:$0xff] }
 0x2b5   : > { %5912 = vmatpush1.bf16.msra.mxu0 %v8650_v59  ;;  %6076 = vmatpush1.bf16.msra.mxu1 %v8652_v60  ;;  %v353_v59 = vld [vmem:[%s9765_s6 + $0x70] sm:$0xff]  ;;  %v8762_v60 = vcombine.low %v1111_v48, %v1119_v49 }
 0x2b6   : > { %5913 = vmatprep.subr.bf16.mxu0 %v8667_v61  ;;  %6077 = vmatprep.subr.bf16.mxu1 %v8669_v62  ;;  %v346_v61 = vld [vmem:[%s9765_s6 + $0x38] sm:$0xff]  ;;  %v7999_v1 = vcombine.high %v345_v57, %v353_v59 }
 0x2b7   : > { %v354_v62 = vld [vmem:[%s9765_s6 + $0x78] sm:$0xff] }
 0x2b8   : > { %v8001_v2 = vcombine.high %v346_v61, %v354_v62  ;;  %v8000_v11 = vcombine.low %v346_v61, %v354_v62  ;;  %v441_v61 = vld [vmem:[%s9765_s6 + $0x330] sm:$0xff] }
 0x2b9   : > { %5914 = vmatpush1.bf16.msra.mxu0 %v8666_v6  ;;  %6078 = vmatpush1.bf16.msra.mxu1 %v8668_v7  ;;  %v369_v6 = vld [vmem:[%s9765_s6 + $0xf0] sm:$0xff]  ;;  %v362_v7 = vld [vmem:[%s9765_s6 + $0xb8] sm:$0xff] }
 0x2ba   : > { %5915 = vmatprep.subr.bf16.mxu0 %v8683_v9  ;;  %6079 = vmatprep.subr.bf16.mxu1 %v8685_v10  ;;  %v370_v9 = vld [vmem:[%s9765_s6 + $0xf8] sm:$0xff]  ;;  %v7998_v10 = vcombine.low %v345_v57, %v353_v59  ;;  %v8015_v12 = vcombine.high %v361_v3, %v369_v6  ;;  %v8014_v21 = vcombine.low %v361_v3, %v369_v6  ;;  %v449_v62 = vld [vmem:[%s9765_s6 + $0x370] sm:$0xff] }
 0x2bb   : > { %v8017_v14 = vcombine.high %v362_v7, %v370_v9  ;;  %v8016_v54 = vcombine.low %v362_v7, %v370_v9  ;;  %v8095_v6 = vcombine.high %v441_v61, %v449_v62  ;;  %v457_v9 = vld [vmem:[%s9765_s6 + $0x3b0] sm:$0xff] }
 0x2bd   : > { %5916 = vmatpush1.bf16.msra.mxu0 %v8682_v17  ;;  %6080 = vmatpush1.bf16.msra.mxu1 %v8684_v18  ;;  %v385_v17 = vld [vmem:[%s9765_s6 + $0x170] sm:$0xff]  ;;  %v9408_v18 = vld [vmem:[%s10920_s0 + $0x18] ss:$0 sps:$4 sm:$0xff]  }
 0x2be   : > { %5917 = vmatprep.subr.bf16.mxu0 %v8699_v19  ;;  %6081 = vmatprep.subr.bf16.mxu1 %v8701_v20  ;;  %v378_v19 = vld [vmem:[%s9765_s6 + $0x138] sm:$0xff]  ;;  %v8031_v23 = vcombine.high %v377_v15, %v385_v17  ;;  %v8030_v31 = vcombine.low %v377_v15, %v385_v17 }
 0x2bf   : > { %v386_v20 = vld [vmem:[%s9765_s6 + $0x178] sm:$0xff] }
 0x2c0   : > { %v8033_v24 = vcombine.high %v378_v19, %v386_v20  ;;  %v8032_v32 = vcombine.low %v378_v19, %v386_v20  ;;  %v473_v19 = vld [vmem:[%s9765_s6 + $0x430] sm:$0xff] }
 0x2c1   : > { %5918 = vmatpush1.bf16.msra.mxu0 %v8698_v27  ;;  %6082 = vmatpush1.bf16.msra.mxu1 %v8700_v28  ;;  %v393_v27 = vld [vmem:[%s9765_s6 + $0x1b0] sm:$0xff] }
 0x2c2   : > { %5919 = vmatprep.subr.bf16.mxu0 %v8715_v29  ;;  %6083 = vmatprep.subr.bf16.mxu1 %v8717_v30  ;;  %v401_v28 = vld [vmem:[%s9765_s6 + $0x1f0] sm:$0xff]  ;;  %v394_v29 = vld [vmem:[%s9765_s6 + $0x1b8] sm:$0xff] }
 0x2c3   : > { %v402_v30 = vld [vmem:[%s9765_s6 + $0x1f8] sm:$0xff]  ;;  %v8047_v33 = vcombine.high %v393_v27, %v401_v28  ;;  %v481_v20 = vld [vmem:[%s9765_s6 + $0x470] sm:$0xff] }
 0x2c5   : > { %5920 = vmatpush1.bf16.msra.mxu0 %v8714_v36  ;;  %6084 = vmatpush1.bf16.msra.mxu1 %v8716_v37  ;;  %v8049_v36 = vcombine.high %v394_v29, %v402_v30  ;;  %v409_v37 = vld [vmem:[%s9765_s6 + $0x230] sm:$0xff] }
 0x2c6   : > { %5921 = vmatprep.subr.bf16.mxu0 %v8731_v38  ;;  %6085 = vmatprep.subr.bf16.mxu1 %v8733_v39  ;;  %v417_v38 = vld [vmem:[%s9765_s6 + $0x270] sm:$0xff] }
 0x2c7   : > { %v8063_v48 = vcombine.high %v409_v37, %v417_v38 }
 0x2c9   : > { %5922 = vmatpush1.bf16.msra.mxu0 %v8730_v44  ;;  %6086 = vmatpush1.bf16.msra.mxu1 %v8732_v45  ;;  %v8046_v44 = vcombine.low %v393_v27, %v401_v28  ;;  %v8127_v27 = vcombine.high %v473_v19, %v481_v20 }
 0x2ca   : > { %5923 = vmatprep.subr.bf16.mxu0 %v8747_v46  ;;  %6087 = vmatprep.subr.bf16.mxu1 %v8749_v47  ;;  %v8048_v47 = vcombine.low %v394_v29, %v402_v30  ;;  %v489_v29 = vld [vmem:[%s9765_s6 + $0x4b0] sm:$0xff] }
 0x2cb   : > { %v497_v30 = vld [vmem:[%s9765_s6 + $0x4f0] sm:$0xff] }
 0x2cd   : > { %5924 = vmatpush1.bf16.msra.mxu0 %v8746_v52  ;;  %6088 = vmatpush1.bf16.msra.mxu1 %v8748_v53  ;;  %v433_v52 = vld [vmem:[%s9765_s6 + $0x2f0] sm:$0xff]  ;;  %v426_v53 = vld [vmem:[%s9765_s6 + $0x2b8] sm:$0xff] }
 0x2ce   : > { %5934 = vmatprep.subr.bf16.mxu0 %v8763_v55  ;;  %6098 = vmatprep.subr.bf16.mxu1 %v8765_v56  ;;  %v434_v55 = vld [vmem:[%s9765_s6 + $0x2f8] sm:$0xff]  ;;  %v8062_v56 = vcombine.low %v409_v37, %v417_v38  ;;  %v8079_v59 = vcombine.high %v425_v51, %v433_v52  ;;  %v8143_v37 = vcombine.high %v489_v29, %v497_v30 }
 0x2cf   : > { %v8080_v3 = vcombine.low %v426_v53, %v434_v55 }
 0x2d0   : > { %5926 = vmatmul.mubr.bf16.vlgmr.msra.gmra.mrb[8].mxu0 %v10028_v35  ;;  %6090 = vmatmul.mubr.bf16.vlgmr.msra.gmra.mrb[8].mxu1 %v10028_v35 }
 0x2d1   : > { %5935 = vmatpush1.bf16.msra.mxu0 %v8762_v60  ;;  %6099 = vmatpush1.bf16.msra.mxu1 %v8764_v63  ;;  %v8081_v60 = vcombine.high %v426_v53, %v434_v55  ;;  %v442_v63 = vld [vmem:[%s9765_s6 + $0x338] sm:$0xff] }
 0x2d2   : > { %5966 = vmatprep.mubr.bf16.mxu0 %v9563_v25  ;;  %6130 = vmatprep.mubr.bf16.mxu1 %v9563_v25 }
 0x2d3   : > { %6139 = vmatprep.subr.bf16.mxu0 %v7999_v1  ;;  %6303 = vmatprep.subr.bf16.mxu1 %v8001_v2  ;;  %v450_v1 = vld [vmem:[%s9765_s6 + $0x378] sm:$0xff]  ;;  %v8078_v2 = vcombine.low %v425_v51, %v433_v52 }
 0x2d4   : > { %v8097_v7 = vcombine.high %v442_v63, %v450_v1  ;;  %v8096_v15 = vcombine.low %v442_v63, %v450_v1  ;;  %v522_v51 = vld [vmem:[%s9765_s6 + $0x5b8] sm:$0xff] }
 0x2d5   : > { %v530_v52 = vld [vmem:[%s9765_s6 + $0x5f8] sm:$0xff] }
 0x2d6   : > { %v8176_v1 = vcombine.low %v522_v51, %v530_v52 }
 0x2dc   : > { %8774 = vmatmul.mubr.msk.bf16.vlgmr.msra.gmra.mrb[8].mxu0 %vm5151_vm0, %v9408_v18  ;;  %8775 = vmatmul.mubr.msk.bf16.vlgmr.msra.gmra.mrb[8].mxu1 %vm5151_vm0, %v9408_v18 }
 0x2dd   : > { %6140 = vmatpush1.bf16.msra.mxu0 %v7998_v10  ;;  %6304 = vmatpush1.bf16.msra.mxu1 %v8000_v11  ;;  %v465_v10 = vld [vmem:[%s9765_s6 + $0x3f0] sm:$0xff]  ;;  %v458_v11 = vld [vmem:[%s9765_s6 + $0x3b8] sm:$0xff] }
 0x2de   : > { %6141 = vmatprep.subr.bf16.mxu0 %v8015_v12  ;;  %6305 = vmatprep.subr.bf16.mxu1 %v8017_v14  ;;  %v466_v12 = vld [vmem:[%s9765_s6 + $0x3f8] sm:$0xff]  ;;  %v8094_v14 = vcombine.low %v441_v61, %v449_v62  ;;  %v8111_v17 = vcombine.high %v457_v9, %v465_v10 }
 0x2df   : > { %6171 = vmatprep.mubr.bf16.mxu0 %v9822_v58  ;;  %6335 = vmatprep.mubr.bf16.mxu1 %v9822_v58  ;;  %v418_v58 = vld [vmem:[%s9765_s6 + $0x278] sm:$0xff]  ;;  %v8113_v18 = vcombine.high %v458_v11, %v466_v12 }
 0x2e0   : > { %v8065_v50 = vcombine.high %v410_v41, %v418_v58  ;;  %v8064_v57 = vcombine.low %v410_v41, %v418_v58  ;;  %v505_v41 = vld [vmem:[%s9765_s6 + $0x530] sm:$0xff]  ;;  %v538_v61 = vld [vmem:[%s9765_s6 + $0x638] sm:$0xff] }
 0x2e1   : > { %6142 = vmatpush1.bf16.msra.mxu0 %v8014_v21  ;;  %6306 = vmatpush1.bf16.msra.mxu1 %v8016_v54  ;;  %v474_v21 = vld [vmem:[%s9765_s6 + $0x438] sm:$0xff]  ;;  %v513_v58 = vld [vmem:[%s9765_s6 + $0x570] sm:$0xff] }
 0x2e2   : > { %6143 = vmatprep.subr.bf16.mxu0 %v8031_v23  ;;  %6307 = vmatprep.subr.bf16.mxu1 %v8033_v24  ;;  %v482_v54 = vld [vmem:[%s9765_s6 + $0x478] sm:$0xff]  ;;  %v8110_v23 = vcombine.low %v457_v9, %v465_v10  ;;  %v8112_v24 = vcombine.low %v458_v11, %v466_v12  ;;  %v8158_v53 = vcombine.low %v505_v41, %v513_v58 }
 0x2e3   : > { %v10495_v34 = vpop.f32.mrb[4].mxu0  ;;  %v10499_v39 = vpop.f32.mrb[4].mxu1  ;;  %v8129_v28 = vcombine.high %v474_v21, %v482_v54  ;;  %v546_v62 = vld [vmem:[%s9765_s6 + $0x678] sm:$0xff] }
 0x2e4   : > { %v10501_v40 = vpop.f32.mrb[5].mxu0  ;;  %v10505_v42 = vpop.f32.mrb[5].mxu1  ;;  %v554_v9 = vld [vmem:[%s9765_s6 + $0x6b8] sm:$0xff]  ;;  %v8192_v12 = vcombine.low %v538_v61, %v546_v62 }
 0x2e5   : > { %6144 = vmatpush1.bf16.msra.mxu0 %v8030_v31  ;;  %v5644_v43 = vpop.f32.mrb[6].mxu0  ;;  %6308 = vmatpush1.bf16.msra.mxu1 %v8032_v32  ;;  %v5808_v45 = vpop.f32.mrb[6].mxu1  ;;  %v490_v31 = vld [vmem:[%s9765_s6 + $0x4b8] sm:$0xff] }
 0x2e6   : > { %v5645_v46 = vpop.f32.mrb[7].mxu0  ;;  %6145 = vmatprep.subr.bf16.mxu0 %v8047_v33  ;;  %v5809_v49 = vpop.f32.mrb[7].mxu1  ;;  %6309 = vmatprep.subr.bf16.mxu1 %v8049_v36  ;;  %v498_v32 = vld [vmem:[%s9765_s6 + $0x4f8] sm:$0xff]  ;;  %v8126_v33 = vcombine.low %v473_v19, %v481_v20  ;;  %v8128_v36 = vcombine.low %v474_v21, %v482_v54  ;;  %v8142_v45 = vcombine.low %v489_v29, %v497_v30 }
 0x2e7   : > { %v8145_v38 = vcombine.high %v490_v31, %v498_v32  ;;  %v506_v43 = vld [vmem:[%s9765_s6 + $0x538] sm:$0xff]  ;;  %v8144_v46 = vcombine.low %v490_v31, %v498_v32  ;;  %v521_v49 = vld [vmem:[%s9765_s6 + $0x5b0] sm:$0xff] }
 0x2e8   : > { %v562_v10 = vld [vmem:[%s9765_s6 + $0x6f8] sm:$0xff] }
 0x2e9   : > { %6146 = vmatpush1.bf16.msra.mxu0 %v8046_v44  ;;  %6310 = vmatpush1.bf16.msra.mxu1 %v8048_v47  ;;  %v514_v44 = vld [vmem:[%s9765_s6 + $0x578] sm:$0xff]  ;;  %v8159_v47 = vcombine.high %v505_v41, %v513_v58  ;;  %v8208_v54 = vcombine.low %v554_v9, %v562_v10 }
 0x2ea   : > { %6147 = vmatprep.subr.bf16.mxu0 %v8063_v48  ;;  %6311 = vmatprep.subr.bf16.mxu1 %v8065_v50  ;;  %v8161_v48 = vcombine.high %v506_v43, %v514_v44  ;;  %v529_v50 = vld [vmem:[%s9765_s6 + $0x5f0] sm:$0xff]  ;;  %v8160_v55 = vcombine.low %v506_v43, %v514_v44  ;;  %v570_v19 = vld [vmem:[%s9765_s6 + $0x738] sm:$0xff] }
 0x2eb   : > { %v8174_v63 = vcombine.low %v521_v49, %v529_v50  ;;  %v578_v20 = vld [vmem:[%s9765_s6 + $0x778] sm:$0xff] }
 0x2ec   : > { %v586_v29 = vld [vmem:[%s9765_s6 + $0x7b8] sm:$0xff]  ;;  %v8224_v32 = vcombine.low %v570_v19, %v578_v20 }
 0x2ed   : > { %6148 = vmatpush1.bf16.msra.mxu0 %v8062_v56  ;;  %6312 = vmatpush1.bf16.msra.mxu1 %v8064_v57  ;;  %v8175_v56 = vcombine.high %v521_v49, %v529_v50  ;;  %v8177_v57 = vcombine.high %v522_v51, %v530_v52  ;;  %v594_v30 = vld [vmem:[%s9765_s6 + $0x7f8] sm:$0xff] }
 0x2ee   : > { %6149 = vmatprep.subr.bf16.mxu0 %v8079_v59  ;;  %6313 = vmatprep.subr.bf16.mxu1 %v8081_v60  ;;  %v537_v59 = vld [vmem:[%s9765_s6 + $0x630] sm:$0xff]  ;;  %v602_v41 = vld [vmem:[%s9765_s6 + $0x838] sm:$0xff]  ;;  %v8240_v44 = vcombine.low %v586_v29, %v594_v30 }
 0x2ef   : > { %v545_v60 = vld [vmem:[%s9765_s6 + $0x670] sm:$0xff]  ;;  %v610_v58 = vld [vmem:[%s9765_s6 + $0x878] sm:$0xff] }
 0x2f0   : > { %v8190_v11 = vcombine.low %v537_v59, %v545_v60  ;;  %v618_v49 = vld [vmem:[%s9765_s6 + $0x8b8] sm:$0xff]  ;;  %v8256_v52 = vcombine.low %v602_v41, %v610_v58 }
 0x2f1   : > { %6150 = vmatpush1.bf16.msra.mxu0 %v8078_v2  ;;  %6314 = vmatpush1.bf16.msra.mxu1 %v8080_v3  ;;  %v8191_v2 = vcombine.high %v537_v59, %v545_v60  ;;  %v8193_v3 = vcombine.high %v538_v61, %v546_v62  ;;  %v626_v50 = vld [vmem:[%s9765_s6 + $0x8f8] sm:$0xff] }
 0x2f2   : > { %6151 = vmatprep.subr.bf16.mxu0 %v8095_v6  ;;  %6315 = vmatprep.subr.bf16.mxu1 %v8097_v7  ;;  %v553_v6 = vld [vmem:[%s9765_s6 + $0x6b0] sm:$0xff]  ;;  %v634_v59 = vld [vmem:[%s9765_s6 + $0x938] sm:$0xff]  ;;  %v8272_v62 = vcombine.low %v618_v49, %v626_v50 }
 0x2f3   : > { %v561_v7 = vld [vmem:[%s9765_s6 + $0x6f0] sm:$0xff]  ;;  %v642_v60 = vld [vmem:[%s9765_s6 + $0x978] sm:$0xff] }
 0x2f4   : > { %v8206_v21 = vcombine.low %v553_v6, %v561_v7 }
 0x2f5   : > { %6152 = vmatpush1.bf16.msra.mxu0 %v8094_v14  ;;  %6316 = vmatpush1.bf16.msra.mxu1 %v8096_v15  ;;  %v8207_v14 = vcombine.high %v553_v6, %v561_v7  ;;  %v8209_v15 = vcombine.high %v554_v9, %v562_v10  ;;  %v650_v6 = vld [vmem:[%s9765_s6 + $0x9b8] sm:$0xff]  ;;  %v8288_v9 = vcombine.low %v634_v59, %v642_v60 }
 0x2f6   : > { %6153 = vmatprep.subr.bf16.mxu0 %v8111_v17  ;;  %6317 = vmatprep.subr.bf16.mxu1 %v8113_v18  ;;  %v569_v17 = vld [vmem:[%s9765_s6 + $0x730] sm:$0xff]  ;;  %v658_v7 = vld [vmem:[%s9765_s6 + $0x9f8] sm:$0xff] }
 0x2f7   : > { %v577_v18 = vld [vmem:[%s9765_s6 + $0x770] sm:$0xff] }
 0x2f8   : > { %v8222_v31 = vcombine.low %v569_v17, %v577_v18 }
 0x2f9   : > { %6154 = vmatpush1.bf16.msra.mxu0 %v8110_v23  ;;  %6318 = vmatpush1.bf16.msra.mxu1 %v8112_v24  ;;  %v8223_v23 = vcombine.high %v569_v17, %v577_v18  ;;  %v8225_v24 = vcombine.high %v570_v19, %v578_v20  ;;  %v674_v17 = vld [vmem:[%s9765_s6 + $0xa78] sm:$0xff] }
 0x2fa   : > { %6155 = vmatprep.subr.bf16.mxu0 %v8127_v27  ;;  %6319 = vmatprep.subr.bf16.mxu1 %v8129_v28  ;;  %v585_v27 = vld [vmem:[%s9765_s6 + $0x7b0] sm:$0xff] }
 0x2fb   : > { %v593_v28 = vld [vmem:[%s9765_s6 + $0x7f0] sm:$0xff] }
 0x2fc   : > { %v8238_v43 = vcombine.low %v585_v27, %v593_v28 }
 0x2fd   : > { %6156 = vmatpush1.bf16.msra.mxu0 %v8126_v33  ;;  %6320 = vmatpush1.bf16.msra.mxu1 %v8128_v36  ;;  %v8239_v33 = vcombine.high %v585_v27, %v593_v28  ;;  %v8241_v36 = vcombine.high %v586_v29, %v594_v30 }
 0x2fe   : > { %6157 = vmatprep.subr.bf16.mxu0 %v8143_v37  ;;  %6321 = vmatprep.subr.bf16.mxu1 %v8145_v38  ;;  %v601_v37 = vld [vmem:[%s9765_s6 + $0x830] sm:$0xff] }
 0x2ff   : > { %v609_v38 = vld [vmem:[%s9765_s6 + $0x870] sm:$0xff] }
 0x300   : > { %v8254_v51 = vcombine.low %v601_v37, %v609_v38 }
 0x301   : > { %6158 = vmatpush1.bf16.msra.mxu0 %v8142_v45  ;;  %6322 = vmatpush1.bf16.msra.mxu1 %v8144_v46  ;;  %v8255_v45 = vcombine.high %v601_v37, %v609_v38  ;;  %v8257_v46 = vcombine.high %v602_v41, %v610_v58 }
 0x302   : > { %6159 = vmatprep.subr.bf16.mxu0 %v8159_v47  ;;  %6323 = vmatprep.subr.bf16.mxu1 %v8161_v48  ;;  %v617_v47 = vld [vmem:[%s9765_s6 + $0x8b0] sm:$0xff] }
 0x303   : > { %v625_v48 = vld [vmem:[%s9765_s6 + $0x8f0] sm:$0xff] }
 0x304   : > { %v8270_v61 = vcombine.low %v617_v47, %v625_v48 }
 0x305   : > { %6160 = vmatpush1.bf16.msra.mxu0 %v8158_v53  ;;  %6324 = vmatpush1.bf16.msra.mxu1 %v8160_v55  ;;  %v8271_v53 = vcombine.high %v617_v47, %v625_v48  ;;  %v8273_v55 = vcombine.high %v618_v49, %v626_v50 }
 0x306   : > { %6161 = vmatprep.subr.bf16.mxu0 %v8175_v56  ;;  %6325 = vmatprep.subr.bf16.mxu1 %v8177_v57  ;;  %v633_v56 = vld [vmem:[%s9765_s6 + $0x930] sm:$0xff] }
 0x307   : > { %v641_v57 = vld [vmem:[%s9765_s6 + $0x970] sm:$0xff] }
 0x309   : > { %6162 = vmatpush1.bf16.msra.mxu0 %v8174_v63  ;;  %6326 = vmatpush1.bf16.msra.mxu1 %v8176_v1  ;;  %v8287_v63 = vcombine.high %v633_v56, %v641_v57  ;;  %v8289_v1 = vcombine.high %v634_v59, %v642_v60 }
 0x30a   : > { %6163 = vmatprep.subr.bf16.mxu0 %v8191_v2  ;;  %6327 = vmatprep.subr.bf16.mxu1 %v8193_v3  ;;  %v649_v2 = vld [vmem:[%s9765_s6 + $0x9b0] sm:$0xff] }
 0x30b   : > { %v657_v3 = vld [vmem:[%s9765_s6 + $0x9f0] sm:$0xff] }
 0x30c   : > { %v8303_v10 = vcombine.high %v649_v2, %v657_v3  ;;  %v8302_v18 = vcombine.low %v649_v2, %v657_v3 }
 0x30d   : > { %6164 = vmatpush1.bf16.msra.mxu0 %v8190_v11  ;;  %6328 = vmatpush1.bf16.msra.mxu1 %v8192_v12  ;;  %v8305_v11 = vcombine.high %v650_v6, %v658_v7  ;;  %v665_v12 = vld [vmem:[%s9765_s6 + $0xa30] sm:$0xff] }
 0x30e   : > { %6165 = vmatprep.subr.bf16.mxu0 %v8207_v14  ;;  %6329 = vmatprep.subr.bf16.mxu1 %v8209_v15  ;;  %v673_v14 = vld [vmem:[%s9765_s6 + $0xa70] sm:$0xff]  ;;  %v666_v15 = vld [vmem:[%s9765_s6 + $0xa38] sm:$0xff] }
 0x30f   : > { %v8319_v19 = vcombine.high %v665_v12, %v673_v14  ;;  %v8321_v20 = vcombine.high %v666_v15, %v674_v17  ;;  %v8318_v27 = vcombine.low %v665_v12, %v673_v14  ;;  %v8320_v28 = vcombine.low %v666_v15, %v674_v17 }
 0x311   : > { %6166 = vmatpush1.bf16.msra.mxu0 %v8206_v21  ;;  %6330 = vmatpush1.bf16.msra.mxu1 %v8208_v54  ;;  %v681_v21 = vld [vmem:[%s9765_s6 + $0xab0] sm:$0xff] }
 0x312   : > { %6167 = vmatprep.subr.bf16.mxu0 %v8223_v23  ;;  %6331 = vmatprep.subr.bf16.mxu1 %v8225_v24  ;;  %v689_v54 = vld [vmem:[%s9765_s6 + $0xaf0] sm:$0xff]  ;;  %v682_v23 = vld [vmem:[%s9765_s6 + $0xab8] sm:$0xff] }
 0x313   : > { %v690_v24 = vld [vmem:[%s9765_s6 + $0xaf8] sm:$0xff]  ;;  %v8335_v29 = vcombine.high %v681_v21, %v689_v54  ;;  %v8334_v37 = vcombine.low %v681_v21, %v689_v54 }
 0x314   : > { %v8337_v30 = vcombine.high %v682_v23, %v690_v24  ;;  %v8336_v38 = vcombine.low %v682_v23, %v690_v24 }
 0x315   : > { %6168 = vmatpush1.bf16.msra.mxu0 %v8222_v31  ;;  %6332 = vmatpush1.bf16.msra.mxu1 %v8224_v32  ;;  %v697_v31 = vld [vmem:[%s9765_s6 + $0xb30] sm:$0xff] }
 0x316   : > { %6169 = vmatprep.subr.bf16.mxu0 %v8239_v33  ;;  %6333 = vmatprep.subr.bf16.mxu1 %v8241_v36  ;;  %v705_v32 = vld [vmem:[%s9765_s6 + $0xb70] sm:$0xff]  ;;  %v698_v33 = vld [vmem:[%s9765_s6 + $0xb38] sm:$0xff] }
 0x317   : > { %v706_v36 = vld [vmem:[%s9765_s6 + $0xb78] sm:$0xff]  ;;  %v8351_v41 = vcombine.high %v697_v31, %v705_v32  ;;  %v8350_v47 = vcombine.low %v697_v31, %v705_v32 }
 0x318   : > { %v8353_v58 = vcombine.high %v698_v33, %v706_v36  ;;  %v8352_v48 = vcombine.low %v698_v33, %v706_v36 }
 0x319   : > { %6170 = vmatpush1.bf16.msra.mxu0 %v8238_v43  ;;  %6334 = vmatpush1.bf16.msra.mxu1 %v8240_v44  ;;  %v713_v43 = vld [vmem:[%s9765_s6 + $0xbb0] sm:$0xff] }
 0x31a   : > { %6180 = vmatprep.subr.bf16.mxu0 %v8255_v45  ;;  %6344 = vmatprep.subr.bf16.mxu1 %v8257_v46  ;;  %v721_v44 = vld [vmem:[%s9765_s6 + $0xbf0] sm:$0xff]  ;;  %v714_v45 = vld [vmem:[%s9765_s6 + $0xbb8] sm:$0xff] }
 0x31b   : > { %v722_v46 = vld [vmem:[%s9765_s6 + $0xbf8] sm:$0xff]  ;;  %v8367_v49 = vcombine.high %v713_v43, %v721_v44 }
 0x31c   : > { %6172 = vmatmul.mubr.bf16.vlgmr.msra.gmra.mrb[12].mxu0 %v9868_v13  ;;  %6336 = vmatmul.mubr.bf16.vlgmr.msra.gmra.mrb[12].mxu1 %v9868_v13  ;;  %v8286_v13 = vcombine.low %v633_v56, %v641_v57  ;;  %v8369_v50 = vcombine.high %v714_v45, %v722_v46  ;;  %v8366_v56 = vcombine.low %v713_v43, %v721_v44 }
 0x31d   : > { %6181 = vmatpush1.bf16.msra.mxu0 %v8254_v51  ;;  %6345 = vmatpush1.bf16.msra.mxu1 %v8256_v52  ;;  %v729_v51 = vld [vmem:[%s9765_s6 + $0xc30] sm:$0xff]  ;;  %v8368_v57 = vcombine.low %v714_v45, %v722_v46 }
 0x31e   : > { %6182 = vmatprep.subr.bf16.mxu0 %v8271_v53  ;;  %6346 = vmatprep.subr.bf16.mxu1 %v8273_v55  ;;  %v737_v52 = vld [vmem:[%s9765_s6 + $0xc70] sm:$0xff]  ;;  %v730_v53 = vld [vmem:[%s9765_s6 + $0xc38] sm:$0xff] }
 0x31f   : > { %6212 = vmatprep.mubr.bf16.mxu0 %v9881_v22  ;;  %6376 = vmatprep.mubr.bf16.mxu1 %v9881_v22  ;;  %v8304_v22 = vcombine.low %v650_v6, %v658_v7  ;;  %v738_v55 = vld [vmem:[%s9765_s6 + $0xc78] sm:$0xff]  ;;  %v8383_v59 = vcombine.high %v729_v51, %v737_v52  ;;  %v8382_v2 = vcombine.low %v729_v51, %v737_v52 }
 0x320   : > { %v8385_v60 = vcombine.high %v730_v53, %v738_v55  ;;  %v8384_v3 = vcombine.low %v730_v53, %v738_v55 }
 0x321   : > { %6183 = vmatpush1.bf16.msra.mxu0 %v8270_v61  ;;  %6347 = vmatpush1.bf16.msra.mxu1 %v8272_v62  ;;  %v745_v61 = vld [vmem:[%s9765_s6 + $0xcb0] sm:$0xff] }
 0x322   : > { %6184 = vmatprep.subr.bf16.mxu0 %v8287_v63  ;;  %6348 = vmatprep.subr.bf16.mxu1 %v8289_v1  ;;  %v753_v62 = vld [vmem:[%s9765_s6 + $0xcf0] sm:$0xff]  ;;  %v746_v63 = vld [vmem:[%s9765_s6 + $0xcb8] sm:$0xff] }
 0x323   : > { %v754_v1 = vld [vmem:[%s9765_s6 + $0xcf8] sm:$0xff]  ;;  %v8399_v6 = vcombine.high %v745_v61, %v753_v62  ;;  %v8398_v12 = vcombine.low %v745_v61, %v753_v62 }
 0x324   : > { %v8401_v7 = vcombine.high %v746_v63, %v754_v1  ;;  %v8400_v14 = vcombine.low %v746_v63, %v754_v1 }
 0x325   : > { %6185 = vmatpush1.bf16.msra.mxu0 %v8286_v13  ;;  %6349 = vmatpush1.bf16.msra.mxu1 %v8288_v9  ;;  %v761_v13 = vld [vmem:[%s9765_s6 + $0xd30] sm:$0xff] }
 0x326   : > { %6186 = vmatprep.subr.bf16.mxu0 %v8303_v10  ;;  %6350 = vmatprep.subr.bf16.mxu1 %v8305_v11  ;;  %v769_v9 = vld [vmem:[%s9765_s6 + $0xd70] sm:$0xff]  ;;  %v762_v10 = vld [vmem:[%s9765_s6 + $0xd38] sm:$0xff] }
 0x327   : > { %v770_v11 = vld [vmem:[%s9765_s6 + $0xd78] sm:$0xff]  ;;  %v8415_v15 = vcombine.high %v761_v13, %v769_v9  ;;  %v8414_v21 = vcombine.low %v761_v13, %v769_v9 }
 0x328   : > { %v8417_v17 = vcombine.high %v762_v10, %v770_v11  ;;  %v8416_v54 = vcombine.low %v762_v10, %v770_v11 }
 0x329   : > { %6187 = vmatpush1.bf16.msra.mxu0 %v8302_v18  ;;  %6351 = vmatpush1.bf16.msra.mxu1 %v8304_v22  ;;  %v777_v18 = vld [vmem:[%s9765_s6 + $0xdb0] sm:$0xff] }
 0x32a   : > { %6188 = vmatprep.subr.bf16.mxu0 %v8319_v19  ;;  %6352 = vmatprep.subr.bf16.mxu1 %v8321_v20  ;;  %v785_v22 = vld [vmem:[%s9765_s6 + $0xdf0] sm:$0xff]  ;;  %v778_v19 = vld [vmem:[%s9765_s6 + $0xdb8] sm:$0xff] }
 0x32b   : > { %v786_v20 = vld [vmem:[%s9765_s6 + $0xdf8] sm:$0xff]  ;;  %v8431_v23 = vcombine.high %v777_v18, %v785_v22  ;;  %v8430_v31 = vcombine.low %v777_v18, %v785_v22 }
 0x32c   : > { %v8433_v24 = vcombine.high %v778_v19, %v786_v20  ;;  %v8432_v32 = vcombine.low %v778_v19, %v786_v20 }
 0x32d   : > { %6189 = vmatpush1.bf16.msra.mxu0 %v8318_v27  ;;  %6353 = vmatpush1.bf16.msra.mxu1 %v8320_v28  ;;  %v793_v27 = vld [vmem:[%s9765_s6 + $0xe30] sm:$0xff] }
 0x32e   : > { %6190 = vmatprep.subr.bf16.mxu0 %v8335_v29  ;;  %6354 = vmatprep.subr.bf16.mxu1 %v8337_v30  ;;  %v801_v28 = vld [vmem:[%s9765_s6 + $0xe70] sm:$0xff]  ;;  %v794_v29 = vld [vmem:[%s9765_s6 + $0xe38] sm:$0xff] }
 0x32f   : > { %v802_v30 = vld [vmem:[%s9765_s6 + $0xe78] sm:$0xff]  ;;  %v8447_v33 = vcombine.high %v793_v27, %v801_v28  ;;  %v8446_v43 = vcombine.low %v793_v27, %v801_v28 }
 0x330   : > { %v8449_v36 = vcombine.high %v794_v29, %v802_v30  ;;  %v8448_v44 = vcombine.low %v794_v29, %v802_v30 }
 0x331   : > { %6191 = vmatpush1.bf16.msra.mxu0 %v8334_v37  ;;  %6355 = vmatpush1.bf16.msra.mxu1 %v8336_v38  ;;  %v809_v37 = vld [vmem:[%s9765_s6 + $0xeb0] sm:$0xff] }
 0x332   : > { %6192 = vmatprep.subr.bf16.mxu0 %v8351_v41  ;;  %6356 = vmatprep.subr.bf16.mxu1 %v8353_v58  ;;  %v817_v38 = vld [vmem:[%s9765_s6 + $0xef0] sm:$0xff]  ;;  %v810_v41 = vld [vmem:[%s9765_s6 + $0xeb8] sm:$0xff] }
 0x333   : > { %v818_v58 = vld [vmem:[%s9765_s6 + $0xef8] sm:$0xff]  ;;  %v8463_v45 = vcombine.high %v809_v37, %v817_v38  ;;  %v8462_v51 = vcombine.low %v809_v37, %v817_v38 }
 0x334   : > { %v8465_v46 = vcombine.high %v810_v41, %v818_v58  ;;  %v8464_v52 = vcombine.low %v810_v41, %v818_v58  ;;  %v921_v58 = vld [vmem:[%s9765_s6 + $0x1230] sm:$0xff] }
 0x335   : > { %6193 = vmatpush1.bf16.msra.mxu0 %v8350_v47  ;;  %6357 = vmatpush1.bf16.msra.mxu1 %v8352_v48  ;;  %v825_v47 = vld [vmem:[%s9765_s6 + $0xf30] sm:$0xff] }
 0x336   : > { %6194 = vmatprep.subr.bf16.mxu0 %v8367_v49  ;;  %6358 = vmatprep.subr.bf16.mxu1 %v8369_v50  ;;  %v833_v48 = vld [vmem:[%s9765_s6 + $0xf70] sm:$0xff]  ;;  %v826_v49 = vld [vmem:[%s9765_s6 + $0xf38] sm:$0xff] }
 0x337   : > { %v834_v50 = vld [vmem:[%s9765_s6 + $0xf78] sm:$0xff]  ;;  %v8479_v53 = vcombine.high %v825_v47, %v833_v48  ;;  %v8478_v61 = vcombine.low %v825_v47, %v833_v48 }
 0x338   : > { %v8481_v55 = vcombine.high %v826_v49, %v834_v50  ;;  %v8480_v62 = vcombine.low %v826_v49, %v834_v50  ;;  %v937_v49 = vld [vmem:[%s9765_s6 + $0x12b0] sm:$0xff] }
 0x339   : > { %6195 = vmatpush1.bf16.msra.mxu0 %v8366_v56  ;;  %6359 = vmatpush1.bf16.msra.mxu1 %v8368_v57  ;;  %v841_v56 = vld [vmem:[%s9765_s6 + $0xfb0] sm:$0xff] }
 0x33a   : > { %6196 = vmatprep.subr.bf16.mxu0 %v8383_v59  ;;  %6360 = vmatprep.subr.bf16.mxu1 %v8385_v60  ;;  %v849_v57 = vld [vmem:[%s9765_s6 + $0xff0] sm:$0xff]  ;;  %v842_v59 = vld [vmem:[%s9765_s6 + $0xfb8] sm:$0xff] }
 0x33b   : > { %v850_v60 = vld [vmem:[%s9765_s6 + $0xff8] sm:$0xff]  ;;  %v8495_v63 = vcombine.high %v841_v56, %v849_v57  ;;  %v8494_v13 = vcombine.low %v841_v56, %v849_v57  ;;  %v945_v50 = vld [vmem:[%s9765_s6 + $0x12f0] sm:$0xff] }
 0x33c   : > { %v8497_v1 = vcombine.high %v842_v59, %v850_v60  ;;  %v8496_v9 = vcombine.low %v842_v59, %v850_v60  ;;  %v8591_v56 = vcombine.high %v937_v49, %v945_v50  ;;  %v953_v59 = vld [vmem:[%s9765_s6 + $0x1330] sm:$0xff] }
 0x33d   : > { %6197 = vmatpush1.bf16.msra.mxu0 %v8382_v2  ;;  %6361 = vmatpush1.bf16.msra.mxu1 %v8384_v3  ;;  %v857_v2 = vld [vmem:[%s9765_s6 + $0x1030] sm:$0xff] }
 0x33e   : > { %6198 = vmatprep.subr.bf16.mxu0 %v8399_v6  ;;  %6362 = vmatprep.subr.bf16.mxu1 %v8401_v7  ;;  %v865_v3 = vld [vmem:[%s9765_s6 + $0x1070] sm:$0xff]  ;;  %v858_v6 = vld [vmem:[%s9765_s6 + $0x1038] sm:$0xff] }
 0x33f   : > { %v866_v7 = vld [vmem:[%s9765_s6 + $0x1078] sm:$0xff]  ;;  %v8511_v10 = vcombine.high %v857_v2, %v865_v3  ;;  %v8510_v18 = vcombine.low %v857_v2, %v865_v3  ;;  %v961_v60 = vld [vmem:[%s9765_s6 + $0x1370] sm:$0xff] }
 0x340   : > { %v8513_v11 = vcombine.high %v858_v6, %v866_v7  ;;  %v8512_v22 = vcombine.low %v858_v6, %v866_v7  ;;  %v8607_v2 = vcombine.high %v953_v59, %v961_v60  ;;  %v969_v6 = vld [vmem:[%s9765_s6 + $0x13b0] sm:$0xff] }
 0x341   : > { %6199 = vmatpush1.bf16.msra.mxu0 %v8398_v12  ;;  %6363 = vmatpush1.bf16.msra.mxu1 %v8400_v14  ;;  %v873_v12 = vld [vmem:[%s9765_s6 + $0x10b0] sm:$0xff] }
 0x342   : > { %6200 = vmatprep.subr.bf16.mxu0 %v8415_v15  ;;  %6364 = vmatprep.subr.bf16.mxu1 %v8417_v17  ;;  %v881_v14 = vld [vmem:[%s9765_s6 + $0x10f0] sm:$0xff]  ;;  %v874_v15 = vld [vmem:[%s9765_s6 + $0x10b8] sm:$0xff] }
 0x343   : > { %v882_v17 = vld [vmem:[%s9765_s6 + $0x10f8] sm:$0xff]  ;;  %v8527_v19 = vcombine.high %v873_v12, %v881_v14  ;;  %v8526_v27 = vcombine.low %v873_v12, %v881_v14  ;;  %v977_v7 = vld [vmem:[%s9765_s6 + $0x13f0] sm:$0xff] }
 0x344   : > { %v8529_v20 = vcombine.high %v874_v15, %v882_v17  ;;  %v8528_v28 = vcombine.low %v874_v15, %v882_v17  ;;  %v8623_v12 = vcombine.high %v969_v6, %v977_v7  ;;  %v985_v15 = vld [vmem:[%s9765_s6 + $0x1430] sm:$0xff] }
 0x345   : > { %6201 = vmatpush1.bf16.msra.mxu0 %v8414_v21  ;;  %6365 = vmatpush1.bf16.msra.mxu1 %v8416_v54  ;;  %v889_v21 = vld [vmem:[%s9765_s6 + $0x1130] sm:$0xff] }
 0x346   : > { %6202 = vmatprep.subr.bf16.mxu0 %v8431_v23  ;;  %6366 = vmatprep.subr.bf16.mxu1 %v8433_v24  ;;  %v897_v54 = vld [vmem:[%s9765_s6 + $0x1170] sm:$0xff]  ;;  %v890_v23 = vld [vmem:[%s9765_s6 + $0x1138] sm:$0xff] }
 0x347   : > { %v898_v24 = vld [vmem:[%s9765_s6 + $0x1178] sm:$0xff]  ;;  %v8543_v29 = vcombine.high %v889_v21, %v897_v54  ;;  %v993_v17 = vld [vmem:[%s9765_s6 + $0x1470] sm:$0xff] }
 0x348   : > { %v8545_v30 = vcombine.high %v890_v23, %v898_v24  ;;  %v8544_v37 = vcombine.low %v890_v23, %v898_v24  ;;  %v1001_v23 = vld [vmem:[%s9765_s6 + $0x14b0] sm:$0xff] }
 0x349   : > { %6203 = vmatpush1.bf16.msra.mxu0 %v8430_v31  ;;  %6367 = vmatpush1.bf16.msra.mxu1 %v8432_v32  ;;  %v905_v31 = vld [vmem:[%s9765_s6 + $0x11b0] sm:$0xff] }
 0x34a   : > { %6204 = vmatprep.subr.bf16.mxu0 %v8447_v33  ;;  %6368 = vmatprep.subr.bf16.mxu1 %v8449_v36  ;;  %v913_v32 = vld [vmem:[%s9765_s6 + $0x11f0] sm:$0xff]  ;;  %v906_v33 = vld [vmem:[%s9765_s6 + $0x11b8] sm:$0xff] }
 0x34b   : > { %v914_v36 = vld [vmem:[%s9765_s6 + $0x11f8] sm:$0xff]  ;;  %v8559_v38 = vcombine.high %v905_v31, %v913_v32  ;;  %v1009_v24 = vld [vmem:[%s9765_s6 + $0x14f0] sm:$0xff] }
 0x34c   : > { %v8561_v41 = vcombine.high %v906_v33, %v914_v36 }
 0x34d   : > { %6205 = vmatpush1.bf16.msra.mxu0 %v8446_v43  ;;  %6369 = vmatpush1.bf16.msra.mxu1 %v8448_v44  ;;  %v929_v43 = vld [vmem:[%s9765_s6 + $0x1270] sm:$0xff]  ;;  %v922_v44 = vld [vmem:[%s9765_s6 + $0x1238] sm:$0xff] }
 0x34e   : > { %6206 = vmatprep.subr.bf16.mxu0 %v8463_v45  ;;  %6370 = vmatprep.subr.bf16.mxu1 %v8465_v46  ;;  %v930_v45 = vld [vmem:[%s9765_s6 + $0x1278] sm:$0xff]  ;;  %v8558_v46 = vcombine.low %v905_v31, %v913_v32  ;;  %v8575_v47 = vcombine.high %v921_v58, %v929_v43  ;;  %v8655_v31 = vcombine.high %v1001_v23, %v1009_v24 }
 0x34f   : > { %v8577_v48 = vcombine.high %v922_v44, %v930_v45 }
 0x351   : > { %6207 = vmatpush1.bf16.msra.mxu0 %v8462_v51  ;;  %6371 = vmatpush1.bf16.msra.mxu1 %v8464_v52  ;;  %v938_v51 = vld [vmem:[%s9765_s6 + $0x12b8] sm:$0xff] }
 0x352   : > { %6208 = vmatprep.subr.bf16.mxu0 %v8479_v53  ;;  %6372 = vmatprep.subr.bf16.mxu1 %v8481_v55  ;;  %v946_v52 = vld [vmem:[%s9765_s6 + $0x12f8] sm:$0xff]  ;;  %v8574_v53 = vcombine.low %v921_v58, %v929_v43  ;;  %v8576_v55 = vcombine.low %v922_v44, %v930_v45  ;;  %v1033_v44 = vld [vmem:[%s9765_s6 + $0x15b0] sm:$0xff] }
 0x353   : > { %v8593_v57 = vcombine.high %v938_v51, %v946_v52  ;;  %v1041_v45 = vld [vmem:[%s9765_s6 + $0x15f0] sm:$0xff] }
 0x355   : > { %6209 = vmatpush1.bf16.msra.mxu0 %v8478_v61  ;;  %6373 = vmatpush1.bf16.msra.mxu1 %v8480_v62  ;;  %v954_v61 = vld [vmem:[%s9765_s6 + $0x1338] sm:$0xff] }
 0x356   : > { %6210 = vmatprep.subr.bf16.mxu0 %v8495_v63  ;;  %6374 = vmatprep.subr.bf16.mxu1 %v8497_v1  ;;  %v962_v62 = vld [vmem:[%s9765_s6 + $0x1378] sm:$0xff]  ;;  %v8590_v63 = vcombine.low %v937_v49, %v945_v50  ;;  %v8592_v1 = vcombine.low %v938_v51, %v946_v52  ;;  %v8687_v49 = vcombine.high %v1033_v44, %v1041_v45  ;;  %v1049_v51 = vld [vmem:[%s9765_s6 + $0x1630] sm:$0xff] }
 0x357   : > { %v8609_v3 = vcombine.high %v954_v61, %v962_v62  ;;  %v1057_v52 = vld [vmem:[%s9765_s6 + $0x1670] sm:$0xff] }
 0x359   : > { %6211 = vmatpush1.bf16.msra.mxu0 %v8494_v13  ;;  %6375 = vmatpush1.bf16.msra.mxu1 %v8496_v9  ;;  %v970_v13 = vld [vmem:[%s9765_s6 + $0x13b8] sm:$0xff] }
 0x35a   : > { %6221 = vmatprep.subr.bf16.mxu0 %v8511_v10  ;;  %6385 = vmatprep.subr.bf16.mxu1 %v8513_v11  ;;  %v978_v9 = vld [vmem:[%s9765_s6 + $0x13f8] sm:$0xff]  ;;  %v8606_v10 = vcombine.low %v953_v59, %v961_v60  ;;  %v8608_v11 = vcombine.low %v954_v61, %v962_v62  ;;  %v8703_v59 = vcombine.high %v1049_v51, %v1057_v52  ;;  %v1065_v61 = vld [vmem:[%s9765_s6 + $0x16b0] sm:$0xff] }
 0x35b   : > { %v8625_v14 = vcombine.high %v970_v13, %v978_v9  ;;  %v1073_v62 = vld [vmem:[%s9765_s6 + $0x16f0] sm:$0xff] }
 0x35c   : > { %6213 = vmatmul.mubr.bf16.vlgmr.msra.gmra.mrb[12].mxu0 %v9956_v26  ;;  %6377 = vmatmul.mubr.bf16.vlgmr.msra.gmra.mrb[12].mxu1 %v9956_v26  ;;  %v8542_v26 = vcombine.low %v889_v21, %v897_v54  ;;  %v8639_v21 = vcombine.high %v985_v15, %v993_v17 }
 0x35d   : > { %6222 = vmatpush1.bf16.msra.mxu0 %v8510_v18  ;;  %6386 = vmatpush1.bf16.msra.mxu1 %v8512_v22  ;;  %v986_v18 = vld [vmem:[%s9765_s6 + $0x1438] sm:$0xff] }
 0x35e   : > { %6223 = vmatprep.subr.bf16.mxu0 %v8527_v19  ;;  %6387 = vmatprep.subr.bf16.mxu1 %v8529_v20  ;;  %v994_v22 = vld [vmem:[%s9765_s6 + $0x1478] sm:$0xff]  ;;  %v8622_v19 = vcombine.low %v969_v6, %v977_v7  ;;  %v8624_v20 = vcombine.low %v970_v13, %v978_v9  ;;  %v8719_v6 = vcombine.high %v1065_v61, %v1073_v62  ;;  %v1081_v13 = vld [vmem:[%s9765_s6 + $0x1730] sm:$0xff] }
 0x35f   : > { %6253 = vmatprep.mubr.bf16.mxu0 %v9964_v16  ;;  %6417 = vmatprep.mubr.bf16.mxu1 %v9964_v16  ;;  %v8560_v16 = vcombine.low %v906_v33, %v914_v36  ;;  %v8641_v54 = vcombine.high %v986_v18, %v994_v22  ;;  %v1017_v33 = vld [vmem:[%s9765_s6 + $0x1530] sm:$0xff] }
 0x360   : > { %v1025_v36 = vld [vmem:[%s9765_s6 + $0x1570] sm:$0xff] }
 0x361   : > { %6224 = vmatpush1.bf16.msra.mxu0 %v8526_v27  ;;  %6388 = vmatpush1.bf16.msra.mxu1 %v8528_v28  ;;  %v1002_v27 = vld [vmem:[%s9765_s6 + $0x14b8] sm:$0xff]  ;;  %v8671_v58 = vcombine.high %v1017_v33, %v1025_v36  ;;  %v1089_v9 = vld [vmem:[%s9765_s6 + $0x1770] sm:$0xff] }
 0x362   : > { %6225 = vmatprep.subr.bf16.mxu0 %v8543_v29  ;;  %6389 = vmatprep.subr.bf16.mxu1 %v8545_v30  ;;  %v1010_v28 = vld [vmem:[%s9765_s6 + $0x14f8] sm:$0xff]  ;;  %v8638_v29 = vcombine.low %v985_v15, %v993_v17  ;;  %v8640_v30 = vcombine.low %v986_v18, %v994_v22  ;;  %v8735_v15 = vcombine.high %v1081_v13, %v1089_v9  ;;  %v1097_v18 = vld [vmem:[%s9765_s6 + $0x17b0] sm:$0xff] }
 0x363   : > { %v8657_v32 = vcombine.high %v1002_v27, %v1010_v28  ;;  %v1105_v22 = vld [vmem:[%s9765_s6 + $0x17f0] sm:$0xff] }
 0x365   : > { %6226 = vmatpush1.bf16.msra.mxu0 %v8542_v26  ;;  %6390 = vmatpush1.bf16.msra.mxu1 %v8544_v37  ;;  %v1018_v26 = vld [vmem:[%s9765_s6 + $0x1538] sm:$0xff] }
 0x366   : > { %6227 = vmatprep.subr.bf16.mxu0 %v8559_v38  ;;  %6391 = vmatprep.subr.bf16.mxu1 %v8561_v41  ;;  %v1026_v37 = vld [vmem:[%s9765_s6 + $0x1578] sm:$0xff]  ;;  %v8654_v38 = vcombine.low %v1001_v23, %v1009_v24  ;;  %v8656_v41 = vcombine.low %v1002_v27, %v1010_v28  ;;  %v8751_v24 = vcombine.high %v1097_v18, %v1105_v22  ;;  %v1113_v28 = vld [vmem:[%s9765_s6 + $0x1830] sm:$0xff] }
 0x367   : > { %v8673_v43 = vcombine.high %v1018_v26, %v1026_v37 }
 0x369   : > { %6228 = vmatpush1.bf16.msra.mxu0 %v8558_v46  ;;  %6392 = vmatpush1.bf16.msra.mxu1 %v8560_v16  ;;  %v1034_v46 = vld [vmem:[%s9765_s6 + $0x15b8] sm:$0xff] }
 0x36a   : > { %6229 = vmatprep.subr.bf16.mxu0 %v8575_v47  ;;  %6393 = vmatprep.subr.bf16.mxu1 %v8577_v48  ;;  %v1042_v16 = vld [vmem:[%s9765_s6 + $0x15f8] sm:$0xff]  ;;  %v8670_v47 = vcombine.low %v1017_v33, %v1025_v36  ;;  %v8672_v48 = vcombine.low %v1018_v26, %v1026_v37  ;;  %v8750_v33 = vcombine.low %v1097_v18, %v1105_v22 }
 0x36b   : > { %v8689_v50 = vcombine.high %v1034_v46, %v1042_v16 }
 0x36d   : > { %6230 = vmatpush1.bf16.msra.mxu0 %v8574_v53  ;;  %6394 = vmatpush1.bf16.msra.mxu1 %v8576_v55  ;;  %v1050_v53 = vld [vmem:[%s9765_s6 + $0x1638] sm:$0xff] }
 0x36e   : > { %6231 = vmatprep.subr.bf16.mxu0 %v8591_v56  ;;  %6395 = vmatprep.subr.bf16.mxu1 %v8593_v57  ;;  %v1058_v55 = vld [vmem:[%s9765_s6 + $0x1678] sm:$0xff]  ;;  %v8686_v56 = vcombine.low %v1033_v44, %v1041_v45  ;;  %v8688_v57 = vcombine.low %v1034_v46, %v1042_v16  ;;  %v9279_v45 = vld [vmem:[%s9779_s29 + $0x40] sm:$0xff]  }
 0x36f   : > { %v8705_v60 = vcombine.high %v1050_v53, %v1058_v55  ;;  %v9280_v16 = vld [vmem:[%s9779_s29 + $0xc0] sm:$0xff]  }
 0x371   : > { %6232 = vmatpush1.bf16.msra.mxu0 %v8590_v63  ;;  %6396 = vmatpush1.bf16.msra.mxu1 %v8592_v1  ;;  %v1066_v63 = vld [vmem:[%s9765_s6 + $0x16b8] sm:$0xff] }
 0x372   : > { %6233 = vmatprep.subr.bf16.mxu0 %v8607_v2  ;;  %6397 = vmatprep.subr.bf16.mxu1 %v8609_v3  ;;  %v1074_v1 = vld [vmem:[%s9765_s6 + $0x16f8] sm:$0xff]  ;;  %v8702_v2 = vcombine.low %v1049_v51, %v1057_v52  ;;  %v8704_v3 = vcombine.low %v1050_v53, %v1058_v55  ;;  %v9281_v52 = vld [vmem:[%s9779_s29] sm:$0xff]   ;;  %v9283_v53 = vld [vmem:[%s9779_s29 + $0x48] sm:$0xff]  }
 0x373   : > { %v8721_v7 = vcombine.high %v1066_v63, %v1074_v1 }
 0x375   : > { %6234 = vmatpush1.bf16.msra.mxu0 %v8606_v10  ;;  %6398 = vmatpush1.bf16.msra.mxu1 %v8608_v11  ;;  %v1082_v10 = vld [vmem:[%s9765_s6 + $0x1738] sm:$0xff] }
 0x376   : > { %6235 = vmatprep.subr.bf16.mxu0 %v8623_v12  ;;  %6399 = vmatprep.subr.bf16.mxu1 %v8625_v14  ;;  %v1090_v11 = vld [vmem:[%s9765_s6 + $0x1778] sm:$0xff]  ;;  %v8718_v12 = vcombine.low %v1065_v61, %v1073_v62  ;;  %v8720_v14 = vcombine.low %v1066_v63, %v1074_v1  ;;  %v9287_v61 = vld [vmem:[%s9779_s29 + $0x50] sm:$0xff]  }
 0x377   : > { %v8737_v17 = vcombine.high %v1082_v10, %v1090_v11  ;;  %v8736_v23 = vcombine.low %v1082_v10, %v1090_v11  ;;  %v9288_v63 = vld [vmem:[%s9779_s29 + $0xd0] sm:$0xff]   ;;  %v9292_v11 = vld [vmem:[%s9779_s29 + $0xd8] sm:$0xff]  }
 0x379   : > { %6236 = vmatpush1.bf16.msra.mxu0 %v8622_v19  ;;  %6400 = vmatpush1.bf16.msra.mxu1 %v8624_v20  ;;  %v1127_v19 = vlaneseq  ;;  %v1098_v20 = vld [vmem:[%s9765_s6 + $0x17b8] sm:$0xff] }
 0x37a   : > { %6237 = vmatprep.subr.bf16.mxu0 %v8639_v21  ;;  %6401 = vmatprep.subr.bf16.mxu1 %v8641_v54  ;;  %v1106_v21 = vld [vmem:[%s9765_s6 + $0x17f8] sm:$0xff]  ;;  %v8734_v54 = vcombine.low %v1081_v13, %v1089_v9 }
 0x37b   : > { %v8753_v27 = vcombine.high %v1098_v20, %v1106_v21  ;;  %v8752_v36 = vcombine.low %v1098_v20, %v1106_v21  ;;  %v9291_v9 = vld [vmem:[%s9779_s29 + $0x58] sm:$0xff]  }
 0x37c   : > { %v9293_v20 = vld [vmem:[%s9779_s29 + $0x18] sm:$0xff]  }
 0x37d   : > { %6238 = vmatpush1.bf16.msra.mxu0 %v8638_v29  ;;  %6402 = vmatpush1.bf16.msra.mxu1 %v8640_v30  ;;  %v1121_v29 = vld [vmem:[%s9765_s6 + $0x1870] sm:$0xff]  ;;  %v10689_v30 = vshrl.u32 %v1127_v19, 7 }
 0x37e   : > { %6239 = vmatprep.subr.bf16.mxu0 %v8655_v31  ;;  %6403 = vmatprep.subr.bf16.mxu1 %v8657_v32  ;;  %v1114_v31 = vld [vmem:[%s9765_s6 + $0x1838] sm:$0xff]  ;;  %v8767_v26 = vcombine.high %v1113_v28, %v1121_v29 }
 0x37f   : > { %v1122_v32 = vld [vmem:[%s9765_s6 + $0x1878] sm:$0xff]  ;;  %v1137_v62 = vsub.s32 2, %v10689_v30 }
 0x380   : > { %v8769_v37 = vcombine.high %v1114_v31, %v1122_v32  ;;  %v8768_v44 = vcombine.low %v1114_v31, %v1122_v32  ;;  %v9297_v31 = vld [vmem:[%s9779_s29 + $0x20] sm:$0xff]  }
 0x381   : > { %6240 = vmatpush1.bf16.msra.mxu0 %v8654_v38  ;;  %6404 = vmatpush1.bf16.msra.mxu1 %v8656_v41  ;;  %v1133_v38 = vsub.s32 1, %v10689_v30  ;;  %v10695_v41 = vld [vmem:[%s9773_s13] sm:$0xff] }
 0x382   : > { %6241 = vmatprep.subr.bf16.mxu0 %v8671_v58  ;;  %6405 = vmatprep.subr.bf16.mxu1 %v8673_v43  ;;  %v1141_v58 = vsub.s32 3, %v10689_v30  ;;  %v8766_v43 = vcombine.low %v1113_v28, %v1121_v29  ;;  %v9296_v29 = vld [vmem:[%s9779_s29 + $0xe0] sm:$0xff]  }
 0x383   : > { %v1134_v46 = vrot.slane %v10695_v41, %v1133_v38  ;;  %v9298_v32 = vld [vmem:[%s9779_s29 + $0xa0] sm:$0xff]  }
 0x385   : > { %6242 = vmatpush1.bf16.msra.mxu0 %v8670_v47  ;;  %6406 = vmatpush1.bf16.msra.mxu1 %v8672_v48  ;;  %v1142_v47 = vrot.slane %v10695_v41, %v1141_v58  ;;  %v9088_v48 = vadd.f32 %v10278_v5, %v1134_v46  ;;  %v9284_v5 = vld [vmem:[%s9779_s29 + $0xc8] sm:$0xff]   ;;  %v9304_v46 = vld [vmem:[%s9779_s29 + $0xf0] sm:$0xff]  }
 0x386   : > { %6243 = vmatprep.subr.bf16.mxu0 %v8687_v49  ;;  %6407 = vmatprep.subr.bf16.mxu1 %v8689_v50 }
 0x387   : > { %v9090_v49 = vadd.f32 %v10282_v8, %v1142_v47  ;;  %v6468_v50 = vmax.f32 %v9088_v48, 0.0  ;;  %v9285_v8 = vld [vmem:[%s9779_s29 + $0x8] sm:$0xff]   ;;  %v9305_v48 = vld [vmem:[%s9779_s29 + $0x30] sm:$0xff]  }
 0x389   : > { %6244 = vmatpush1.bf16.msra.mxu0 %v8686_v56  ;;  %6408 = vmatpush1.bf16.msra.mxu1 %v8688_v57  ;;  %v6470_v51 = vmax.f32 %v9090_v49, 0.0  ;;  %v6485_v55 = vpack.c.bf16 %v6468_v50, %v6468_v50  ;;  %v10719_v57 = vld [vmem:[%s9773_s13 + $0x8] sm:$0xff]  ;;  %v9306_v50 = vld [vmem:[%s9779_s29 + $0xb0] sm:$0xff]  }
 0x38a   : > { %6245 = vmatprep.subr.bf16.mxu0 %v8703_v59  ;;  %6409 = vmatprep.subr.bf16.mxu1 %v8705_v60  ;;  %v1129_v59 = vsub.s32 0, %v10689_v30  ;;  %v9286_v60 = vld [vmem:[%s9779_s29 + $0x88] sm:$0xff]   ;;  %v1174_v13 = vrot.slane %v10719_v57, %v1141_v58 }
 0x38b   : > { %v6487_v56 = vpack.c.bf16 %v6470_v51, %v6470_v51  ;;  %v9307_v51 = vld [vmem:[%s9779_s29 + $0x78] sm:$0xff]  }
 0x38c   : > { %v1162_v1 = vrot.slane %v10719_v57, %v1129_v59  ;;  %v1130_v58 = vrot.slane %v10695_v41, %v1129_v59 }
 0x38d   : > { %6246 = vmatpush1.bf16.msra.mxu0 %v8702_v2  ;;  %6410 = vmatpush1.bf16.msra.mxu1 %v8704_v3  ;;  %v1170_v2 = vrot.slane %v10719_v57, %v1137_v62  ;;  %v9289_v3 = vld [vmem:[%s9779_s29 + $0x10] sm:$0xff]  }
 0x38e   : > { %6247 = vmatprep.subr.bf16.mxu0 %v8719_v6  ;;  %6411 = vmatprep.subr.bf16.mxu1 %v8721_v7  ;;  %v1166_v6 = vrot.slane %v10719_v57, %v1133_v38  ;;  %v9290_v7 = vld [vmem:[%s9779_s29 + $0x90] sm:$0xff]   ;;  %v9301_v38 = vld [vmem:[%s9779_s29 + $0x28] sm:$0xff]   ;;  %v9087_v49 = vadd.f32 %v10272_v0, %v1130_v58  ;;  %v9310_v0 = vld [vmem:[%s9779_s29 + $0xb8] sm:$0xff]  }
 0x391   : > { %6248 = vmatpush1.bf16.msra.mxu0 %v8718_v12  ;;  %6412 = vmatpush1.bf16.msra.mxu1 %v8720_v14 }
 0x392   : > { %6249 = vmatprep.subr.bf16.mxu0 %v8735_v15  ;;  %6413 = vmatprep.subr.bf16.mxu1 %v8737_v17 }
 0x395   : > { %6250 = vmatpush1.bf16.msra.mxu0 %v8734_v54  ;;  %6414 = vmatpush1.bf16.msra.mxu1 %v8736_v23 }
 0x396   : > { %6251 = vmatprep.subr.bf16.mxu0 %v8751_v24  ;;  %6415 = vmatprep.subr.bf16.mxu1 %v8753_v27  ;;  %v9294_v24 = vld [vmem:[%s9779_s29 + $0x98] sm:$0xff]   ;;  %v9295_v27 = vld [vmem:[%s9779_s29 + $0x60] sm:$0xff]  }
 0x399   : > { %6252 = vmatpush1.bf16.msra.mxu0 %v8750_v33  ;;  %6416 = vmatpush1.bf16.msra.mxu1 %v8752_v36  ;;  %v9299_v33 = vld [vmem:[%s9779_s29 + $0x68] sm:$0xff]  }
 0x39a   : > { %6262 = vmatprep.subr.bf16.mxu0 %v8767_v26  ;;  %6426 = vmatprep.subr.bf16.mxu1 %v8769_v37  ;;  %v9300_v36 = vld [vmem:[%s9779_s29 + $0xe8] sm:$0xff]   ;;  %v1149_v26 = vsub.s32 5, %v10689_v30  ;;  %v1157_v37 = vsub.s32 7, %v10689_v30 }
 0x39c   : > { %6254 = vmatmul.mubr.bf16.vlgmr.msra.gmra.mrb[12].mxu0 %v10028_v35  ;;  %6418 = vmatmul.mubr.bf16.vlgmr.msra.gmra.mrb[12].mxu1 %v10028_v35  ;;  %v9282_v35 = vld [vmem:[%s9779_s29 + $0x80] sm:$0xff]   ;;  %v1158_v47 = vrot.slane %v10695_v41, %v1157_v37 }
 0x39d   : > { %6263 = vmatpush1.bf16.msra.mxu0 %v8766_v43  ;;  %6427 = vmatpush1.bf16.msra.mxu1 %v8768_v44  ;;  %v9302_v43 = vld [vmem:[%s9779_s29 + $0xa8] sm:$0xff]   ;;  %v9303_v44 = vld [vmem:[%s9779_s29 + $0x70] sm:$0xff]  }
 0x39e   : > { %6294 = vmatprep.mubr.bf16.mxu0 %v9563_v25  ;;  %6458 = vmatprep.mubr.bf16.mxu1 %v9563_v25  ;;  %v9409_v25 = vld [vmem:[%s10920_s0 + $0x18] ss:$0 sps:$4 sm:$0xff]  }
 0x39f   : > { %8911 = vmatprep.subr.bf16.mxu0 %v9279_v45  ;;  %8933 = vmatprep.subr.bf16.mxu1 %v9280_v16  ;;  %v1138_v45 = vrot.slane %v10695_v41, %v1137_v62  ;;  %v1150_v16 = vrot.slane %v10695_v41, %v1149_v26 }
 0x3a8   : > { %8776 = vmatmul.mubr.msk.bf16.vlgmr.msra.gmra.mrb[12].mxu0 %vm5151_vm0, %v9409_v25  ;;  %8777 = vmatmul.mubr.msk.bf16.vlgmr.msra.gmra.mrb[12].mxu1 %vm5151_vm0, %v9409_v25  ;;  %v9309_v25 = vld [vmem:[%s9779_s29 + $0x38] sm:$0xff]  }
 0x3a9   : > { %8912 = vmatpush3.bf16.msra.mxu0 %v9281_v52  ;;  %8934 = vmatpush3.bf16.msra.mxu1 %v9282_v35  ;;  %v9089_v52 = vadd.f32 %v10276_v4, %v1138_v45  ;;  %v9308_v35 = vld [vmem:[%s9779_s29 + $0xf8] sm:$0xff]   ;;  %v9312_v4 = vld [vmem:[%s9779_s29 + $0x1c0] sm:$0xff]  }
 0x3aa   : > { %7556 = vmatprep.mubr.bf16.mxu0 %v6485_v55  ;;  %7596 = vmatprep.mubr.bf16.mxu1 %v6487_v56  ;;  %v9094_v55 = vadd.f32 %v10505_v42, %v1158_v47  ;;  %v9311_v56 = vld [vmem:[%s9779_s29 + $0x140] sm:$0xff]  }
 0x3ab   : > { %8913 = vmatprep.subr.bf16.mxu0 %v9283_v53  ;;  %8935 = vmatprep.subr.bf16.mxu1 %v9284_v5  ;;  %v9092_v53 = vadd.f32 %v10501_v40, %v1150_v16  ;;  %v6467_v5 = vmax.f32 %v9087_v49, 0.0  ;;  %v9313_v40 = vld [vmem:[%s9779_s29 + $0x100] sm:$0xff]   ;;  %v9339_v16 = vld [vmem:[%s9779_s29 + $0x178] sm:$0xff]  }
 0x3ac   : > { %v9314_v42 = vld [vmem:[%s9779_s29 + $0x180] sm:$0xff]  }
 0x3ad   : > { %8914 = vmatpush3.bf16.msra.mxu0 %v9285_v8  ;;  %8936 = vmatpush3.bf16.msra.mxu1 %v9286_v60  ;;  %v6469_v8 = vmax.f32 %v9089_v52, 0.0  ;;  %v6472_v59 = vmax.f32 %v9092_v53, 0.0  ;;  %v6474_v60 = vmax.f32 %v9094_v55, 0.0  ;;  %v9344_v52 = vld [vmem:[%s9779_s29 + $0x2c0] sm:$0xff]  }
 0x3ae   : > { %8915 = vmatprep.subr.bf16.mxu0 %v9287_v61  ;;  %8937 = vmatprep.subr.bf16.mxu1 %v9288_v63  ;;  %v6484_v61 = vpack.c.bf16 %v6467_v5, %v6467_v5  ;;  %v9315_v63 = vld [vmem:[%s9779_s29 + $0x148] sm:$0xff]   ;;  %v9345_v53 = vld [vmem:[%s9779_s29 + $0x200] sm:$0xff]  }
 0x3af   : > { %v5968_v10 = vpop.f32.mrb[8].mxu0  ;;  %v6132_v14 = vpop.f32.mrb[8].mxu1  ;;  %v6486_v62 = vpack.c.bf16 %v6469_v8, %v6469_v8  ;;  %v9348_v8 = vld [vmem:[%s9779_s29 + $0x2c8] sm:$0xff]  }
 0x3b0   : > { %v10734_v12 = vadd.f32 %v5968_v10, %v1162_v1  ;;  %v5970_v15 = vpop.f32.mrb[9].mxu0  ;;  %v10736_v17 = vadd.f32 %v6132_v14, %v1170_v2  ;;  %v6134_v22 = vpop.f32.mrb[9].mxu1  ;;  %v6489_v1 = vpack.c.bf16 %v6472_v59, %v6472_v59  ;;  %v9316_v2 = vld [vmem:[%s9779_s29 + $0x1c8] sm:$0xff]   ;;  %v9321_v10 = vld [vmem:[%s9779_s29 + $0x110] sm:$0xff]   ;;  %v9323_v14 = vld [vmem:[%s9779_s29 + $0x158] sm:$0xff]  }
 0x3b1   : > { %8916 = vmatpush3.bf16.msra.mxu0 %v9289_v3  ;;  %v10738_v18 = vadd.f32 %v5970_v15, %v1166_v6  ;;  %v5972_v19 = vpop.f32.mrb[10].mxu0  ;;  %8938 = vmatpush3.bf16.msra.mxu1 %v9290_v7  ;;  %v10741_v21 = vadd.f32 %v6134_v22, %v1174_v13  ;;  %v6136_v54 = vpop.f32.mrb[10].mxu1  ;;  %v6491_v3 = vpack.c.bf16 %v6474_v60, %v6474_v60  ;;  %v9317_v6 = vld [vmem:[%s9779_s29 + $0x108] sm:$0xff]   ;;  %v9319_v13 = vld [vmem:[%s9779_s29 + $0x150] sm:$0xff]   ;;  %v9324_v15 = vld [vmem:[%s9779_s29 + $0x1d8] sm:$0xff]  }
 0x3b2   : > { %v5973_v23 = vpop.f32.mrb[11].mxu0  ;;  %8917 = vmatprep.subr.bf16.mxu0 %v9291_v9  ;;  %v6137_v28 = vpop.f32.mrb[11].mxu1  ;;  %8939 = vmatprep.subr.bf16.mxu1 %v9292_v11  ;;  %v9318_v7 = vld [vmem:[%s9779_s29 + $0x188] sm:$0xff]   ;;  %v9320_v9 = vld [vmem:[%s9779_s29 + $0x1d0] sm:$0xff]   ;;  %v9325_v22 = vld [vmem:[%s9779_s29 + $0x118] sm:$0xff]  }
 0x3b3   : > { %v9322_v11 = vld [vmem:[%s9779_s29 + $0x190] sm:$0xff]   ;;  %v9326_v19 = vld [vmem:[%s9779_s29 + $0x198] sm:$0xff]   ;;  %v9328_v54 = vld [vmem:[%s9779_s29 + $0x1e0] sm:$0xff]  }
 0x3b4   : > { %v9329_v23 = vld [vmem:[%s9779_s29 + $0x120] sm:$0xff]   ;;  %v9331_v28 = vld [vmem:[%s9779_s29 + $0x168] sm:$0xff]   ;;  %v9351_v59 = vld [vmem:[%s9779_s29 + $0x250] sm:$0xff]  }
 0x3b5   : > { %8918 = vmatpush3.bf16.msra.mxu0 %v9293_v20  ;;  %8940 = vmatpush3.bf16.msra.mxu1 %v9294_v24  ;;  %v9327_v20 = vld [vmem:[%s9779_s29 + $0x160] sm:$0xff]   ;;  %v1145_v24 = vsub.s32 4, %v10689_v30  ;;  %v9352_v60 = vld [vmem:[%s9779_s29 + $0x2d0] sm:$0xff]  }
 0x3b6   : > { %8919 = vmatprep.subr.bf16.mxu0 %v9295_v27  ;;  %8941 = vmatprep.subr.bf16.mxu1 %v9296_v29  ;;  %v9330_v27 = vld [vmem:[%s9779_s29 + $0x1a0] sm:$0xff]   ;;  %v1153_v29 = vsub.s32 6, %v10689_v30 }
 0x3b8   : > { %v1154_v58 = vrot.slane %v10695_v41, %v1153_v29 }
 0x3b9   : > { %8920 = vmatpush3.bf16.msra.mxu0 %v9297_v31  ;;  %8942 = vmatpush3.bf16.msra.mxu1 %v9298_v32  ;;  %v9332_v31 = vld [vmem:[%s9779_s29 + $0x1e8] sm:$0xff]  }
 0x3ba   : > { %8921 = vmatprep.subr.bf16.mxu0 %v9299_v33  ;;  %8943 = vmatprep.subr.bf16.mxu1 %v9300_v36  ;;  %v9333_v32 = vld [vmem:[%s9779_s29 + $0x128] sm:$0xff]   ;;  %v1146_v33 = vrot.slane %v10695_v41, %v1145_v24  ;;  %v9093_v47 = vadd.f32 %v10499_v39, %v1154_v58  ;;  %v9341_v41 = vld [vmem:[%s9779_s29 + $0x138] sm:$0xff]   ;;  %v6478_v39 = vmax.f32 %v10741_v21, 0.0  ;;  %v9378_v58 = vld [vmem:[%s9779_s29 + $0x380] sm:$0xff]  }
 0x3bb   : > { %v9334_v36 = vld [vmem:[%s9779_s29 + $0x1a8] sm:$0xff]  }
 0x3bc   : > { %v9091_v45 = vadd.f32 %v10495_v34, %v1146_v33  ;;  %v6473_v34 = vmax.f32 %v9093_v47, 0.0  ;;  %v9349_v21 = vld [vmem:[%s9779_s29 + $0x208] sm:$0xff]   ;;  %v9376_v33 = vld [vmem:[%s9779_s29 + $0x3c0] sm:$0xff]   ;;  %v9385_v47 = vld [vmem:[%s9779_s29 + $0x310] sm:$0xff]  }
 0x3bd   : > { %8922 = vmatpush3.bf16.msra.mxu0 %v9301_v38  ;;  %8944 = vmatpush3.bf16.msra.mxu1 %v9302_v43  ;;  %v9335_v38 = vld [vmem:[%s9779_s29 + $0x170] sm:$0xff]  }
 0x3be   : > { %8923 = vmatprep.subr.bf16.mxu0 %v9303_v44  ;;  %8945 = vmatprep.subr.bf16.mxu1 %v9304_v46  ;;  %v9336_v43 = vld [vmem:[%s9779_s29 + $0x1f0] sm:$0xff]   ;;  %v6471_v49 = vmax.f32 %v9091_v45, 0.0  ;;  %v6490_v5 = vpack.c.bf16 %v6473_v34, %v6473_v34  ;;  %v9382_v45 = vld [vmem:[%s9779_s29 + $0x388] sm:$0xff]   ;;  %v9391_v34 = vld [vmem:[%s9779_s29 + $0x360] sm:$0xff]  }
 0x3bf   : > { %v9337_v44 = vld [vmem:[%s9779_s29 + $0x130] sm:$0xff]  }
 0x3c0   : > { %v9338_v46 = vld [vmem:[%s9779_s29 + $0x1b0] sm:$0xff]   ;;  %v6488_v55 = vpack.c.bf16 %v6471_v49, %v6471_v49  ;;  %v9388_v49 = vld [vmem:[%s9779_s29 + $0x3d8] sm:$0xff]  }
 0x3c1   : > { %8924 = vmatpush3.bf16.msra.mxu0 %v9305_v48  ;;  %8946 = vmatpush3.bf16.msra.mxu1 %v9306_v50  ;;  %v9340_v48 = vld [vmem:[%s9779_s29 + $0x1f8] sm:$0xff]  }
 0x3c2   : > { %8925 = vmatprep.subr.bf16.mxu0 %v9307_v51  ;;  %8947 = vmatprep.subr.bf16.mxu1 %v9308_v35  ;;  %v9342_v50 = vld [vmem:[%s9779_s29 + $0x1b8] sm:$0xff]   ;;  %v9343_v51 = vld [vmem:[%s9779_s29 + $0x240] sm:$0xff]   ;;  %v6476_v35 = vmax.f32 %v10738_v18, 0.0  ;;  %v6495_v18 = vpack.c.bf16 %v6478_v39, %v6478_v39 }
 0x3c3   : > { %v9394_v39 = vld [vmem:[%s9779_s29 + $0x3a0] sm:$0xff]  }
 0x3c5   : > { %8926 = vmatpush3.bf16.msra.mxu0 %v9309_v25  ;;  %8948 = vmatpush3.bf16.msra.mxu1 %v9310_v0  ;;  %v9346_v25 = vld [vmem:[%s9779_s29 + $0x280] sm:$0xff]   ;;  %v9347_v0 = vld [vmem:[%s9779_s29 + $0x248] sm:$0xff]  }
 0x3c6   : > { %8955 = vmatprep.subr.bf16.mxu0 %v9311_v56  ;;  %8977 = vmatprep.subr.bf16.mxu1 %v9312_v4  ;;  %v6493_v56 = vpack.c.bf16 %v6476_v35, %v6476_v35  ;;  %v9350_v4 = vld [vmem:[%s9779_s29 + $0x288] sm:$0xff]   ;;  %v9393_v35 = vld [vmem:[%s9779_s29 + $0x320] sm:$0xff]  }
 0x3c8   : > { %7557 = vmatmul.mubr.bf16.vlgmr.msra.gmra.mrb[16].mxu0 %v6484_v61  ;;  %7597 = vmatmul.mubr.bf16.vlgmr.msra.gmra.mrb[16].mxu1 %v6486_v62  ;;  %v9354_v61 = vld [vmem:[%s9779_s29 + $0x290] sm:$0xff]   ;;  %v9356_v62 = vld [vmem:[%s9779_s29 + $0x2d8] sm:$0xff]  }
 0x3c9   : > { %8956 = vmatpush3.bf16.msra.mxu0 %v9313_v40  ;;  %7636 = vmatprep.mubr.bf16.mxu0 %v6489_v1  ;;  %v9353_v40 = vld [vmem:[%s9779_s29 + $0x210] sm:$0xff]   ;;  %v9358_v1 = vld [vmem:[%s9779_s29 + $0x298] sm:$0xff]  }
 0x3ca   : > { %8978 = vmatpush3.bf16.msra.mxu1 %v9314_v42  ;;  %7676 = vmatprep.mubr.bf16.mxu1 %v6491_v3  ;;  %v9355_v42 = vld [vmem:[%s9779_s29 + $0x258] sm:$0xff]   ;;  %v9360_v3 = vld [vmem:[%s9779_s29 + $0x2e0] sm:$0xff]  }
 0x3cb   : > { %8957 = vmatprep.subr.bf16.mxu0 %v9315_v63  ;;  %8979 = vmatprep.subr.bf16.mxu1 %v9316_v2  ;;  %v9357_v63 = vld [vmem:[%s9779_s29 + $0x218] sm:$0xff]   ;;  %v9359_v2 = vld [vmem:[%s9779_s29 + $0x260] sm:$0xff]  }
 0x3cd   : > { %8958 = vmatpush3.bf16.msra.mxu0 %v9317_v6  ;;  %v9361_v6 = vld [vmem:[%s9779_s29 + $0x220] sm:$0xff]  }
 0x3ce   : > { %8980 = vmatpush3.bf16.msra.mxu1 %v9318_v7  ;;  %8959 = vmatprep.subr.bf16.mxu0 %v9319_v13  ;;  %v9362_v7 = vld [vmem:[%s9779_s29 + $0x2a0] sm:$0xff]   ;;  %v9363_v13 = vld [vmem:[%s9779_s29 + $0x268] sm:$0xff]  }
 0x3cf   : > { %8981 = vmatprep.subr.bf16.mxu1 %v9320_v9  ;;  %v9364_v9 = vld [vmem:[%s9779_s29 + $0x2e8] sm:$0xff]  }
 0x3d1   : > { %8960 = vmatpush3.bf16.msra.mxu0 %v9321_v10  ;;  %v9365_v10 = vld [vmem:[%s9779_s29 + $0x228] sm:$0xff]  }
 0x3d2   : > { %8982 = vmatpush3.bf16.msra.mxu1 %v9322_v11  ;;  %8961 = vmatprep.subr.bf16.mxu0 %v9323_v14  ;;  %v9366_v11 = vld [vmem:[%s9779_s29 + $0x2a8] sm:$0xff]   ;;  %v9367_v14 = vld [vmem:[%s9779_s29 + $0x270] sm:$0xff]  }
 0x3d3   : > { %8983 = vmatprep.subr.bf16.mxu1 %v9324_v15  ;;  %v9368_v15 = vld [vmem:[%s9779_s29 + $0x2f0] sm:$0xff]  }
 0x3d5   : > { %8962 = vmatpush3.bf16.msra.mxu0 %v9325_v22  ;;  %v9369_v22 = vld [vmem:[%s9779_s29 + $0x230] sm:$0xff]  }
 0x3d6   : > { %8984 = vmatpush3.bf16.msra.mxu1 %v9326_v19  ;;  %8963 = vmatprep.subr.bf16.mxu0 %v9327_v20  ;;  %v9370_v19 = vld [vmem:[%s9779_s29 + $0x2b0] sm:$0xff]   ;;  %v9371_v20 = vld [vmem:[%s9779_s29 + $0x278] sm:$0xff]  }
 0x3d7   : > { %8985 = vmatprep.subr.bf16.mxu1 %v9328_v54  ;;  %v9372_v54 = vld [vmem:[%s9779_s29 + $0x2f8] sm:$0xff]  }
 0x3d9   : > { %8964 = vmatpush3.bf16.msra.mxu0 %v9329_v23  ;;  %v9373_v23 = vld [vmem:[%s9779_s29 + $0x238] sm:$0xff]  }
 0x3da   : > { %8986 = vmatpush3.bf16.msra.mxu1 %v9330_v27  ;;  %8965 = vmatprep.subr.bf16.mxu0 %v9331_v28  ;;  %v6475_v27 = vmax.f32 %v10734_v12, 0.0  ;;  %v9374_v28 = vld [vmem:[%s9779_s29 + $0x2b8] sm:$0xff]   ;;  %v9379_v12 = vld [vmem:[%s9779_s29 + $0x348] sm:$0xff]  }
 0x3db   : > { %8987 = vmatprep.subr.bf16.mxu1 %v9332_v31  ;;  %v9375_v31 = vld [vmem:[%s9779_s29 + $0x340] sm:$0xff]  }
 0x3dd   : > { %8966 = vmatpush3.bf16.msra.mxu0 %v9333_v32  ;;  %v6477_v32 = vmax.f32 %v10736_v17, 0.0  ;;  %v9381_v17 = vld [vmem:[%s9779_s29 + $0x308] sm:$0xff]  }
 0x3de   : > { %8988 = vmatpush3.bf16.msra.mxu1 %v9334_v36  ;;  %8967 = vmatprep.subr.bf16.mxu0 %v9335_v38  ;;  %v9377_v36 = vld [vmem:[%s9779_s29 + $0x300] sm:$0xff]   ;;  %v6492_v38 = vpack.c.bf16 %v6475_v27, %v6475_v27 }
 0x3df   : > { %8989 = vmatprep.subr.bf16.mxu1 %v9336_v43  ;;  %v6494_v43 = vpack.c.bf16 %v6477_v32, %v6477_v32 }
 0x3e1   : > { %8968 = vmatpush3.bf16.msra.mxu0 %v9337_v44  ;;  %v9380_v44 = vld [vmem:[%s9779_s29 + $0x3c8] sm:$0xff]  }
 0x3e2   : > { %8990 = vmatpush3.bf16.msra.mxu1 %v9338_v46  ;;  %8969 = vmatprep.subr.bf16.mxu0 %v9339_v16  ;;  %v9383_v46 = vld [vmem:[%s9779_s29 + $0x350] sm:$0xff]  }
 0x3e3   : > { %8991 = vmatprep.subr.bf16.mxu1 %v9340_v48  ;;  %v9384_v16 = vld [vmem:[%s9779_s29 + $0x3d0] sm:$0xff]  }
 0x3e4   : > { %v9386_v48 = vld [vmem:[%s9779_s29 + $0x390] sm:$0xff]  }
 0x3e5   : > { %8970 = vmatpush3.bf16.msra.mxu0 %v9341_v41  ;;  %v9387_v41 = vld [vmem:[%s9779_s29 + $0x358] sm:$0xff]  }
 0x3e6   : > { %8992 = vmatpush3.bf16.msra.mxu1 %v9342_v50  ;;  %8999 = vmatprep.subr.bf16.mxu0 %v9343_v51  ;;  %v9389_v50 = vld [vmem:[%s9779_s29 + $0x318] sm:$0xff]  }
 0x3e7   : > { %9021 = vmatprep.subr.bf16.mxu1 %v9344_v52  ;;  %v9390_v51 = vld [vmem:[%s9779_s29 + $0x398] sm:$0xff]   ;;  %v9392_v52 = vld [vmem:[%s9779_s29 + $0x3e0] sm:$0xff]  }
 0x3e8   : > { %7637 = vmatmul.mubr.bf16.vlgmr.msra.gmra.mrb[20].mxu0 %v6488_v55  ;;  %v9396_v55 = vld [vmem:[%s9779_s29 + $0x3e8] sm:$0xff]  }
 0x3e9   : > { %7677 = vmatmul.mubr.bf16.vlgmr.msra.gmra.mrb[20].mxu1 %v6490_v5  ;;  %9000 = vmatpush3.bf16.msra.mxu0 %v9345_v53  ;;  %v9395_v53 = vld [vmem:[%s9779_s29 + $0x368] sm:$0xff]  }
 0x3ea   : > { %7716 = vmatprep.mubr.bf16.mxu0 %v6493_v56  ;;  %9022 = vmatpush3.bf16.msra.mxu1 %v9346_v25  ;;  %v9397_v25 = vld [vmem:[%s9779_s29 + $0x328] sm:$0xff]   ;;  %v9400_v56 = vld [vmem:[%s9779_s29 + $0x3f0] sm:$0xff]  }
 0x3eb   : > { %7756 = vmatprep.mubr.bf16.mxu1 %v6495_v18  ;;  %9001 = vmatprep.subr.bf16.mxu0 %v9347_v0  ;;  %v9398_v5 = vld [vmem:[%s9779_s29 + $0x3a8] sm:$0xff]   ;;  %v9399_v0 = vld [vmem:[%s9779_s29 + $0x370] sm:$0xff]  }
 0x3ec   : > { %9023 = vmatprep.subr.bf16.mxu1 %v9348_v8  ;;  %v9401_v8 = vld [vmem:[%s9779_s29 + $0x330] sm:$0xff]  }
 0x3ed   : > { %9002 = vmatpush3.bf16.msra.mxu0 %v9349_v21  ;;  %v9402_v18 = vld [vmem:[%s9779_s29 + $0x3b0] sm:$0xff]   ;;  %v9403_v21 = vld [vmem:[%s9779_s29 + $0x378] sm:$0xff]  }
 0x3ee   : > { %9024 = vmatpush3.bf16.msra.mxu1 %v9350_v4  ;;  %9003 = vmatprep.subr.bf16.mxu0 %v9351_v59  ;;  %v9404_v4 = vld [vmem:[%s9779_s29 + $0x3f8] sm:$0xff]  }
 0x3ef   : > { %9025 = vmatprep.subr.bf16.mxu1 %v9352_v60  ;;  %v9405_v59 = vld [vmem:[%s9779_s29 + $0x338] sm:$0xff]  }
 0x3f0   : > { %v9406_v60 = vld [vmem:[%s9779_s29 + $0x3b8] sm:$0xff]  }
 0x3f1   : > { %9004 = vmatpush3.bf16.msra.mxu0 %v9353_v40  ;;  %v1178_v40 = vrot.slane %v10719_v57, %v1145_v24 }
 0x3f2   : > { %9026 = vmatpush3.bf16.msra.mxu1 %v9354_v61  ;;  %9005 = vmatprep.subr.bf16.mxu0 %v9355_v42  ;;  %v1186_v61 = vrot.slane %v10719_v57, %v1153_v29  ;;  %v1182_v42 = vrot.slane %v10719_v57, %v1149_v26 }
 0x3f3   : > { %9027 = vmatprep.subr.bf16.mxu1 %v9356_v62  ;;  %v1190_v62 = vrot.slane %v10719_v57, %v1157_v37 }
 0x3f5   : > { %9006 = vmatpush3.bf16.msra.mxu0 %v9357_v63 }
 0x3f6   : > { %9028 = vmatpush3.bf16.msra.mxu1 %v9358_v1  ;;  %9007 = vmatprep.subr.bf16.mxu0 %v9359_v2 }
 0x3f7   : > { %9029 = vmatprep.subr.bf16.mxu1 %v9360_v3 }
 0x3f9   : > { %9008 = vmatpush3.bf16.msra.mxu0 %v9361_v6 }
 0x3fa   : > { %9030 = vmatpush3.bf16.msra.mxu1 %v9362_v7  ;;  %9009 = vmatprep.subr.bf16.mxu0 %v9363_v13 }
 0x3fb   : > { %9031 = vmatprep.subr.bf16.mxu1 %v9364_v9 }
 0x3fd   : > { %9010 = vmatpush3.bf16.msra.mxu0 %v9365_v10 }
 0x3fe   : > { %9032 = vmatpush3.bf16.msra.mxu1 %v9366_v11  ;;  %9011 = vmatprep.subr.bf16.mxu0 %v9367_v14 }
 0x3ff   : > { %9033 = vmatprep.subr.bf16.mxu1 %v9368_v15 }
 0x401   : > { %9012 = vmatpush3.bf16.msra.mxu0 %v9369_v22 }
 0x402   : > { %9034 = vmatpush3.bf16.msra.mxu1 %v9370_v19  ;;  %9013 = vmatprep.subr.bf16.mxu0 %v9371_v20 }
 0x403   : > { %9035 = vmatprep.subr.bf16.mxu1 %v9372_v54 }
 0x405   : > { %9014 = vmatpush3.bf16.msra.mxu0 %v9373_v23 }
 0x406   : > { %9036 = vmatpush3.bf16.msra.mxu1 %v9374_v28  ;;  %9043 = vmatprep.subr.bf16.mxu0 %v9375_v31 }
 0x407   : > { %9065 = vmatprep.subr.bf16.mxu1 %v9376_v33 }
 0x408   : > { %7717 = vmatmul.mubr.bf16.vlgmr.msra.gmra.mrb[24].mxu0 %v6492_v38 }
 0x409   : > { %7757 = vmatmul.mubr.bf16.vlgmr.msra.gmra.mrb[24].mxu1 %v6494_v43  ;;  %9044 = vmatpush3.bf16.msra.mxu0 %v9377_v36 }
 0x40a   : > { %9066 = vmatpush3.bf16.msra.mxu1 %v9378_v58  ;;  %9045 = vmatprep.subr.bf16.mxu0 %v9379_v12 }
 0x40b   : > { %9067 = vmatprep.subr.bf16.mxu1 %v9380_v44 }
 0x40d   : > { %9046 = vmatpush3.bf16.msra.mxu0 %v9381_v17 }
 0x40e   : > { %9068 = vmatpush3.bf16.msra.mxu1 %v9382_v45  ;;  %9047 = vmatprep.subr.bf16.mxu0 %v9383_v46 }
 0x40f   : > { %9069 = vmatprep.subr.bf16.mxu1 %v9384_v16 }
 0x411   : > { %9048 = vmatpush3.bf16.msra.mxu0 %v9385_v47 }
 0x412   : > { %9070 = vmatpush3.bf16.msra.mxu1 %v9386_v48  ;;  %9049 = vmatprep.subr.bf16.mxu0 %v9387_v41 }
 0x413   : > { %9071 = vmatprep.subr.bf16.mxu1 %v9388_v49 }
 0x415   : > { %9050 = vmatpush3.bf16.msra.mxu0 %v9389_v50 }
 0x416   : > { %9072 = vmatpush3.bf16.msra.mxu1 %v9390_v51  ;;  %9051 = vmatprep.subr.bf16.mxu0 %v9391_v34 }
 0x417   : > { %9073 = vmatprep.subr.bf16.mxu1 %v9392_v52 }
 0x419   : > { %9052 = vmatpush3.bf16.msra.mxu0 %v9393_v35 }
 0x41a   : > { %9074 = vmatpush3.bf16.msra.mxu1 %v9394_v39  ;;  %9053 = vmatprep.subr.bf16.mxu0 %v9395_v53 }
 0x41b   : > { %9075 = vmatprep.subr.bf16.mxu1 %v9396_v55 }
 0x41d   : > { %9054 = vmatpush3.bf16.msra.mxu0 %v9397_v25 }
 0x41e   : > { %9076 = vmatpush3.bf16.msra.mxu1 %v9398_v5  ;;  %9055 = vmatprep.subr.bf16.mxu0 %v9399_v0 }
 0x41f   : > { %9077 = vmatprep.subr.bf16.mxu1 %v9400_v56 }
 0x421   : > { %9056 = vmatpush3.bf16.msra.mxu0 %v9401_v8 }
 0x422   : > { %9078 = vmatpush3.bf16.msra.mxu1 %v9402_v18  ;;  %9057 = vmatprep.subr.bf16.mxu0 %v9403_v21 }
 0x423   : > { %9079 = vmatprep.subr.bf16.mxu1 %v9404_v4 }
 0x425   : > { %9058 = vmatpush3.bf16.msra.mxu0 %v9405_v59 }
 0x426   : > { %9080 = vmatpush3.bf16.msra.mxu1 %v9406_v60 }
 0x47b   : > { %v6296_v63 = vpop.f32.mrb[12].mxu0  ;;  %v6460_v2 = vpop.f32.mrb[12].mxu1 }
 0x47c   : > { %v9099_v1 = vadd.f32 %v6296_v63, %v1178_v40  ;;  %v6298_v3 = vpop.f32.mrb[13].mxu0  ;;  %v9101_v6 = vadd.f32 %v6460_v2, %v1186_v61  ;;  %v6462_v13 = vpop.f32.mrb[13].mxu1  ;;  %v6483_v2 = vld [vmem:[%s10924_s4] sm:$0xff] }
 0x47d   : > { %v9100_v7 = vadd.f32 %v6298_v3, %v1182_v42  ;;  %v6300_v24 = vpop.f32.mrb[14].mxu0  ;;  %v9102_v10 = vadd.f32 %v6462_v13, %v1190_v62  ;;  %v6464_v11 = vpop.f32.mrb[14].mxu1 }
 0x47e   : > { %v6479_v9 = vmax.f32 %v9099_v1, 0.0  ;;  %v6301_v29 = vpop.f32.mrb[15].mxu0  ;;  %v6481_v14 = vmax.f32 %v9101_v6, 0.0  ;;  %v6465_v22 = vpop.f32.mrb[15].mxu1 }
 0x47f   : > { %v6480_v15 = vmax.f32 %v9100_v7, 0.0  ;;  %v6482_v26 = vmax.f32 %v9102_v10, 0.0 }
 0x480   : > { %v6496_v30 = vpack.c.bf16 %v6479_v9, %v6479_v9  ;;  %v6498_v57 = vpack.c.bf16 %v6481_v14, %v6481_v14 }
 0x481   : > { %v6497_v19 = vpack.c.bf16 %v6480_v15, %v6480_v15  ;;  %v6499_v20 = vpack.c.bf16 %v6482_v26, %v6482_v26 }
 0x483   : > { %7796 = vmatprep.mubr.bf16.mxu0 %v6497_v19  ;;  %7836 = vmatprep.mubr.bf16.mxu1 %v6499_v20 }
 0x484   : > { %7797 = vmatmul.mubr.bf16.vlgmr.msra.gmra.mrb[28].mxu0 %v6496_v30  ;;  %7837 = vmatmul.mubr.bf16.vlgmr.msra.gmra.mrb[28].mxu1 %v6498_v57 }
 0x49b   : > { %v8927_v37 = vpop.f32.mrb[16].mxu0  ;;  %v8949_v54 = vpop.f32.mrb[16].mxu1 }
 0x49c   : > { %v8928_v23 = vpop.f32.mrb[17].mxu0  ;;  %v8950_v28 = vpop.f32.mrb[17].mxu1 }
 0x49d   : > { %v8929_v27 = vadd.f32 %v8928_v23, %v8927_v37  ;;  %v8930_v31 = vpop.f32.mrb[18].mxu0  ;;  %v8951_v32 = vadd.f32 %v8950_v28, %v8949_v54  ;;  %v8952_v33 = vpop.f32.mrb[18].mxu1 }
 0x49e   : > { %v8931_v36 = vpop.f32.mrb[19].mxu0  ;;  %v8953_v38 = vpop.f32.mrb[19].mxu1 }
 0x49f   : > { %v7599_v58 = vadd.f32 %v8951_v32, %v8929_v27 }
 0x4bb   : > { %v8971_v12 = vpop.f32.mrb[20].mxu0 }
 0x4bc   : > { %v8993_v43 = vpop.f32.mrb[20].mxu1  ;;  %v8972_v44 = vpop.f32.mrb[21].mxu0 }
 0x4bd   : > { %v8973_v17 = vadd.f32 %v8972_v44, %v8971_v12  ;;  %v8994_v45 = vpop.f32.mrb[21].mxu1  ;;  %v8974_v46 = vpop.f32.mrb[22].mxu0 }
 0x4be   : > { %v8995_v16 = vadd.f32 %v8994_v45, %v8993_v43  ;;  %v8996_v47 = vpop.f32.mrb[22].mxu1  ;;  %v8975_v48 = vpop.f32.mrb[23].mxu0 }
 0x4bf   : > { %v7639_v41 = vadd.f32 %v8973_v17, %v7599_v58  ;;  %v8997_v49 = vpop.f32.mrb[23].mxu1 }
 0x4c1   : > { %v7679_v50 = vadd.f32 %v8995_v16, %v7639_v41 }
 0x4db   : > { %v9015_v51 = vpop.f32.mrb[24].mxu0 }
 0x4dc   : > { %v9037_v34 = vpop.f32.mrb[24].mxu1  ;;  %v9016_v52 = vpop.f32.mrb[25].mxu0 }
 0x4dd   : > { %v9017_v35 = vadd.f32 %v9016_v52, %v9015_v51  ;;  %v9038_v39 = vpop.f32.mrb[25].mxu1  ;;  %v9018_v53 = vpop.f32.mrb[26].mxu0 }
 0x4de   : > { %v9039_v55 = vadd.f32 %v9038_v39, %v9037_v34  ;;  %v9040_v25 = vpop.f32.mrb[26].mxu1  ;;  %v9019_v5 = vpop.f32.mrb[27].mxu0 }
 0x4df   : > { %v7719_v0 = vadd.f32 %v9017_v35, %v7679_v50  ;;  %v9041_v56 = vpop.f32.mrb[27].mxu1 }
 0x4e1   : > { %v7759_v8 = vadd.f32 %v9039_v55, %v7719_v0 }
 0x557   : > { %v9059_v18 = vpop.f32.mrb[28].mxu0  ;;  %v9081_v21 = vpop.f32.mrb[28].mxu1 }
 0x558   : > { %v9060_v4 = vpop.f32.mrb[29].mxu0  ;;  %v9082_v60 = vpop.f32.mrb[29].mxu1 }
 0x559   : > { %v9061_v59 = vadd.f32 %v9060_v4, %v9059_v18  ;;  %v9062_v40 = vpop.f32.mrb[30].mxu0  ;;  %v9083_v61 = vadd.f32 %v9082_v60, %v9081_v21  ;;  %v9084_v42 = vpop.f32.mrb[30].mxu1 }
 0x55a   : > { %v9063_v62 = vpop.f32.mrb[31].mxu0  ;;  %v9085_v1 = vpop.f32.mrb[31].mxu1 }
 0x55b   : > { %v7799_v63 = vadd.f32 %v9061_v59, %v7759_v8 }
 0x55d   : > { %v7839_v3 = vadd.f32 %v9083_v61, %v7799_v63 }
 0x55f   : > { %v7844_v6 = vadd.f32 %v7839_v3, %v6483_v2 }
 0x561   : > { %7845 = vst [vmem:[%s10924_s4] sm:$0xff] %v7844_v6 }
 0x562 PF: > { %s20_s20 = sadd.s32 1, %s9554_s20   ;;  %s10934_s15 = smov %s9538_s16 }
 0x563   : > { %p17_p1 = scmp.ge.s32.totalorder %s20_s20, 4   ;;  %s10935_s16 = smov %s9542_s17 }
 0x564   : > { %s10936_s17 = smov %s9636_s26  ;;  %s10937_s18 = smov %s9550_s19 }
 0x565   : > { %s10938_s19 = smov %s10940_s22  ;;  %19 = sbr.rel (!%p17_p1) target bundleno = 6 (0x6), region = 104 }
 0x56c   :  { %7865 = vsyncpa [#allocation3], 1 }
 0x56d   :  { %7867 = vsyncpa [#allocation3 + $0x1], 1 }
 0x56e   :  { %7868 = vsyncpa [#allocation5], 1 }
 0x56f   :  { %7870 = vsyncpa [#allocation5 + $0x1], 1 }

</bundles_post_ra>
